<compile_context>
chip_gen: v6e
topology: v6e:2x2x1
jax: 0.10.0
libtpu: 0.0.40
codegen_flags: <defaults>
</compile_context>

<pallas_src>
import functools
import math

import jax
import jax.numpy as jnp
from jax.experimental import pallas as pl
from jax.experimental.pallas import tpu as pltpu

LN_EPS = 1e-5

# Fixed ordering of the weight slabs passed to the fused kernel.
_WEIGHT_ORDER = (
    # encoder (stacked over layers)
    "e_wqkv", "e_bqkv", "e_wo", "e_bo", "e_g1", "e_be1",
    "e_w1", "e_c1", "e_w2", "e_c2", "e_g2", "e_be2",
    # decoder (stacked over layers)
    "d_swqkv", "d_sbqkv", "d_swo", "d_sbo", "d_g1", "d_be1",
    "d_cwqkv", "d_cbqkv", "d_cwo", "d_cbo", "d_g2", "d_be2",
    "d_w1", "d_c1", "d_w2", "d_c2", "d_g3", "d_be3",
    # latent + output projection
    "lat_w", "lat_b", "out_w", "out_b",
)


# ----------------------------- in-kernel helpers -----------------------------

def _layernorm(y, g, b):
    mu = jnp.mean(y, axis=-1, keepdims=True)
    yc = y - mu
    var = jnp.mean(yc * yc, axis=-1, keepdims=True)
    return yc * jax.lax.rsqrt(var + LN_EPS) * g + b


def _attention(xq, xkv, wqkv, bqkv, wo, bo, heads, self_attn):
    """Multi-head attention on VMEM-resident values.

    xq: (Sq, D) queries, xkv: (Sk, D) keys/values source.
    wqkv: (D, 3D) fused projection (1/sqrt(Dh) pre-folded into the Q columns),
    bqkv: (1, 3D), wo: (D, D), bo: (1, D).
    """
    d = xq.shape[-1]
    dh = d // heads
    if self_attn:
        qkv = jnp.dot(xq, wqkv, preferred_element_type=jnp.float32) + bqkv      # (S, 3D)
        q, k, v = qkv[:, :d], qkv[:, d:2 * d], qkv[:, 2 * d:]
    else:
        q = jnp.dot(xq, wqkv[:, :d], preferred_element_type=jnp.float32) + bqkv[:, :d]
        kv = jnp.dot(xkv, wqkv[:, d:], preferred_element_type=jnp.float32) + bqkv[:, d:]
        k, v = kv[:, :d], kv[:, d:]

    heads_out = []
    for h in range(heads):                      # static unroll; lane slices are static
        sl = slice(h * dh, (h + 1) * dh)
        qh, kh, vh = q[:, sl], k[:, sl], v[:, sl]
        s = jax.lax.dot_general(qh, kh, (((1,), (1,)), ((), ())),
                                preferred_element_type=jnp.float32)             # (Sq, Sk)
        s = s - jnp.max(s, axis=-1, keepdims=True)
        p = jnp.exp(s)
        p = p * pl.reciprocal(jnp.sum(p, axis=-1, keepdims=True), approx=True)
        heads_out.append(jnp.dot(p, vh, preferred_element_type=jnp.float32))    # (Sq, Dh)
    o = jnp.concatenate(heads_out, axis=-1)                                     # (Sq, D)
    return jnp.dot(o, wo, preferred_element_type=jnp.float32) + bo


def _ffn(x, w1, c1, w2, c2):
    h = jnp.dot(x, w1, preferred_element_type=jnp.float32) + c1
    h = jnp.maximum(h, 0.0)
    return jnp.dot(h, w2, preferred_element_type=jnp.float32) + c2


# ----------------------------- fused whole-model kernel -----------------------------

def _vae_kernel(*refs, n_layers, heads):
    (x_ref, eps_ref,
     e_wqkv, e_bqkv, e_wo, e_bo, e_g1, e_be1,
     e_w1, e_c1, e_w2, e_c2, e_g2, e_be2,
     d_swqkv, d_sbqkv, d_swo, d_sbo, d_g1, d_be1,
     d_cwqkv, d_cbqkv, d_cwo, d_cbo, d_g2, d_be2,
     d_w1, d_c1, d_w2, d_c2, d_g3, d_be3,
     lat_w, lat_b, out_w, out_b,
     recon_ref, z_ref, mean_ref, lv_ref) = refs

    x = x_ref[0].astype(jnp.float32)      # (S, D)
    eps = eps_ref[0].astype(jnp.float32)  # (S, L)

    # ---- encoder (post-norm TransformerEncoderLayer, relu, dropout = identity) ----
    h = x
    for l in range(n_layers):
        a = _attention(h, h, e_wqkv[l], e_bqkv[l], e_wo[l], e_bo[l], heads, True)
        h = _layernorm(h + a, e_g1[l], e_be1[l])
        f = _ffn(h, e_w1[l], e_c1[l], e_w2[l], e_c2[l])
        h = _layernorm(h + f, e_g2[l], e_be2[l])

    # ---- to_latent + chunk + reparameterize ----
    ml = jnp.dot(h, lat_w[...], preferred_element_type=jnp.float32) + lat_b[...]  # (S, 2L)
    lat = ml.shape[-1] // 2
    mean = ml[:, :lat]
    log_var = ml[:, lat:]
    z = mean + eps * jnp.exp(0.5 * log_var)

    # ---- decoder (post-norm TransformerDecoderLayer), memory = z ----
    t = z
    for l in range(n_layers):
        a = _attention(t, t, d_swqkv[l], d_sbqkv[l], d_swo[l], d_sbo[l], heads, True)
        t = _layernorm(t + a, d_g1[l], d_be1[l])
        a = _attention(t, z, d_cwqkv[l], d_cbqkv[l], d_cwo[l], d_cbo[l], heads, False)
        t = _layernorm(t + a, d_g2[l], d_be2[l])
        f = _ffn(t, d_w1[l], d_c1[l], d_w2[l], d_c2[l])
        t = _layernorm(t + f, d_g3[l], d_be3[l])

    recon = jnp.dot(t, out_w[...], preferred_element_type=jnp.float32) + out_b[...]

    recon_ref[0] = recon.astype(recon_ref.dtype)
    z_ref[0] = z.astype(z_ref.dtype)
    mean_ref[0] = mean.astype(mean_ref.dtype)
    lv_ref[0] = log_var.astype(lv_ref.dtype)


# ----------------------------- model wrapper -----------------------------

@functools.partial(jax.jit, static_argnames=("heads",))
def transformer_vae_v2_forward(x_sbd, params, eps_sbd, *, heads):
    # PyTorch batch_first=False layout (S, B, D) -> batch-major ONCE at the boundary.
    x = jnp.transpose(x_sbd, (1, 0, 2))      # (B, S, D)
    eps = jnp.transpose(eps_sbd, (1, 0, 2))  # (B, S, L)
    B, S, D = x.shape
    L = eps.shape[-1]
    n_layers = int(params["e_wqkv"].shape[0])

    weights = [params[k] for k in _WEIGHT_ORDER]

    def _rep(a):  # replicated full-array block; constant index map => fetched once
        return pl.BlockSpec(a.shape, lambda b, _n=a.ndim: (0,) * _n)

    def _io(last):
        return pl.BlockSpec((1, S, last), lambda b: (b, 0, 0))

    recon, z, mean, log_var = pl.pallas_call(
        functools.partial(_vae_kernel, n_layers=n_layers, heads=heads),
        grid=(B,),
        out_shape=(jax.ShapeDtypeStruct((B, S, D), jnp.float32),
                   jax.ShapeDtypeStruct((B, S, L), jnp.float32),
                   jax.ShapeDtypeStruct((B, S, L), jnp.float32),
                   jax.ShapeDtypeStruct((B, S, L), jnp.float32)),
        in_specs=[_io(D), _io(L)] + [_rep(w) for w in weights],
        out_specs=(_io(D), _io(L), _io(L), _io(L)),
        compiler_params=pltpu.CompilerParams(dimension_semantics=("parallel",)),
    )(x, eps, *weights)

    back = lambda a: jnp.transpose(a, (1, 0, 2))  # -> (S, B, ...)
    return back(recon), x_sbd, back(z), back(mean), back(log_var)


# ----------------------------- parameter init (pre-packed) -----------------------------

def _randn(key, shape, scale=0.02):
    return scale * jax.random.normal(key, shape, jnp.float32)


def init_params(key, d, f, latent_dim, n_layers, heads):
    """Weights pre-packed for the kernel: x @ W layout (PyTorch W.T), fused QKV slabs,
    1/sqrt(Dh) folded into Q, per-layer weights stacked by kind."""
    sc_q = 1.0 / math.sqrt(d // heads)
    ks = iter(jax.random.split(key, 40 * n_layers + 16))

    def attn_params():
        wqkv = _randn(next(ks), (d, 3 * d)).at[:, :d].multiply(sc_q)
        bqkv = _randn(next(ks), (1, 3 * d), 0.01).at[:, :d].multiply(sc_q)
        wo = _randn(next(ks), (d, d))
        bo = _randn(next(ks), (1, d), 0.01)
        return wqkv, bqkv, wo, bo

    def ffn_params():
        return (_randn(next(ks), (d, f)), _randn(next(ks), (1, f), 0.01),
                _randn(next(ks), (f, d)), _randn(next(ks), (1, d), 0.01))

    def ln_params():
        return jnp.ones((1, d), jnp.float32), jnp.zeros((1, d), jnp.float32)

    p = {}

    def stack(prefix, per_layer_fn, names):
        cols = [per_layer_fn() for _ in range(n_layers)]
        for i, name in enumerate(names):
            p[prefix + name] = jnp.stack([c[i] for c in cols])

    stack("e_", lambda: attn_params() + ln_params() + ffn_params() + ln_params(),
          ("wqkv", "bqkv", "wo", "bo", "g1", "be1",
           "w1", "c1", "w2", "c2", "g2", "be2"))
    stack("d_", lambda: (attn_params() + ln_params() + attn_params() + ln_params()
                         + ffn_params() + ln_params()),
          ("swqkv", "sbqkv", "swo", "sbo", "g1", "be1",
           "cwqkv", "cbqkv", "cwo", "cbo", "g2", "be2",
           "w1", "c1", "w2", "c2", "g3", "be3"))

    p["lat_w"] = _randn(next(ks), (d, 2 * latent_dim))           # to_latent: Linear(D, 2L)
    p["lat_b"] = _randn(next(ks), (1, 2 * latent_dim), 0.01)
    p["out_w"] = _randn(next(ks), (d, d))                        # output_layer: Linear(D, D)
    p["out_b"] = _randn(next(ks), (1, d), 0.01)
    return p


# ----------------------------- main -----------------------------

if __name__ == "__main__":
    S, B = 8, 2                 # (seq, batch) — batch_first=False convention at the interface
    D, H, F, NL = 32, 4, 64, 2  # input_dim, heads, dim_feedforward, n_layers
    L = D                       # latent_dim must equal input_dim (see NOTE above)

    key = jax.random.PRNGKey(0)
    kx, kp, ke = jax.random.split(key, 3)
    x = jax.random.normal(kx, (S, B, D), dtype=jnp.float32)
    params = init_params(kp, D, F, L, NL, H)
    eps = jax.random.normal(ke, (S, B, L), dtype=jnp.float32)  # deterministic "randn_like"

    outs = transformer_vae_v2_forward(x, params, eps, heads=H)
    jax.block_until_ready(outs)
    recon, x_out, z, mean, log_var = outs

    assert recon.shape == (S, B, D) and x_out.shape == (S, B, D)
    assert z.shape == (S, B, L) and mean.shape == (S, B, L) and log_var.shape == (S, B, L)
    assert all(bool(jnp.all(jnp.isfinite(a))) for a in (recon, z, mean, log_var))
    print("KERNEL_OK")
</pallas_src>

<mosaic_0001>
module attributes {stable_mosaic.version = 11 : i64} {
  func.func @_vae_kernel(%arg0: i32, %arg1: memref<1x8x32xf32, #tpu.memory_space<vmem>>, %arg2: memref<1x8x32xf32, #tpu.memory_space<vmem>>, %arg3: memref<2x32x96xf32, #tpu.memory_space<vmem>>, %arg4: memref<2x1x96xf32, #tpu.memory_space<vmem>>, %arg5: memref<2x32x32xf32, #tpu.memory_space<vmem>>, %arg6: memref<2x1x32xf32, #tpu.memory_space<vmem>>, %arg7: memref<2x1x32xf32, #tpu.memory_space<vmem>>, %arg8: memref<2x1x32xf32, #tpu.memory_space<vmem>>, %arg9: memref<2x32x64xf32, #tpu.memory_space<vmem>>, %arg10: memref<2x1x64xf32, #tpu.memory_space<vmem>>, %arg11: memref<2x64x32xf32, #tpu.memory_space<vmem>>, %arg12: memref<2x1x32xf32, #tpu.memory_space<vmem>>, %arg13: memref<2x1x32xf32, #tpu.memory_space<vmem>>, %arg14: memref<2x1x32xf32, #tpu.memory_space<vmem>>, %arg15: memref<2x32x96xf32, #tpu.memory_space<vmem>>, %arg16: memref<2x1x96xf32, #tpu.memory_space<vmem>>, %arg17: memref<2x32x32xf32, #tpu.memory_space<vmem>>, %arg18: memref<2x1x32xf32, #tpu.memory_space<vmem>>, %arg19: memref<2x1x32xf32, #tpu.memory_space<vmem>>, %arg20: memref<2x1x32xf32, #tpu.memory_space<vmem>>, %arg21: memref<2x32x96xf32, #tpu.memory_space<vmem>>, %arg22: memref<2x1x96xf32, #tpu.memory_space<vmem>>, %arg23: memref<2x32x32xf32, #tpu.memory_space<vmem>>, %arg24: memref<2x1x32xf32, #tpu.memory_space<vmem>>, %arg25: memref<2x1x32xf32, #tpu.memory_space<vmem>>, %arg26: memref<2x1x32xf32, #tpu.memory_space<vmem>>, %arg27: memref<2x32x64xf32, #tpu.memory_space<vmem>>, %arg28: memref<2x1x64xf32, #tpu.memory_space<vmem>>, %arg29: memref<2x64x32xf32, #tpu.memory_space<vmem>>, %arg30: memref<2x1x32xf32, #tpu.memory_space<vmem>>, %arg31: memref<2x1x32xf32, #tpu.memory_space<vmem>>, %arg32: memref<2x1x32xf32, #tpu.memory_space<vmem>>, %arg33: memref<32x64xf32, #tpu.memory_space<vmem>>, %arg34: memref<1x64xf32, #tpu.memory_space<vmem>>, %arg35: memref<32x32xf32, #tpu.memory_space<vmem>>, %arg36: memref<1x32xf32, #tpu.memory_space<vmem>>, %arg37: memref<1x8x32xf32, #tpu.memory_space<vmem>>, %arg38: memref<1x8x32xf32, #tpu.memory_space<vmem>>, %arg39: memref<1x8x32xf32, #tpu.memory_space<vmem>>, %arg40: memref<1x8x32xf32, #tpu.memory_space<vmem>>) attributes {dimension_semantics = [#tpu.dimension_semantics<parallel>], iteration_bounds = array<i64: 2>, scalar_prefetch = 0 : i64, scratch_operands = 0 : i64, tpu.core_type = #tpu.core_type<tc>, window_params = [{transform_indices = @transform_0, window_bounds = array<i64: 1, 8, 32>}, {transform_indices = @transform_1, window_bounds = array<i64: 1, 8, 32>}, {pipeline_mode = #tpu.pipeline_mode<synchronous>, transform_indices = @transform_2, window_bounds = array<i64: 2, 32, 96>}, {pipeline_mode = #tpu.pipeline_mode<synchronous>, transform_indices = @transform_3, window_bounds = array<i64: 2, 1, 96>}, {pipeline_mode = #tpu.pipeline_mode<synchronous>, transform_indices = @transform_4, window_bounds = array<i64: 2, 32, 32>}, {pipeline_mode = #tpu.pipeline_mode<synchronous>, transform_indices = @transform_5, window_bounds = array<i64: 2, 1, 32>}, {pipeline_mode = #tpu.pipeline_mode<synchronous>, transform_indices = @transform_6, window_bounds = array<i64: 2, 1, 32>}, {pipeline_mode = #tpu.pipeline_mode<synchronous>, transform_indices = @transform_7, window_bounds = array<i64: 2, 1, 32>}, {pipeline_mode = #tpu.pipeline_mode<synchronous>, transform_indices = @transform_8, window_bounds = array<i64: 2, 32, 64>}, {pipeline_mode = #tpu.pipeline_mode<synchronous>, transform_indices = @transform_9, window_bounds = array<i64: 2, 1, 64>}, {pipeline_mode = #tpu.pipeline_mode<synchronous>, transform_indices = @transform_10, window_bounds = array<i64: 2, 64, 32>}, {pipeline_mode = #tpu.pipeline_mode<synchronous>, transform_indices = @transform_11, window_bounds = array<i64: 2, 1, 32>}, {pipeline_mode = #tpu.pipeline_mode<synchronous>, transform_indices = @transform_12, window_bounds = array<i64: 2, 1, 32>}, {pipeline_mode = #tpu.pipeline_mode<synchronous>, transform_indices = @transform_13, window_bounds = array<i64: 2, 1, 32>}, {pipeline_mode = #tpu.pipeline_mode<synchronous>, transform_indices = @transform_14, window_bounds = array<i64: 2, 32, 96>}, {pipeline_mode = #tpu.pipeline_mode<synchronous>, transform_indices = @transform_15, window_bounds = array<i64: 2, 1, 96>}, {pipeline_mode = #tpu.pipeline_mode<synchronous>, transform_indices = @transform_16, window_bounds = array<i64: 2, 32, 32>}, {pipeline_mode = #tpu.pipeline_mode<synchronous>, transform_indices = @transform_17, window_bounds = array<i64: 2, 1, 32>}, {pipeline_mode = #tpu.pipeline_mode<synchronous>, transform_indices = @transform_18, window_bounds = array<i64: 2, 1, 32>}, {pipeline_mode = #tpu.pipeline_mode<synchronous>, transform_indices = @transform_19, window_bounds = array<i64: 2, 1, 32>}, {pipeline_mode = #tpu.pipeline_mode<synchronous>, transform_indices = @transform_20, window_bounds = array<i64: 2, 32, 96>}, {pipeline_mode = #tpu.pipeline_mode<synchronous>, transform_indices = @transform_21, window_bounds = array<i64: 2, 1, 96>}, {pipeline_mode = #tpu.pipeline_mode<synchronous>, transform_indices = @transform_22, window_bounds = array<i64: 2, 32, 32>}, {pipeline_mode = #tpu.pipeline_mode<synchronous>, transform_indices = @transform_23, window_bounds = array<i64: 2, 1, 32>}, {pipeline_mode = #tpu.pipeline_mode<synchronous>, transform_indices = @transform_24, window_bounds = array<i64: 2, 1, 32>}, {pipeline_mode = #tpu.pipeline_mode<synchronous>, transform_indices = @transform_25, window_bounds = array<i64: 2, 1, 32>}, {pipeline_mode = #tpu.pipeline_mode<synchronous>, transform_indices = @transform_26, window_bounds = array<i64: 2, 32, 64>}, {pipeline_mode = #tpu.pipeline_mode<synchronous>, transform_indices = @transform_27, window_bounds = array<i64: 2, 1, 64>}, {pipeline_mode = #tpu.pipeline_mode<synchronous>, transform_indices = @transform_28, window_bounds = array<i64: 2, 64, 32>}, {pipeline_mode = #tpu.pipeline_mode<synchronous>, transform_indices = @transform_29, window_bounds = array<i64: 2, 1, 32>}, {pipeline_mode = #tpu.pipeline_mode<synchronous>, transform_indices = @transform_30, window_bounds = array<i64: 2, 1, 32>}, {pipeline_mode = #tpu.pipeline_mode<synchronous>, transform_indices = @transform_31, window_bounds = array<i64: 2, 1, 32>}, {pipeline_mode = #tpu.pipeline_mode<synchronous>, transform_indices = @transform_32, window_bounds = array<i64: 32, 64>}, {pipeline_mode = #tpu.pipeline_mode<synchronous>, transform_indices = @transform_33, window_bounds = array<i64: 1, 64>}, {pipeline_mode = #tpu.pipeline_mode<synchronous>, transform_indices = @transform_34, window_bounds = array<i64: 32, 32>}, {pipeline_mode = #tpu.pipeline_mode<synchronous>, transform_indices = @transform_35, window_bounds = array<i64: 1, 32>}, {transform_indices = @transform_36, window_bounds = array<i64: 1, 8, 32>}, {transform_indices = @transform_37, window_bounds = array<i64: 1, 8, 32>}, {transform_indices = @transform_38, window_bounds = array<i64: 1, 8, 32>}, {transform_indices = @transform_39, window_bounds = array<i64: 1, 8, 32>}]} {
    %c0 = arith.constant 0 : index
    %c0_0 = arith.constant 0 : index
    %c0_1 = arith.constant 0 : index
    %0 = vector.load %arg1[%c0, %c0_0, %c0_1] : memref<1x8x32xf32, #tpu.memory_space<vmem>>, vector<1x8x32xf32>
    %1 = vector.shape_cast %0 : vector<1x8x32xf32> to vector<8x32xf32>
    %c0_2 = arith.constant 0 : index
    %c0_3 = arith.constant 0 : index
    %c0_4 = arith.constant 0 : index
    %2 = vector.load %arg2[%c0_2, %c0_3, %c0_4] : memref<1x8x32xf32, #tpu.memory_space<vmem>>, vector<1x8x32xf32>
    %3 = vector.shape_cast %2 : vector<1x8x32xf32> to vector<8x32xf32>
    %c0_5 = arith.constant 0 : index
    %c0_6 = arith.constant 0 : index
    %c0_7 = arith.constant 0 : index
    %4 = vector.load %arg3[%c0_5, %c0_6, %c0_7] : memref<2x32x96xf32, #tpu.memory_space<vmem>>, vector<1x32x96xf32>
    %5 = vector.shape_cast %4 : vector<1x32x96xf32> to vector<32x96xf32>
    %c0_8 = arith.constant 0 : index
    %c0_9 = arith.constant 0 : index
    %c0_10 = arith.constant 0 : index
    %6 = vector.load %arg4[%c0_8, %c0_9, %c0_10] : memref<2x1x96xf32, #tpu.memory_space<vmem>>, vector<1x1x96xf32>
    %7 = vector.shape_cast %6 : vector<1x1x96xf32> to vector<1x96xf32>
    %c0_11 = arith.constant 0 : index
    %c0_12 = arith.constant 0 : index
    %c0_13 = arith.constant 0 : index
    %8 = vector.load %arg5[%c0_11, %c0_12, %c0_13] : memref<2x32x32xf32, #tpu.memory_space<vmem>>, vector<1x32x32xf32>
    %9 = vector.shape_cast %8 : vector<1x32x32xf32> to vector<32x32xf32>
    %c0_14 = arith.constant 0 : index
    %c0_15 = arith.constant 0 : index
    %c0_16 = arith.constant 0 : index
    %10 = vector.load %arg6[%c0_14, %c0_15, %c0_16] : memref<2x1x32xf32, #tpu.memory_space<vmem>>, vector<1x1x32xf32>
    %11 = vector.shape_cast %10 : vector<1x1x32xf32> to vector<1x32xf32>
    %cst = arith.constant dense<0.000000e+00> : vector<8x96xf32>
    %12 = tpu.matmul %1, %5, %cst {dimension_numbers = #tpu.dot_dimension_numbers<[1], [0], [0], [1], [0, 0, 1, 1], [], []>} : vector<8x32xf32>, vector<32x96xf32>, vector<8x96xf32> -> vector<8x96xf32>
    %13 = vector.broadcast %7 : vector<1x96xf32> to vector<8x96xf32>
    %14 = arith.addf %12, %13 : vector<8x96xf32>
    %15 = vector.extract_strided_slice %14 {offsets = [0, 0], sizes = [8, 32], strides = [1, 1]} : vector<8x96xf32> to vector<8x32xf32>
    %16 = vector.extract_strided_slice %14 {offsets = [0, 32], sizes = [8, 32], strides = [1, 1]} : vector<8x96xf32> to vector<8x32xf32>
    %17 = vector.extract_strided_slice %14 {offsets = [0, 64], sizes = [8, 32], strides = [1, 1]} : vector<8x96xf32> to vector<8x32xf32>
    %18 = vector.extract_strided_slice %15 {offsets = [0, 0], sizes = [8, 8], strides = [1, 1]} : vector<8x32xf32> to vector<8x8xf32>
    %19 = vector.extract_strided_slice %16 {offsets = [0, 0], sizes = [8, 8], strides = [1, 1]} : vector<8x32xf32> to vector<8x8xf32>
    %20 = vector.extract_strided_slice %17 {offsets = [0, 0], sizes = [8, 8], strides = [1, 1]} : vector<8x32xf32> to vector<8x8xf32>
    %cst_17 = arith.constant dense<0.000000e+00> : vector<8x8xf32>
    %21 = tpu.matmul %18, %19, %cst_17 {dimension_numbers = #tpu.dot_dimension_numbers<[1], [1], [0], [0], [0, 0, 1, 0], [], []>} : vector<8x8xf32>, vector<8x8xf32>, vector<8x8xf32> -> vector<8x8xf32>
    %cst_18 = arith.constant dense<0xFF800000> : vector<8xf32>
    %22 = vector.multi_reduction <maximumf>, %21, %cst_18 [1] : vector<8x8xf32> to vector<8xf32>
    %23 = vector.shape_cast %22 : vector<8xf32> to vector<8x1xf32>
    %24 = vector.broadcast %23 : vector<8x1xf32> to vector<8x8xf32>
    %25 = arith.subf %21, %24 : vector<8x8xf32>
    %26 = math.exp %25 : vector<8x8xf32>
    %cst_19 = arith.constant dense<0.000000e+00> : vector<8xf32>
    %27 = vector.multi_reduction <add>, %26, %cst_19 [1] : vector<8x8xf32> to vector<8xf32>
    %28 = vector.shape_cast %27 : vector<8xf32> to vector<8x1xf32>
    %29 = tpu.reciprocal %28 {approx = true} : vector<8x1xf32> -> vector<8x1xf32>
    %30 = vector.broadcast %29 : vector<8x1xf32> to vector<8x8xf32>
    %31 = arith.mulf %26, %30 : vector<8x8xf32>
    %cst_20 = arith.constant dense<0.000000e+00> : vector<8x8xf32>
    %32 = tpu.matmul %31, %20, %cst_20 {dimension_numbers = #tpu.dot_dimension_numbers<[1], [0], [0], [1], [0, 0, 1, 1], [], []>} : vector<8x8xf32>, vector<8x8xf32>, vector<8x8xf32> -> vector<8x8xf32>
    %33 = vector.extract_strided_slice %15 {offsets = [0, 8], sizes = [8, 8], strides = [1, 1]} : vector<8x32xf32> to vector<8x8xf32>
    %34 = vector.extract_strided_slice %16 {offsets = [0, 8], sizes = [8, 8], strides = [1, 1]} : vector<8x32xf32> to vector<8x8xf32>
    %35 = vector.extract_strided_slice %17 {offsets = [0, 8], sizes = [8, 8], strides = [1, 1]} : vector<8x32xf32> to vector<8x8xf32>
    %cst_21 = arith.constant dense<0.000000e+00> : vector<8x8xf32>
    %36 = tpu.matmul %33, %34, %cst_21 {dimension_numbers = #tpu.dot_dimension_numbers<[1], [1], [0], [0], [0, 0, 1, 0], [], []>} : vector<8x8xf32>, vector<8x8xf32>, vector<8x8xf32> -> vector<8x8xf32>
    %cst_22 = arith.constant dense<0xFF800000> : vector<8xf32>
    %37 = vector.multi_reduction <maximumf>, %36, %cst_22 [1] : vector<8x8xf32> to vector<8xf32>
    %38 = vector.shape_cast %37 : vector<8xf32> to vector<8x1xf32>
    %39 = vector.broadcast %38 : vector<8x1xf32> to vector<8x8xf32>
    %40 = arith.subf %36, %39 : vector<8x8xf32>
    %41 = math.exp %40 : vector<8x8xf32>
    %cst_23 = arith.constant dense<0.000000e+00> : vector<8xf32>
    %42 = vector.multi_reduction <add>, %41, %cst_23 [1] : vector<8x8xf32> to vector<8xf32>
    %43 = vector.shape_cast %42 : vector<8xf32> to vector<8x1xf32>
    %44 = tpu.reciprocal %43 {approx = true} : vector<8x1xf32> -> vector<8x1xf32>
    %45 = vector.broadcast %44 : vector<8x1xf32> to vector<8x8xf32>
    %46 = arith.mulf %41, %45 : vector<8x8xf32>
    %cst_24 = arith.constant dense<0.000000e+00> : vector<8x8xf32>
    %47 = tpu.matmul %46, %35, %cst_24 {dimension_numbers = #tpu.dot_dimension_numbers<[1], [0], [0], [1], [0, 0, 1, 1], [], []>} : vector<8x8xf32>, vector<8x8xf32>, vector<8x8xf32> -> vector<8x8xf32>
    %48 = vector.extract_strided_slice %15 {offsets = [0, 16], sizes = [8, 8], strides = [1, 1]} : vector<8x32xf32> to vector<8x8xf32>
    %49 = vector.extract_strided_slice %16 {offsets = [0, 16], sizes = [8, 8], strides = [1, 1]} : vector<8x32xf32> to vector<8x8xf32>
    %50 = vector.extract_strided_slice %17 {offsets = [0, 16], sizes = [8, 8], strides = [1, 1]} : vector<8x32xf32> to vector<8x8xf32>
    %cst_25 = arith.constant dense<0.000000e+00> : vector<8x8xf32>
    %51 = tpu.matmul %48, %49, %cst_25 {dimension_numbers = #tpu.dot_dimension_numbers<[1], [1], [0], [0], [0, 0, 1, 0], [], []>} : vector<8x8xf32>, vector<8x8xf32>, vector<8x8xf32> -> vector<8x8xf32>
    %cst_26 = arith.constant dense<0xFF800000> : vector<8xf32>
    %52 = vector.multi_reduction <maximumf>, %51, %cst_26 [1] : vector<8x8xf32> to vector<8xf32>
    %53 = vector.shape_cast %52 : vector<8xf32> to vector<8x1xf32>
    %54 = vector.broadcast %53 : vector<8x1xf32> to vector<8x8xf32>
    %55 = arith.subf %51, %54 : vector<8x8xf32>
    %56 = math.exp %55 : vector<8x8xf32>
    %cst_27 = arith.constant dense<0.000000e+00> : vector<8xf32>
    %57 = vector.multi_reduction <add>, %56, %cst_27 [1] : vector<8x8xf32> to vector<8xf32>
    %58 = vector.shape_cast %57 : vector<8xf32> to vector<8x1xf32>
    %59 = tpu.reciprocal %58 {approx = true} : vector<8x1xf32> -> vector<8x1xf32>
    %60 = vector.broadcast %59 : vector<8x1xf32> to vector<8x8xf32>
    %61 = arith.mulf %56, %60 : vector<8x8xf32>
    %cst_28 = arith.constant dense<0.000000e+00> : vector<8x8xf32>
    %62 = tpu.matmul %61, %50, %cst_28 {dimension_numbers = #tpu.dot_dimension_numbers<[1], [0], [0], [1], [0, 0, 1, 1], [], []>} : vector<8x8xf32>, vector<8x8xf32>, vector<8x8xf32> -> vector<8x8xf32>
    %63 = vector.extract_strided_slice %15 {offsets = [0, 24], sizes = [8, 8], strides = [1, 1]} : vector<8x32xf32> to vector<8x8xf32>
    %64 = vector.extract_strided_slice %16 {offsets = [0, 24], sizes = [8, 8], strides = [1, 1]} : vector<8x32xf32> to vector<8x8xf32>
    %65 = vector.extract_strided_slice %17 {offsets = [0, 24], sizes = [8, 8], strides = [1, 1]} : vector<8x32xf32> to vector<8x8xf32>
    %cst_29 = arith.constant dense<0.000000e+00> : vector<8x8xf32>
    %66 = tpu.matmul %63, %64, %cst_29 {dimension_numbers = #tpu.dot_dimension_numbers<[1], [1], [0], [0], [0, 0, 1, 0], [], []>} : vector<8x8xf32>, vector<8x8xf32>, vector<8x8xf32> -> vector<8x8xf32>
    %cst_30 = arith.constant dense<0xFF800000> : vector<8xf32>
    %67 = vector.multi_reduction <maximumf>, %66, %cst_30 [1] : vector<8x8xf32> to vector<8xf32>
    %68 = vector.shape_cast %67 : vector<8xf32> to vector<8x1xf32>
    %69 = vector.broadcast %68 : vector<8x1xf32> to vector<8x8xf32>
    %70 = arith.subf %66, %69 : vector<8x8xf32>
    %71 = math.exp %70 : vector<8x8xf32>
    %cst_31 = arith.constant dense<0.000000e+00> : vector<8xf32>
    %72 = vector.multi_reduction <add>, %71, %cst_31 [1] : vector<8x8xf32> to vector<8xf32>
    %73 = vector.shape_cast %72 : vector<8xf32> to vector<8x1xf32>
    %74 = tpu.reciprocal %73 {approx = true} : vector<8x1xf32> -> vector<8x1xf32>
    %75 = vector.broadcast %74 : vector<8x1xf32> to vector<8x8xf32>
    %76 = arith.mulf %71, %75 : vector<8x8xf32>
    %cst_32 = arith.constant dense<0.000000e+00> : vector<8x8xf32>
    %77 = tpu.matmul %76, %65, %cst_32 {dimension_numbers = #tpu.dot_dimension_numbers<[1], [0], [0], [1], [0, 0, 1, 1], [], []>} : vector<8x8xf32>, vector<8x8xf32>, vector<8x8xf32> -> vector<8x8xf32>
    %78 = tpu.concatenate %32, %47, %62, %77 in 1 : vector<8x8xf32>, vector<8x8xf32>, vector<8x8xf32>, vector<8x8xf32> -> vector<8x32xf32>
    %cst_33 = arith.constant dense<0.000000e+00> : vector<8x32xf32>
    %79 = tpu.matmul %78, %9, %cst_33 {dimension_numbers = #tpu.dot_dimension_numbers<[1], [0], [0], [1], [0, 0, 1, 1], [], []>} : vector<8x32xf32>, vector<32x32xf32>, vector<8x32xf32> -> vector<8x32xf32>
    %80 = vector.broadcast %11 : vector<1x32xf32> to vector<8x32xf32>
    %81 = arith.addf %79, %80 : vector<8x32xf32>
    %82 = arith.addf %1, %81 : vector<8x32xf32>
    %c0_34 = arith.constant 0 : index
    %c0_35 = arith.constant 0 : index
    %c0_36 = arith.constant 0 : index
    %83 = vector.load %arg7[%c0_34, %c0_35, %c0_36] : memref<2x1x32xf32, #tpu.memory_space<vmem>>, vector<1x1x32xf32>
    %84 = vector.shape_cast %83 : vector<1x1x32xf32> to vector<1x32xf32>
    %c0_37 = arith.constant 0 : index
    %c0_38 = arith.constant 0 : index
    %c0_39 = arith.constant 0 : index
    %85 = vector.load %arg8[%c0_37, %c0_38, %c0_39] : memref<2x1x32xf32, #tpu.memory_space<vmem>>, vector<1x1x32xf32>
    %86 = vector.shape_cast %85 : vector<1x1x32xf32> to vector<1x32xf32>
    %cst_40 = arith.constant dense<0.000000e+00> : vector<8xf32>
    %87 = vector.multi_reduction <add>, %82, %cst_40 [1] : vector<8x32xf32> to vector<8xf32>
    %88 = vector.shape_cast %87 : vector<8xf32> to vector<8x1xf32>
    %cst_41 = arith.constant 3.200000e+01 : f32
    %89 = vector.broadcast %cst_41 : f32 to vector<8x1xf32>
    %90 = arith.divf %88, %89 : vector<8x1xf32>
    %91 = vector.broadcast %90 : vector<8x1xf32> to vector<8x32xf32>
    %92 = arith.subf %82, %91 : vector<8x32xf32>
    %93 = arith.mulf %92, %92 : vector<8x32xf32>
    %cst_42 = arith.constant dense<0.000000e+00> : vector<8xf32>
    %94 = vector.multi_reduction <add>, %93, %cst_42 [1] : vector<8x32xf32> to vector<8xf32>
    %95 = vector.shape_cast %94 : vector<8xf32> to vector<8x1xf32>
    %cst_43 = arith.constant 3.200000e+01 : f32
    %96 = vector.broadcast %cst_43 : f32 to vector<8x1xf32>
    %97 = arith.divf %95, %96 : vector<8x1xf32>
    %cst_44 = arith.constant 9.99999974E-6 : f32
    %98 = vector.broadcast %cst_44 : f32 to vector<8x1xf32>
    %99 = arith.addf %97, %98 : vector<8x1xf32>
    %100 = math.rsqrt %99 : vector<8x1xf32>
    %101 = vector.broadcast %100 : vector<8x1xf32> to vector<8x32xf32>
    %102 = arith.mulf %92, %101 : vector<8x32xf32>
    %103 = vector.broadcast %84 : vector<1x32xf32> to vector<8x32xf32>
    %104 = arith.mulf %102, %103 : vector<8x32xf32>
    %105 = vector.broadcast %86 : vector<1x32xf32> to vector<8x32xf32>
    %106 = arith.addf %104, %105 : vector<8x32xf32>
    %c0_45 = arith.constant 0 : index
    %c0_46 = arith.constant 0 : index
    %c0_47 = arith.constant 0 : index
    %107 = vector.load %arg9[%c0_45, %c0_46, %c0_47] : memref<2x32x64xf32, #tpu.memory_space<vmem>>, vector<1x32x64xf32>
    %108 = vector.shape_cast %107 : vector<1x32x64xf32> to vector<32x64xf32>
    %c0_48 = arith.constant 0 : index
    %c0_49 = arith.constant 0 : index
    %c0_50 = arith.constant 0 : index
    %109 = vector.load %arg10[%c0_48, %c0_49, %c0_50] : memref<2x1x64xf32, #tpu.memory_space<vmem>>, vector<1x1x64xf32>
    %110 = vector.shape_cast %109 : vector<1x1x64xf32> to vector<1x64xf32>
    %c0_51 = arith.constant 0 : index
    %c0_52 = arith.constant 0 : index
    %c0_53 = arith.constant 0 : index
    %111 = vector.load %arg11[%c0_51, %c0_52, %c0_53] : memref<2x64x32xf32, #tpu.memory_space<vmem>>, vector<1x64x32xf32>
    %112 = vector.shape_cast %111 : vector<1x64x32xf32> to vector<64x32xf32>
    %c0_54 = arith.constant 0 : index
    %c0_55 = arith.constant 0 : index
    %c0_56 = arith.constant 0 : index
    %113 = vector.load %arg12[%c0_54, %c0_55, %c0_56] : memref<2x1x32xf32, #tpu.memory_space<vmem>>, vector<1x1x32xf32>
    %114 = vector.shape_cast %113 : vector<1x1x32xf32> to vector<1x32xf32>
    %cst_57 = arith.constant dense<0.000000e+00> : vector<8x64xf32>
    %115 = tpu.matmul %106, %108, %cst_57 {dimension_numbers = #tpu.dot_dimension_numbers<[1], [0], [0], [1], [0, 0, 1, 1], [], []>} : vector<8x32xf32>, vector<32x64xf32>, vector<8x64xf32> -> vector<8x64xf32>
    %116 = vector.broadcast %110 : vector<1x64xf32> to vector<8x64xf32>
    %117 = arith.addf %115, %116 : vector<8x64xf32>
    %cst_58 = arith.constant 0.000000e+00 : f32
    %118 = vector.broadcast %cst_58 : f32 to vector<8x64xf32>
    %119 = arith.maximumf %117, %118 : vector<8x64xf32>
    %cst_59 = arith.constant dense<0.000000e+00> : vector<8x32xf32>
    %120 = tpu.matmul %119, %112, %cst_59 {dimension_numbers = #tpu.dot_dimension_numbers<[1], [0], [0], [1], [0, 0, 1, 1], [], []>} : vector<8x64xf32>, vector<64x32xf32>, vector<8x32xf32> -> vector<8x32xf32>
    %121 = vector.broadcast %114 : vector<1x32xf32> to vector<8x32xf32>
    %122 = arith.addf %120, %121 : vector<8x32xf32>
    %123 = arith.addf %106, %122 : vector<8x32xf32>
    %c0_60 = arith.constant 0 : index
    %c0_61 = arith.constant 0 : index
    %c0_62 = arith.constant 0 : index
    %124 = vector.load %arg13[%c0_60, %c0_61, %c0_62] : memref<2x1x32xf32, #tpu.memory_space<vmem>>, vector<1x1x32xf32>
    %125 = vector.shape_cast %124 : vector<1x1x32xf32> to vector<1x32xf32>
    %c0_63 = arith.constant 0 : index
    %c0_64 = arith.constant 0 : index
    %c0_65 = arith.constant 0 : index
    %126 = vector.load %arg14[%c0_63, %c0_64, %c0_65] : memref<2x1x32xf32, #tpu.memory_space<vmem>>, vector<1x1x32xf32>
    %127 = vector.shape_cast %126 : vector<1x1x32xf32> to vector<1x32xf32>
    %cst_66 = arith.constant dense<0.000000e+00> : vector<8xf32>
    %128 = vector.multi_reduction <add>, %123, %cst_66 [1] : vector<8x32xf32> to vector<8xf32>
    %129 = vector.shape_cast %128 : vector<8xf32> to vector<8x1xf32>
    %cst_67 = arith.constant 3.200000e+01 : f32
    %130 = vector.broadcast %cst_67 : f32 to vector<8x1xf32>
    %131 = arith.divf %129, %130 : vector<8x1xf32>
    %132 = vector.broadcast %131 : vector<8x1xf32> to vector<8x32xf32>
    %133 = arith.subf %123, %132 : vector<8x32xf32>
    %134 = arith.mulf %133, %133 : vector<8x32xf32>
    %cst_68 = arith.constant dense<0.000000e+00> : vector<8xf32>
    %135 = vector.multi_reduction <add>, %134, %cst_68 [1] : vector<8x32xf32> to vector<8xf32>
    %136 = vector.shape_cast %135 : vector<8xf32> to vector<8x1xf32>
    %cst_69 = arith.constant 3.200000e+01 : f32
    %137 = vector.broadcast %cst_69 : f32 to vector<8x1xf32>
    %138 = arith.divf %136, %137 : vector<8x1xf32>
    %cst_70 = arith.constant 9.99999974E-6 : f32
    %139 = vector.broadcast %cst_70 : f32 to vector<8x1xf32>
    %140 = arith.addf %138, %139 : vector<8x1xf32>
    %141 = math.rsqrt %140 : vector<8x1xf32>
    %142 = vector.broadcast %141 : vector<8x1xf32> to vector<8x32xf32>
    %143 = arith.mulf %133, %142 : vector<8x32xf32>
    %144 = vector.broadcast %125 : vector<1x32xf32> to vector<8x32xf32>
    %145 = arith.mulf %143, %144 : vector<8x32xf32>
    %146 = vector.broadcast %127 : vector<1x32xf32> to vector<8x32xf32>
    %147 = arith.addf %145, %146 : vector<8x32xf32>
    %c1 = arith.constant 1 : index
    %c0_71 = arith.constant 0 : index
    %c0_72 = arith.constant 0 : index
    %148 = vector.load %arg3[%c1, %c0_71, %c0_72] : memref<2x32x96xf32, #tpu.memory_space<vmem>>, vector<1x32x96xf32>
    %149 = vector.shape_cast %148 : vector<1x32x96xf32> to vector<32x96xf32>
    %c1_73 = arith.constant 1 : index
    %c0_74 = arith.constant 0 : index
    %c0_75 = arith.constant 0 : index
    %150 = vector.load %arg4[%c1_73, %c0_74, %c0_75] : memref<2x1x96xf32, #tpu.memory_space<vmem>>, vector<1x1x96xf32>
    %151 = vector.shape_cast %150 : vector<1x1x96xf32> to vector<1x96xf32>
    %c1_76 = arith.constant 1 : index
    %c0_77 = arith.constant 0 : index
    %c0_78 = arith.constant 0 : index
    %152 = vector.load %arg5[%c1_76, %c0_77, %c0_78] : memref<2x32x32xf32, #tpu.memory_space<vmem>>, vector<1x32x32xf32>
    %153 = vector.shape_cast %152 : vector<1x32x32xf32> to vector<32x32xf32>
    %c1_79 = arith.constant 1 : index
    %c0_80 = arith.constant 0 : index
    %c0_81 = arith.constant 0 : index
    %154 = vector.load %arg6[%c1_79, %c0_80, %c0_81] : memref<2x1x32xf32, #tpu.memory_space<vmem>>, vector<1x1x32xf32>
    %155 = vector.shape_cast %154 : vector<1x1x32xf32> to vector<1x32xf32>
    %cst_82 = arith.constant dense<0.000000e+00> : vector<8x96xf32>
    %156 = tpu.matmul %147, %149, %cst_82 {dimension_numbers = #tpu.dot_dimension_numbers<[1], [0], [0], [1], [0, 0, 1, 1], [], []>} : vector<8x32xf32>, vector<32x96xf32>, vector<8x96xf32> -> vector<8x96xf32>
    %157 = vector.broadcast %151 : vector<1x96xf32> to vector<8x96xf32>
    %158 = arith.addf %156, %157 : vector<8x96xf32>
    %159 = vector.extract_strided_slice %158 {offsets = [0, 0], sizes = [8, 32], strides = [1, 1]} : vector<8x96xf32> to vector<8x32xf32>
    %160 = vector.extract_strided_slice %158 {offsets = [0, 32], sizes = [8, 32], strides = [1, 1]} : vector<8x96xf32> to vector<8x32xf32>
    %161 = vector.extract_strided_slice %158 {offsets = [0, 64], sizes = [8, 32], strides = [1, 1]} : vector<8x96xf32> to vector<8x32xf32>
    %162 = vector.extract_strided_slice %159 {offsets = [0, 0], sizes = [8, 8], strides = [1, 1]} : vector<8x32xf32> to vector<8x8xf32>
    %163 = vector.extract_strided_slice %160 {offsets = [0, 0], sizes = [8, 8], strides = [1, 1]} : vector<8x32xf32> to vector<8x8xf32>
    %164 = vector.extract_strided_slice %161 {offsets = [0, 0], sizes = [8, 8], strides = [1, 1]} : vector<8x32xf32> to vector<8x8xf32>
    %cst_83 = arith.constant dense<0.000000e+00> : vector<8x8xf32>
    %165 = tpu.matmul %162, %163, %cst_83 {dimension_numbers = #tpu.dot_dimension_numbers<[1], [1], [0], [0], [0, 0, 1, 0], [], []>} : vector<8x8xf32>, vector<8x8xf32>, vector<8x8xf32> -> vector<8x8xf32>
    %cst_84 = arith.constant dense<0xFF800000> : vector<8xf32>
    %166 = vector.multi_reduction <maximumf>, %165, %cst_84 [1] : vector<8x8xf32> to vector<8xf32>
    %167 = vector.shape_cast %166 : vector<8xf32> to vector<8x1xf32>
    %168 = vector.broadcast %167 : vector<8x1xf32> to vector<8x8xf32>
    %169 = arith.subf %165, %168 : vector<8x8xf32>
    %170 = math.exp %169 : vector<8x8xf32>
    %cst_85 = arith.constant dense<0.000000e+00> : vector<8xf32>
    %171 = vector.multi_reduction <add>, %170, %cst_85 [1] : vector<8x8xf32> to vector<8xf32>
    %172 = vector.shape_cast %171 : vector<8xf32> to vector<8x1xf32>
    %173 = tpu.reciprocal %172 {approx = true} : vector<8x1xf32> -> vector<8x1xf32>
    %174 = vector.broadcast %173 : vector<8x1xf32> to vector<8x8xf32>
    %175 = arith.mulf %170, %174 : vector<8x8xf32>
    %cst_86 = arith.constant dense<0.000000e+00> : vector<8x8xf32>
    %176 = tpu.matmul %175, %164, %cst_86 {dimension_numbers = #tpu.dot_dimension_numbers<[1], [0], [0], [1], [0, 0, 1, 1], [], []>} : vector<8x8xf32>, vector<8x8xf32>, vector<8x8xf32> -> vector<8x8xf32>
    %177 = vector.extract_strided_slice %159 {offsets = [0, 8], sizes = [8, 8], strides = [1, 1]} : vector<8x32xf32> to vector<8x8xf32>
    %178 = vector.extract_strided_slice %160 {offsets = [0, 8], sizes = [8, 8], strides = [1, 1]} : vector<8x32xf32> to vector<8x8xf32>
    %179 = vector.extract_strided_slice %161 {offsets = [0, 8], sizes = [8, 8], strides = [1, 1]} : vector<8x32xf32> to vector<8x8xf32>
    %cst_87 = arith.constant dense<0.000000e+00> : vector<8x8xf32>
    %180 = tpu.matmul %177, %178, %cst_87 {dimension_numbers = #tpu.dot_dimension_numbers<[1], [1], [0], [0], [0, 0, 1, 0], [], []>} : vector<8x8xf32>, vector<8x8xf32>, vector<8x8xf32> -> vector<8x8xf32>
    %cst_88 = arith.constant dense<0xFF800000> : vector<8xf32>
    %181 = vector.multi_reduction <maximumf>, %180, %cst_88 [1] : vector<8x8xf32> to vector<8xf32>
    %182 = vector.shape_cast %181 : vector<8xf32> to vector<8x1xf32>
    %183 = vector.broadcast %182 : vector<8x1xf32> to vector<8x8xf32>
    %184 = arith.subf %180, %183 : vector<8x8xf32>
    %185 = math.exp %184 : vector<8x8xf32>
    %cst_89 = arith.constant dense<0.000000e+00> : vector<8xf32>
    %186 = vector.multi_reduction <add>, %185, %cst_89 [1] : vector<8x8xf32> to vector<8xf32>
    %187 = vector.shape_cast %186 : vector<8xf32> to vector<8x1xf32>
    %188 = tpu.reciprocal %187 {approx = true} : vector<8x1xf32> -> vector<8x1xf32>
    %189 = vector.broadcast %188 : vector<8x1xf32> to vector<8x8xf32>
    %190 = arith.mulf %185, %189 : vector<8x8xf32>
    %cst_90 = arith.constant dense<0.000000e+00> : vector<8x8xf32>
    %191 = tpu.matmul %190, %179, %cst_90 {dimension_numbers = #tpu.dot_dimension_numbers<[1], [0], [0], [1], [0, 0, 1, 1], [], []>} : vector<8x8xf32>, vector<8x8xf32>, vector<8x8xf32> -> vector<8x8xf32>
    %192 = vector.extract_strided_slice %159 {offsets = [0, 16], sizes = [8, 8], strides = [1, 1]} : vector<8x32xf32> to vector<8x8xf32>
    %193 = vector.extract_strided_slice %160 {offsets = [0, 16], sizes = [8, 8], strides = [1, 1]} : vector<8x32xf32> to vector<8x8xf32>
    %194 = vector.extract_strided_slice %161 {offsets = [0, 16], sizes = [8, 8], strides = [1, 1]} : vector<8x32xf32> to vector<8x8xf32>
    %cst_91 = arith.constant dense<0.000000e+00> : vector<8x8xf32>
    %195 = tpu.matmul %192, %193, %cst_91 {dimension_numbers = #tpu.dot_dimension_numbers<[1], [1], [0], [0], [0, 0, 1, 0], [], []>} : vector<8x8xf32>, vector<8x8xf32>, vector<8x8xf32> -> vector<8x8xf32>
    %cst_92 = arith.constant dense<0xFF800000> : vector<8xf32>
    %196 = vector.multi_reduction <maximumf>, %195, %cst_92 [1] : vector<8x8xf32> to vector<8xf32>
    %197 = vector.shape_cast %196 : vector<8xf32> to vector<8x1xf32>
    %198 = vector.broadcast %197 : vector<8x1xf32> to vector<8x8xf32>
    %199 = arith.subf %195, %198 : vector<8x8xf32>
    %200 = math.exp %199 : vector<8x8xf32>
    %cst_93 = arith.constant dense<0.000000e+00> : vector<8xf32>
    %201 = vector.multi_reduction <add>, %200, %cst_93 [1] : vector<8x8xf32> to vector<8xf32>
    %202 = vector.shape_cast %201 : vector<8xf32> to vector<8x1xf32>
    %203 = tpu.reciprocal %202 {approx = true} : vector<8x1xf32> -> vector<8x1xf32>
    %204 = vector.broadcast %203 : vector<8x1xf32> to vector<8x8xf32>
    %205 = arith.mulf %200, %204 : vector<8x8xf32>
    %cst_94 = arith.constant dense<0.000000e+00> : vector<8x8xf32>
    %206 = tpu.matmul %205, %194, %cst_94 {dimension_numbers = #tpu.dot_dimension_numbers<[1], [0], [0], [1], [0, 0, 1, 1], [], []>} : vector<8x8xf32>, vector<8x8xf32>, vector<8x8xf32> -> vector<8x8xf32>
    %207 = vector.extract_strided_slice %159 {offsets = [0, 24], sizes = [8, 8], strides = [1, 1]} : vector<8x32xf32> to vector<8x8xf32>
    %208 = vector.extract_strided_slice %160 {offsets = [0, 24], sizes = [8, 8], strides = [1, 1]} : vector<8x32xf32> to vector<8x8xf32>
    %209 = vector.extract_strided_slice %161 {offsets = [0, 24], sizes = [8, 8], strides = [1, 1]} : vector<8x32xf32> to vector<8x8xf32>
    %cst_95 = arith.constant dense<0.000000e+00> : vector<8x8xf32>
    %210 = tpu.matmul %207, %208, %cst_95 {dimension_numbers = #tpu.dot_dimension_numbers<[1], [1], [0], [0], [0, 0, 1, 0], [], []>} : vector<8x8xf32>, vector<8x8xf32>, vector<8x8xf32> -> vector<8x8xf32>
    %cst_96 = arith.constant dense<0xFF800000> : vector<8xf32>
    %211 = vector.multi_reduction <maximumf>, %210, %cst_96 [1] : vector<8x8xf32> to vector<8xf32>
    %212 = vector.shape_cast %211 : vector<8xf32> to vector<8x1xf32>
    %213 = vector.broadcast %212 : vector<8x1xf32> to vector<8x8xf32>
    %214 = arith.subf %210, %213 : vector<8x8xf32>
    %215 = math.exp %214 : vector<8x8xf32>
    %cst_97 = arith.constant dense<0.000000e+00> : vector<8xf32>
    %216 = vector.multi_reduction <add>, %215, %cst_97 [1] : vector<8x8xf32> to vector<8xf32>
    %217 = vector.shape_cast %216 : vector<8xf32> to vector<8x1xf32>
    %218 = tpu.reciprocal %217 {approx = true} : vector<8x1xf32> -> vector<8x1xf32>
    %219 = vector.broadcast %218 : vector<8x1xf32> to vector<8x8xf32>
    %220 = arith.mulf %215, %219 : vector<8x8xf32>
    %cst_98 = arith.constant dense<0.000000e+00> : vector<8x8xf32>
    %221 = tpu.matmul %220, %209, %cst_98 {dimension_numbers = #tpu.dot_dimension_numbers<[1], [0], [0], [1], [0, 0, 1, 1], [], []>} : vector<8x8xf32>, vector<8x8xf32>, vector<8x8xf32> -> vector<8x8xf32>
    %222 = tpu.concatenate %176, %191, %206, %221 in 1 : vector<8x8xf32>, vector<8x8xf32>, vector<8x8xf32>, vector<8x8xf32> -> vector<8x32xf32>
    %cst_99 = arith.constant dense<0.000000e+00> : vector<8x32xf32>
    %223 = tpu.matmul %222, %153, %cst_99 {dimension_numbers = #tpu.dot_dimension_numbers<[1], [0], [0], [1], [0, 0, 1, 1], [], []>} : vector<8x32xf32>, vector<32x32xf32>, vector<8x32xf32> -> vector<8x32xf32>
    %224 = vector.broadcast %155 : vector<1x32xf32> to vector<8x32xf32>
    %225 = arith.addf %223, %224 : vector<8x32xf32>
    %226 = arith.addf %147, %225 : vector<8x32xf32>
    %c1_100 = arith.constant 1 : index
    %c0_101 = arith.constant 0 : index
    %c0_102 = arith.constant 0 : index
    %227 = vector.load %arg7[%c1_100, %c0_101, %c0_102] : memref<2x1x32xf32, #tpu.memory_space<vmem>>, vector<1x1x32xf32>
    %228 = vector.shape_cast %227 : vector<1x1x32xf32> to vector<1x32xf32>
    %c1_103 = arith.constant 1 : index
    %c0_104 = arith.constant 0 : index
    %c0_105 = arith.constant 0 : index
    %229 = vector.load %arg8[%c1_103, %c0_104, %c0_105] : memref<2x1x32xf32, #tpu.memory_space<vmem>>, vector<1x1x32xf32>
    %230 = vector.shape_cast %229 : vector<1x1x32xf32> to vector<1x32xf32>
    %cst_106 = arith.constant dense<0.000000e+00> : vector<8xf32>
    %231 = vector.multi_reduction <add>, %226, %cst_106 [1] : vector<8x32xf32> to vector<8xf32>
    %232 = vector.shape_cast %231 : vector<8xf32> to vector<8x1xf32>
    %cst_107 = arith.constant 3.200000e+01 : f32
    %233 = vector.broadcast %cst_107 : f32 to vector<8x1xf32>
    %234 = arith.divf %232, %233 : vector<8x1xf32>
    %235 = vector.broadcast %234 : vector<8x1xf32> to vector<8x32xf32>
    %236 = arith.subf %226, %235 : vector<8x32xf32>
    %237 = arith.mulf %236, %236 : vector<8x32xf32>
    %cst_108 = arith.constant dense<0.000000e+00> : vector<8xf32>
    %238 = vector.multi_reduction <add>, %237, %cst_108 [1] : vector<8x32xf32> to vector<8xf32>
    %239 = vector.shape_cast %238 : vector<8xf32> to vector<8x1xf32>
    %cst_109 = arith.constant 3.200000e+01 : f32
    %240 = vector.broadcast %cst_109 : f32 to vector<8x1xf32>
    %241 = arith.divf %239, %240 : vector<8x1xf32>
    %cst_110 = arith.constant 9.99999974E-6 : f32
    %242 = vector.broadcast %cst_110 : f32 to vector<8x1xf32>
    %243 = arith.addf %241, %242 : vector<8x1xf32>
    %244 = math.rsqrt %243 : vector<8x1xf32>
    %245 = vector.broadcast %244 : vector<8x1xf32> to vector<8x32xf32>
    %246 = arith.mulf %236, %245 : vector<8x32xf32>
    %247 = vector.broadcast %228 : vector<1x32xf32> to vector<8x32xf32>
    %248 = arith.mulf %246, %247 : vector<8x32xf32>
    %249 = vector.broadcast %230 : vector<1x32xf32> to vector<8x32xf32>
    %250 = arith.addf %248, %249 : vector<8x32xf32>
    %c1_111 = arith.constant 1 : index
    %c0_112 = arith.constant 0 : index
    %c0_113 = arith.constant 0 : index
    %251 = vector.load %arg9[%c1_111, %c0_112, %c0_113] : memref<2x32x64xf32, #tpu.memory_space<vmem>>, vector<1x32x64xf32>
    %252 = vector.shape_cast %251 : vector<1x32x64xf32> to vector<32x64xf32>
    %c1_114 = arith.constant 1 : index
    %c0_115 = arith.constant 0 : index
    %c0_116 = arith.constant 0 : index
    %253 = vector.load %arg10[%c1_114, %c0_115, %c0_116] : memref<2x1x64xf32, #tpu.memory_space<vmem>>, vector<1x1x64xf32>
    %254 = vector.shape_cast %253 : vector<1x1x64xf32> to vector<1x64xf32>
    %c1_117 = arith.constant 1 : index
    %c0_118 = arith.constant 0 : index
    %c0_119 = arith.constant 0 : index
    %255 = vector.load %arg11[%c1_117, %c0_118, %c0_119] : memref<2x64x32xf32, #tpu.memory_space<vmem>>, vector<1x64x32xf32>
    %256 = vector.shape_cast %255 : vector<1x64x32xf32> to vector<64x32xf32>
    %c1_120 = arith.constant 1 : index
    %c0_121 = arith.constant 0 : index
    %c0_122 = arith.constant 0 : index
    %257 = vector.load %arg12[%c1_120, %c0_121, %c0_122] : memref<2x1x32xf32, #tpu.memory_space<vmem>>, vector<1x1x32xf32>
    %258 = vector.shape_cast %257 : vector<1x1x32xf32> to vector<1x32xf32>
    %cst_123 = arith.constant dense<0.000000e+00> : vector<8x64xf32>
    %259 = tpu.matmul %250, %252, %cst_123 {dimension_numbers = #tpu.dot_dimension_numbers<[1], [0], [0], [1], [0, 0, 1, 1], [], []>} : vector<8x32xf32>, vector<32x64xf32>, vector<8x64xf32> -> vector<8x64xf32>
    %260 = vector.broadcast %254 : vector<1x64xf32> to vector<8x64xf32>
    %261 = arith.addf %259, %260 : vector<8x64xf32>
    %cst_124 = arith.constant 0.000000e+00 : f32
    %262 = vector.broadcast %cst_124 : f32 to vector<8x64xf32>
    %263 = arith.maximumf %261, %262 : vector<8x64xf32>
    %cst_125 = arith.constant dense<0.000000e+00> : vector<8x32xf32>
    %264 = tpu.matmul %263, %256, %cst_125 {dimension_numbers = #tpu.dot_dimension_numbers<[1], [0], [0], [1], [0, 0, 1, 1], [], []>} : vector<8x64xf32>, vector<64x32xf32>, vector<8x32xf32> -> vector<8x32xf32>
    %265 = vector.broadcast %258 : vector<1x32xf32> to vector<8x32xf32>
    %266 = arith.addf %264, %265 : vector<8x32xf32>
    %267 = arith.addf %250, %266 : vector<8x32xf32>
    %c1_126 = arith.constant 1 : index
    %c0_127 = arith.constant 0 : index
    %c0_128 = arith.constant 0 : index
    %268 = vector.load %arg13[%c1_126, %c0_127, %c0_128] : memref<2x1x32xf32, #tpu.memory_space<vmem>>, vector<1x1x32xf32>
    %269 = vector.shape_cast %268 : vector<1x1x32xf32> to vector<1x32xf32>
    %c1_129 = arith.constant 1 : index
    %c0_130 = arith.constant 0 : index
    %c0_131 = arith.constant 0 : index
    %270 = vector.load %arg14[%c1_129, %c0_130, %c0_131] : memref<2x1x32xf32, #tpu.memory_space<vmem>>, vector<1x1x32xf32>
    %271 = vector.shape_cast %270 : vector<1x1x32xf32> to vector<1x32xf32>
    %cst_132 = arith.constant dense<0.000000e+00> : vector<8xf32>
    %272 = vector.multi_reduction <add>, %267, %cst_132 [1] : vector<8x32xf32> to vector<8xf32>
    %273 = vector.shape_cast %272 : vector<8xf32> to vector<8x1xf32>
    %cst_133 = arith.constant 3.200000e+01 : f32
    %274 = vector.broadcast %cst_133 : f32 to vector<8x1xf32>
    %275 = arith.divf %273, %274 : vector<8x1xf32>
    %276 = vector.broadcast %275 : vector<8x1xf32> to vector<8x32xf32>
    %277 = arith.subf %267, %276 : vector<8x32xf32>
    %278 = arith.mulf %277, %277 : vector<8x32xf32>
    %cst_134 = arith.constant dense<0.000000e+00> : vector<8xf32>
    %279 = vector.multi_reduction <add>, %278, %cst_134 [1] : vector<8x32xf32> to vector<8xf32>
    %280 = vector.shape_cast %279 : vector<8xf32> to vector<8x1xf32>
    %cst_135 = arith.constant 3.200000e+01 : f32
    %281 = vector.broadcast %cst_135 : f32 to vector<8x1xf32>
    %282 = arith.divf %280, %281 : vector<8x1xf32>
    %cst_136 = arith.constant 9.99999974E-6 : f32
    %283 = vector.broadcast %cst_136 : f32 to vector<8x1xf32>
    %284 = arith.addf %282, %283 : vector<8x1xf32>
    %285 = math.rsqrt %284 : vector<8x1xf32>
    %286 = vector.broadcast %285 : vector<8x1xf32> to vector<8x32xf32>
    %287 = arith.mulf %277, %286 : vector<8x32xf32>
    %288 = vector.broadcast %269 : vector<1x32xf32> to vector<8x32xf32>
    %289 = arith.mulf %287, %288 : vector<8x32xf32>
    %290 = vector.broadcast %271 : vector<1x32xf32> to vector<8x32xf32>
    %291 = arith.addf %289, %290 : vector<8x32xf32>
    %c0_137 = arith.constant 0 : index
    %c0_138 = arith.constant 0 : index
    %292 = vector.load %arg33[%c0_137, %c0_138] : memref<32x64xf32, #tpu.memory_space<vmem>>, vector<32x64xf32>
    %cst_139 = arith.constant dense<0.000000e+00> : vector<8x64xf32>
    %293 = tpu.matmul %291, %292, %cst_139 {dimension_numbers = #tpu.dot_dimension_numbers<[1], [0], [0], [1], [0, 0, 1, 1], [], []>} : vector<8x32xf32>, vector<32x64xf32>, vector<8x64xf32> -> vector<8x64xf32>
    %c0_140 = arith.constant 0 : index
    %c0_141 = arith.constant 0 : index
    %294 = vector.load %arg34[%c0_140, %c0_141] : memref<1x64xf32, #tpu.memory_space<vmem>>, vector<1x64xf32>
    %295 = vector.broadcast %294 : vector<1x64xf32> to vector<8x64xf32>
    %296 = arith.addf %293, %295 : vector<8x64xf32>
    %297 = vector.extract_strided_slice %296 {offsets = [0, 0], sizes = [8, 32], strides = [1, 1]} : vector<8x64xf32> to vector<8x32xf32>
    %298 = vector.extract_strided_slice %296 {offsets = [0, 32], sizes = [8, 32], strides = [1, 1]} : vector<8x64xf32> to vector<8x32xf32>
    %cst_142 = arith.constant 5.000000e-01 : f32
    %299 = vector.broadcast %cst_142 : f32 to vector<8x32xf32>
    %300 = arith.mulf %299, %298 : vector<8x32xf32>
    %301 = math.exp %300 : vector<8x32xf32>
    %302 = arith.mulf %3, %301 : vector<8x32xf32>
    %303 = arith.addf %297, %302 : vector<8x32xf32>
    %c0_143 = arith.constant 0 : index
    %c0_144 = arith.constant 0 : index
    %c0_145 = arith.constant 0 : index
    %304 = vector.load %arg15[%c0_143, %c0_144, %c0_145] : memref<2x32x96xf32, #tpu.memory_space<vmem>>, vector<1x32x96xf32>
    %305 = vector.shape_cast %304 : vector<1x32x96xf32> to vector<32x96xf32>
    %c0_146 = arith.constant 0 : index
    %c0_147 = arith.constant 0 : index
    %c0_148 = arith.constant 0 : index
    %306 = vector.load %arg16[%c0_146, %c0_147, %c0_148] : memref<2x1x96xf32, #tpu.memory_space<vmem>>, vector<1x1x96xf32>
    %307 = vector.shape_cast %306 : vector<1x1x96xf32> to vector<1x96xf32>
    %c0_149 = arith.constant 0 : index
    %c0_150 = arith.constant 0 : index
    %c0_151 = arith.constant 0 : index
    %308 = vector.load %arg17[%c0_149, %c0_150, %c0_151] : memref<2x32x32xf32, #tpu.memory_space<vmem>>, vector<1x32x32xf32>
    %309 = vector.shape_cast %308 : vector<1x32x32xf32> to vector<32x32xf32>
    %c0_152 = arith.constant 0 : index
    %c0_153 = arith.constant 0 : index
    %c0_154 = arith.constant 0 : index
    %310 = vector.load %arg18[%c0_152, %c0_153, %c0_154] : memref<2x1x32xf32, #tpu.memory_space<vmem>>, vector<1x1x32xf32>
    %311 = vector.shape_cast %310 : vector<1x1x32xf32> to vector<1x32xf32>
    %cst_155 = arith.constant dense<0.000000e+00> : vector<8x96xf32>
    %312 = tpu.matmul %303, %305, %cst_155 {dimension_numbers = #tpu.dot_dimension_numbers<[1], [0], [0], [1], [0, 0, 1, 1], [], []>} : vector<8x32xf32>, vector<32x96xf32>, vector<8x96xf32> -> vector<8x96xf32>
    %313 = vector.broadcast %307 : vector<1x96xf32> to vector<8x96xf32>
    %314 = arith.addf %312, %313 : vector<8x96xf32>
    %315 = vector.extract_strided_slice %314 {offsets = [0, 0], sizes = [8, 32], strides = [1, 1]} : vector<8x96xf32> to vector<8x32xf32>
    %316 = vector.extract_strided_slice %314 {offsets = [0, 32], sizes = [8, 32], strides = [1, 1]} : vector<8x96xf32> to vector<8x32xf32>
    %317 = vector.extract_strided_slice %314 {offsets = [0, 64], sizes = [8, 32], strides = [1, 1]} : vector<8x96xf32> to vector<8x32xf32>
    %318 = vector.extract_strided_slice %315 {offsets = [0, 0], sizes = [8, 8], strides = [1, 1]} : vector<8x32xf32> to vector<8x8xf32>
    %319 = vector.extract_strided_slice %316 {offsets = [0, 0], sizes = [8, 8], strides = [1, 1]} : vector<8x32xf32> to vector<8x8xf32>
    %320 = vector.extract_strided_slice %317 {offsets = [0, 0], sizes = [8, 8], strides = [1, 1]} : vector<8x32xf32> to vector<8x8xf32>
    %cst_156 = arith.constant dense<0.000000e+00> : vector<8x8xf32>
    %321 = tpu.matmul %318, %319, %cst_156 {dimension_numbers = #tpu.dot_dimension_numbers<[1], [1], [0], [0], [0, 0, 1, 0], [], []>} : vector<8x8xf32>, vector<8x8xf32>, vector<8x8xf32> -> vector<8x8xf32>
    %cst_157 = arith.constant dense<0xFF800000> : vector<8xf32>
    %322 = vector.multi_reduction <maximumf>, %321, %cst_157 [1] : vector<8x8xf32> to vector<8xf32>
    %323 = vector.shape_cast %322 : vector<8xf32> to vector<8x1xf32>
    %324 = vector.broadcast %323 : vector<8x1xf32> to vector<8x8xf32>
    %325 = arith.subf %321, %324 : vector<8x8xf32>
    %326 = math.exp %325 : vector<8x8xf32>
    %cst_158 = arith.constant dense<0.000000e+00> : vector<8xf32>
    %327 = vector.multi_reduction <add>, %326, %cst_158 [1] : vector<8x8xf32> to vector<8xf32>
    %328 = vector.shape_cast %327 : vector<8xf32> to vector<8x1xf32>
    %329 = tpu.reciprocal %328 {approx = true} : vector<8x1xf32> -> vector<8x1xf32>
    %330 = vector.broadcast %329 : vector<8x1xf32> to vector<8x8xf32>
    %331 = arith.mulf %326, %330 : vector<8x8xf32>
    %cst_159 = arith.constant dense<0.000000e+00> : vector<8x8xf32>
    %332 = tpu.matmul %331, %320, %cst_159 {dimension_numbers = #tpu.dot_dimension_numbers<[1], [0], [0], [1], [0, 0, 1, 1], [], []>} : vector<8x8xf32>, vector<8x8xf32>, vector<8x8xf32> -> vector<8x8xf32>
    %333 = vector.extract_strided_slice %315 {offsets = [0, 8], sizes = [8, 8], strides = [1, 1]} : vector<8x32xf32> to vector<8x8xf32>
    %334 = vector.extract_strided_slice %316 {offsets = [0, 8], sizes = [8, 8], strides = [1, 1]} : vector<8x32xf32> to vector<8x8xf32>
    %335 = vector.extract_strided_slice %317 {offsets = [0, 8], sizes = [8, 8], strides = [1, 1]} : vector<8x32xf32> to vector<8x8xf32>
    %cst_160 = arith.constant dense<0.000000e+00> : vector<8x8xf32>
    %336 = tpu.matmul %333, %334, %cst_160 {dimension_numbers = #tpu.dot_dimension_numbers<[1], [1], [0], [0], [0, 0, 1, 0], [], []>} : vector<8x8xf32>, vector<8x8xf32>, vector<8x8xf32> -> vector<8x8xf32>
    %cst_161 = arith.constant dense<0xFF800000> : vector<8xf32>
    %337 = vector.multi_reduction <maximumf>, %336, %cst_161 [1] : vector<8x8xf32> to vector<8xf32>
    %338 = vector.shape_cast %337 : vector<8xf32> to vector<8x1xf32>
    %339 = vector.broadcast %338 : vector<8x1xf32> to vector<8x8xf32>
    %340 = arith.subf %336, %339 : vector<8x8xf32>
    %341 = math.exp %340 : vector<8x8xf32>
    %cst_162 = arith.constant dense<0.000000e+00> : vector<8xf32>
    %342 = vector.multi_reduction <add>, %341, %cst_162 [1] : vector<8x8xf32> to vector<8xf32>
    %343 = vector.shape_cast %342 : vector<8xf32> to vector<8x1xf32>
    %344 = tpu.reciprocal %343 {approx = true} : vector<8x1xf32> -> vector<8x1xf32>
    %345 = vector.broadcast %344 : vector<8x1xf32> to vector<8x8xf32>
    %346 = arith.mulf %341, %345 : vector<8x8xf32>
    %cst_163 = arith.constant dense<0.000000e+00> : vector<8x8xf32>
    %347 = tpu.matmul %346, %335, %cst_163 {dimension_numbers = #tpu.dot_dimension_numbers<[1], [0], [0], [1], [0, 0, 1, 1], [], []>} : vector<8x8xf32>, vector<8x8xf32>, vector<8x8xf32> -> vector<8x8xf32>
    %348 = vector.extract_strided_slice %315 {offsets = [0, 16], sizes = [8, 8], strides = [1, 1]} : vector<8x32xf32> to vector<8x8xf32>
    %349 = vector.extract_strided_slice %316 {offsets = [0, 16], sizes = [8, 8], strides = [1, 1]} : vector<8x32xf32> to vector<8x8xf32>
    %350 = vector.extract_strided_slice %317 {offsets = [0, 16], sizes = [8, 8], strides = [1, 1]} : vector<8x32xf32> to vector<8x8xf32>
    %cst_164 = arith.constant dense<0.000000e+00> : vector<8x8xf32>
    %351 = tpu.matmul %348, %349, %cst_164 {dimension_numbers = #tpu.dot_dimension_numbers<[1], [1], [0], [0], [0, 0, 1, 0], [], []>} : vector<8x8xf32>, vector<8x8xf32>, vector<8x8xf32> -> vector<8x8xf32>
    %cst_165 = arith.constant dense<0xFF800000> : vector<8xf32>
    %352 = vector.multi_reduction <maximumf>, %351, %cst_165 [1] : vector<8x8xf32> to vector<8xf32>
    %353 = vector.shape_cast %352 : vector<8xf32> to vector<8x1xf32>
    %354 = vector.broadcast %353 : vector<8x1xf32> to vector<8x8xf32>
    %355 = arith.subf %351, %354 : vector<8x8xf32>
    %356 = math.exp %355 : vector<8x8xf32>
    %cst_166 = arith.constant dense<0.000000e+00> : vector<8xf32>
    %357 = vector.multi_reduction <add>, %356, %cst_166 [1] : vector<8x8xf32> to vector<8xf32>
    %358 = vector.shape_cast %357 : vector<8xf32> to vector<8x1xf32>
    %359 = tpu.reciprocal %358 {approx = true} : vector<8x1xf32> -> vector<8x1xf32>
    %360 = vector.broadcast %359 : vector<8x1xf32> to vector<8x8xf32>
    %361 = arith.mulf %356, %360 : vector<8x8xf32>
    %cst_167 = arith.constant dense<0.000000e+00> : vector<8x8xf32>
    %362 = tpu.matmul %361, %350, %cst_167 {dimension_numbers = #tpu.dot_dimension_numbers<[1], [0], [0], [1], [0, 0, 1, 1], [], []>} : vector<8x8xf32>, vector<8x8xf32>, vector<8x8xf32> -> vector<8x8xf32>
    %363 = vector.extract_strided_slice %315 {offsets = [0, 24], sizes = [8, 8], strides = [1, 1]} : vector<8x32xf32> to vector<8x8xf32>
    %364 = vector.extract_strided_slice %316 {offsets = [0, 24], sizes = [8, 8], strides = [1, 1]} : vector<8x32xf32> to vector<8x8xf32>
    %365 = vector.extract_strided_slice %317 {offsets = [0, 24], sizes = [8, 8], strides = [1, 1]} : vector<8x32xf32> to vector<8x8xf32>
    %cst_168 = arith.constant dense<0.000000e+00> : vector<8x8xf32>
    %366 = tpu.matmul %363, %364, %cst_168 {dimension_numbers = #tpu.dot_dimension_numbers<[1], [1], [0], [0], [0, 0, 1, 0], [], []>} : vector<8x8xf32>, vector<8x8xf32>, vector<8x8xf32> -> vector<8x8xf32>
    %cst_169 = arith.constant dense<0xFF800000> : vector<8xf32>
    %367 = vector.multi_reduction <maximumf>, %366, %cst_169 [1] : vector<8x8xf32> to vector<8xf32>
    %368 = vector.shape_cast %367 : vector<8xf32> to vector<8x1xf32>
    %369 = vector.broadcast %368 : vector<8x1xf32> to vector<8x8xf32>
    %370 = arith.subf %366, %369 : vector<8x8xf32>
    %371 = math.exp %370 : vector<8x8xf32>
    %cst_170 = arith.constant dense<0.000000e+00> : vector<8xf32>
    %372 = vector.multi_reduction <add>, %371, %cst_170 [1] : vector<8x8xf32> to vector<8xf32>
    %373 = vector.shape_cast %372 : vector<8xf32> to vector<8x1xf32>
    %374 = tpu.reciprocal %373 {approx = true} : vector<8x1xf32> -> vector<8x1xf32>
    %375 = vector.broadcast %374 : vector<8x1xf32> to vector<8x8xf32>
    %376 = arith.mulf %371, %375 : vector<8x8xf32>
    %cst_171 = arith.constant dense<0.000000e+00> : vector<8x8xf32>
    %377 = tpu.matmul %376, %365, %cst_171 {dimension_numbers = #tpu.dot_dimension_numbers<[1], [0], [0], [1], [0, 0, 1, 1], [], []>} : vector<8x8xf32>, vector<8x8xf32>, vector<8x8xf32> -> vector<8x8xf32>
    %378 = tpu.concatenate %332, %347, %362, %377 in 1 : vector<8x8xf32>, vector<8x8xf32>, vector<8x8xf32>, vector<8x8xf32> -> vector<8x32xf32>
    %cst_172 = arith.constant dense<0.000000e+00> : vector<8x32xf32>
    %379 = tpu.matmul %378, %309, %cst_172 {dimension_numbers = #tpu.dot_dimension_numbers<[1], [0], [0], [1], [0, 0, 1, 1], [], []>} : vector<8x32xf32>, vector<32x32xf32>, vector<8x32xf32> -> vector<8x32xf32>
    %380 = vector.broadcast %311 : vector<1x32xf32> to vector<8x32xf32>
    %381 = arith.addf %379, %380 : vector<8x32xf32>
    %382 = arith.addf %303, %381 : vector<8x32xf32>
    %c0_173 = arith.constant 0 : index
    %c0_174 = arith.constant 0 : index
    %c0_175 = arith.constant 0 : index
    %383 = vector.load %arg19[%c0_173, %c0_174, %c0_175] : memref<2x1x32xf32, #tpu.memory_space<vmem>>, vector<1x1x32xf32>
    %384 = vector.shape_cast %383 : vector<1x1x32xf32> to vector<1x32xf32>
    %c0_176 = arith.constant 0 : index
    %c0_177 = arith.constant 0 : index
    %c0_178 = arith.constant 0 : index
    %385 = vector.load %arg20[%c0_176, %c0_177, %c0_178] : memref<2x1x32xf32, #tpu.memory_space<vmem>>, vector<1x1x32xf32>
    %386 = vector.shape_cast %385 : vector<1x1x32xf32> to vector<1x32xf32>
    %cst_179 = arith.constant dense<0.000000e+00> : vector<8xf32>
    %387 = vector.multi_reduction <add>, %382, %cst_179 [1] : vector<8x32xf32> to vector<8xf32>
    %388 = vector.shape_cast %387 : vector<8xf32> to vector<8x1xf32>
    %cst_180 = arith.constant 3.200000e+01 : f32
    %389 = vector.broadcast %cst_180 : f32 to vector<8x1xf32>
    %390 = arith.divf %388, %389 : vector<8x1xf32>
    %391 = vector.broadcast %390 : vector<8x1xf32> to vector<8x32xf32>
    %392 = arith.subf %382, %391 : vector<8x32xf32>
    %393 = arith.mulf %392, %392 : vector<8x32xf32>
    %cst_181 = arith.constant dense<0.000000e+00> : vector<8xf32>
    %394 = vector.multi_reduction <add>, %393, %cst_181 [1] : vector<8x32xf32> to vector<8xf32>
    %395 = vector.shape_cast %394 : vector<8xf32> to vector<8x1xf32>
    %cst_182 = arith.constant 3.200000e+01 : f32
    %396 = vector.broadcast %cst_182 : f32 to vector<8x1xf32>
    %397 = arith.divf %395, %396 : vector<8x1xf32>
    %cst_183 = arith.constant 9.99999974E-6 : f32
    %398 = vector.broadcast %cst_183 : f32 to vector<8x1xf32>
    %399 = arith.addf %397, %398 : vector<8x1xf32>
    %400 = math.rsqrt %399 : vector<8x1xf32>
    %401 = vector.broadcast %400 : vector<8x1xf32> to vector<8x32xf32>
    %402 = arith.mulf %392, %401 : vector<8x32xf32>
    %403 = vector.broadcast %384 : vector<1x32xf32> to vector<8x32xf32>
    %404 = arith.mulf %402, %403 : vector<8x32xf32>
    %405 = vector.broadcast %386 : vector<1x32xf32> to vector<8x32xf32>
    %406 = arith.addf %404, %405 : vector<8x32xf32>
    %c0_184 = arith.constant 0 : index
    %c0_185 = arith.constant 0 : index
    %c0_186 = arith.constant 0 : index
    %407 = vector.load %arg21[%c0_184, %c0_185, %c0_186] : memref<2x32x96xf32, #tpu.memory_space<vmem>>, vector<1x32x96xf32>
    %408 = vector.shape_cast %407 : vector<1x32x96xf32> to vector<32x96xf32>
    %c0_187 = arith.constant 0 : index
    %c0_188 = arith.constant 0 : index
    %c0_189 = arith.constant 0 : index
    %409 = vector.load %arg22[%c0_187, %c0_188, %c0_189] : memref<2x1x96xf32, #tpu.memory_space<vmem>>, vector<1x1x96xf32>
    %410 = vector.shape_cast %409 : vector<1x1x96xf32> to vector<1x96xf32>
    %c0_190 = arith.constant 0 : index
    %c0_191 = arith.constant 0 : index
    %c0_192 = arith.constant 0 : index
    %411 = vector.load %arg23[%c0_190, %c0_191, %c0_192] : memref<2x32x32xf32, #tpu.memory_space<vmem>>, vector<1x32x32xf32>
    %412 = vector.shape_cast %411 : vector<1x32x32xf32> to vector<32x32xf32>
    %c0_193 = arith.constant 0 : index
    %c0_194 = arith.constant 0 : index
    %c0_195 = arith.constant 0 : index
    %413 = vector.load %arg24[%c0_193, %c0_194, %c0_195] : memref<2x1x32xf32, #tpu.memory_space<vmem>>, vector<1x1x32xf32>
    %414 = vector.shape_cast %413 : vector<1x1x32xf32> to vector<1x32xf32>
    %415 = vector.extract_strided_slice %408 {offsets = [0, 0], sizes = [32, 32], strides = [1, 1]} : vector<32x96xf32> to vector<32x32xf32>
    %cst_196 = arith.constant dense<0.000000e+00> : vector<8x32xf32>
    %416 = tpu.matmul %406, %415, %cst_196 {dimension_numbers = #tpu.dot_dimension_numbers<[1], [0], [0], [1], [0, 0, 1, 1], [], []>} : vector<8x32xf32>, vector<32x32xf32>, vector<8x32xf32> -> vector<8x32xf32>
    %417 = vector.extract_strided_slice %410 {offsets = [0, 0], sizes = [1, 32], strides = [1, 1]} : vector<1x96xf32> to vector<1x32xf32>
    %418 = vector.broadcast %417 : vector<1x32xf32> to vector<8x32xf32>
    %419 = arith.addf %416, %418 : vector<8x32xf32>
    %420 = vector.extract_strided_slice %408 {offsets = [0, 32], sizes = [32, 64], strides = [1, 1]} : vector<32x96xf32> to vector<32x64xf32>
    %cst_197 = arith.constant dense<0.000000e+00> : vector<8x64xf32>
    %421 = tpu.matmul %303, %420, %cst_197 {dimension_numbers = #tpu.dot_dimension_numbers<[1], [0], [0], [1], [0, 0, 1, 1], [], []>} : vector<8x32xf32>, vector<32x64xf32>, vector<8x64xf32> -> vector<8x64xf32>
    %422 = vector.extract_strided_slice %410 {offsets = [0, 32], sizes = [1, 64], strides = [1, 1]} : vector<1x96xf32> to vector<1x64xf32>
    %423 = vector.broadcast %422 : vector<1x64xf32> to vector<8x64xf32>
    %424 = arith.addf %421, %423 : vector<8x64xf32>
    %425 = vector.extract_strided_slice %424 {offsets = [0, 0], sizes = [8, 32], strides = [1, 1]} : vector<8x64xf32> to vector<8x32xf32>
    %426 = vector.extract_strided_slice %424 {offsets = [0, 32], sizes = [8, 32], strides = [1, 1]} : vector<8x64xf32> to vector<8x32xf32>
    %427 = vector.extract_strided_slice %419 {offsets = [0, 0], sizes = [8, 8], strides = [1, 1]} : vector<8x32xf32> to vector<8x8xf32>
    %428 = vector.extract_strided_slice %425 {offsets = [0, 0], sizes = [8, 8], strides = [1, 1]} : vector<8x32xf32> to vector<8x8xf32>
    %429 = vector.extract_strided_slice %426 {offsets = [0, 0], sizes = [8, 8], strides = [1, 1]} : vector<8x32xf32> to vector<8x8xf32>
    %cst_198 = arith.constant dense<0.000000e+00> : vector<8x8xf32>
    %430 = tpu.matmul %427, %428, %cst_198 {dimension_numbers = #tpu.dot_dimension_numbers<[1], [1], [0], [0], [0, 0, 1, 0], [], []>} : vector<8x8xf32>, vector<8x8xf32>, vector<8x8xf32> -> vector<8x8xf32>
    %cst_199 = arith.constant dense<0xFF800000> : vector<8xf32>
    %431 = vector.multi_reduction <maximumf>, %430, %cst_199 [1] : vector<8x8xf32> to vector<8xf32>
    %432 = vector.shape_cast %431 : vector<8xf32> to vector<8x1xf32>
    %433 = vector.broadcast %432 : vector<8x1xf32> to vector<8x8xf32>
    %434 = arith.subf %430, %433 : vector<8x8xf32>
    %435 = math.exp %434 : vector<8x8xf32>
    %cst_200 = arith.constant dense<0.000000e+00> : vector<8xf32>
    %436 = vector.multi_reduction <add>, %435, %cst_200 [1] : vector<8x8xf32> to vector<8xf32>
    %437 = vector.shape_cast %436 : vector<8xf32> to vector<8x1xf32>
    %438 = tpu.reciprocal %437 {approx = true} : vector<8x1xf32> -> vector<8x1xf32>
    %439 = vector.broadcast %438 : vector<8x1xf32> to vector<8x8xf32>
    %440 = arith.mulf %435, %439 : vector<8x8xf32>
    %cst_201 = arith.constant dense<0.000000e+00> : vector<8x8xf32>
    %441 = tpu.matmul %440, %429, %cst_201 {dimension_numbers = #tpu.dot_dimension_numbers<[1], [0], [0], [1], [0, 0, 1, 1], [], []>} : vector<8x8xf32>, vector<8x8xf32>, vector<8x8xf32> -> vector<8x8xf32>
    %442 = vector.extract_strided_slice %419 {offsets = [0, 8], sizes = [8, 8], strides = [1, 1]} : vector<8x32xf32> to vector<8x8xf32>
    %443 = vector.extract_strided_slice %425 {offsets = [0, 8], sizes = [8, 8], strides = [1, 1]} : vector<8x32xf32> to vector<8x8xf32>
    %444 = vector.extract_strided_slice %426 {offsets = [0, 8], sizes = [8, 8], strides = [1, 1]} : vector<8x32xf32> to vector<8x8xf32>
    %cst_202 = arith.constant dense<0.000000e+00> : vector<8x8xf32>
    %445 = tpu.matmul %442, %443, %cst_202 {dimension_numbers = #tpu.dot_dimension_numbers<[1], [1], [0], [0], [0, 0, 1, 0], [], []>} : vector<8x8xf32>, vector<8x8xf32>, vector<8x8xf32> -> vector<8x8xf32>
    %cst_203 = arith.constant dense<0xFF800000> : vector<8xf32>
    %446 = vector.multi_reduction <maximumf>, %445, %cst_203 [1] : vector<8x8xf32> to vector<8xf32>
    %447 = vector.shape_cast %446 : vector<8xf32> to vector<8x1xf32>
    %448 = vector.broadcast %447 : vector<8x1xf32> to vector<8x8xf32>
    %449 = arith.subf %445, %448 : vector<8x8xf32>
    %450 = math.exp %449 : vector<8x8xf32>
    %cst_204 = arith.constant dense<0.000000e+00> : vector<8xf32>
    %451 = vector.multi_reduction <add>, %450, %cst_204 [1] : vector<8x8xf32> to vector<8xf32>
    %452 = vector.shape_cast %451 : vector<8xf32> to vector<8x1xf32>
    %453 = tpu.reciprocal %452 {approx = true} : vector<8x1xf32> -> vector<8x1xf32>
    %454 = vector.broadcast %453 : vector<8x1xf32> to vector<8x8xf32>
    %455 = arith.mulf %450, %454 : vector<8x8xf32>
    %cst_205 = arith.constant dense<0.000000e+00> : vector<8x8xf32>
    %456 = tpu.matmul %455, %444, %cst_205 {dimension_numbers = #tpu.dot_dimension_numbers<[1], [0], [0], [1], [0, 0, 1, 1], [], []>} : vector<8x8xf32>, vector<8x8xf32>, vector<8x8xf32> -> vector<8x8xf32>
    %457 = vector.extract_strided_slice %419 {offsets = [0, 16], sizes = [8, 8], strides = [1, 1]} : vector<8x32xf32> to vector<8x8xf32>
    %458 = vector.extract_strided_slice %425 {offsets = [0, 16], sizes = [8, 8], strides = [1, 1]} : vector<8x32xf32> to vector<8x8xf32>
    %459 = vector.extract_strided_slice %426 {offsets = [0, 16], sizes = [8, 8], strides = [1, 1]} : vector<8x32xf32> to vector<8x8xf32>
    %cst_206 = arith.constant dense<0.000000e+00> : vector<8x8xf32>
    %460 = tpu.matmul %457, %458, %cst_206 {dimension_numbers = #tpu.dot_dimension_numbers<[1], [1], [0], [0], [0, 0, 1, 0], [], []>} : vector<8x8xf32>, vector<8x8xf32>, vector<8x8xf32> -> vector<8x8xf32>
    %cst_207 = arith.constant dense<0xFF800000> : vector<8xf32>
    %461 = vector.multi_reduction <maximumf>, %460, %cst_207 [1] : vector<8x8xf32> to vector<8xf32>
    %462 = vector.shape_cast %461 : vector<8xf32> to vector<8x1xf32>
    %463 = vector.broadcast %462 : vector<8x1xf32> to vector<8x8xf32>
    %464 = arith.subf %460, %463 : vector<8x8xf32>
    %465 = math.exp %464 : vector<8x8xf32>
    %cst_208 = arith.constant dense<0.000000e+00> : vector<8xf32>
    %466 = vector.multi_reduction <add>, %465, %cst_208 [1] : vector<8x8xf32> to vector<8xf32>
    %467 = vector.shape_cast %466 : vector<8xf32> to vector<8x1xf32>
    %468 = tpu.reciprocal %467 {approx = true} : vector<8x1xf32> -> vector<8x1xf32>
    %469 = vector.broadcast %468 : vector<8x1xf32> to vector<8x8xf32>
    %470 = arith.mulf %465, %469 : vector<8x8xf32>
    %cst_209 = arith.constant dense<0.000000e+00> : vector<8x8xf32>
    %471 = tpu.matmul %470, %459, %cst_209 {dimension_numbers = #tpu.dot_dimension_numbers<[1], [0], [0], [1], [0, 0, 1, 1], [], []>} : vector<8x8xf32>, vector<8x8xf32>, vector<8x8xf32> -> vector<8x8xf32>
    %472 = vector.extract_strided_slice %419 {offsets = [0, 24], sizes = [8, 8], strides = [1, 1]} : vector<8x32xf32> to vector<8x8xf32>
    %473 = vector.extract_strided_slice %425 {offsets = [0, 24], sizes = [8, 8], strides = [1, 1]} : vector<8x32xf32> to vector<8x8xf32>
    %474 = vector.extract_strided_slice %426 {offsets = [0, 24], sizes = [8, 8], strides = [1, 1]} : vector<8x32xf32> to vector<8x8xf32>
    %cst_210 = arith.constant dense<0.000000e+00> : vector<8x8xf32>
    %475 = tpu.matmul %472, %473, %cst_210 {dimension_numbers = #tpu.dot_dimension_numbers<[1], [1], [0], [0], [0, 0, 1, 0], [], []>} : vector<8x8xf32>, vector<8x8xf32>, vector<8x8xf32> -> vector<8x8xf32>
    %cst_211 = arith.constant dense<0xFF800000> : vector<8xf32>
    %476 = vector.multi_reduction <maximumf>, %475, %cst_211 [1] : vector<8x8xf32> to vector<8xf32>
    %477 = vector.shape_cast %476 : vector<8xf32> to vector<8x1xf32>
    %478 = vector.broadcast %477 : vector<8x1xf32> to vector<8x8xf32>
    %479 = arith.subf %475, %478 : vector<8x8xf32>
    %480 = math.exp %479 : vector<8x8xf32>
    %cst_212 = arith.constant dense<0.000000e+00> : vector<8xf32>
    %481 = vector.multi_reduction <add>, %480, %cst_212 [1] : vector<8x8xf32> to vector<8xf32>
    %482 = vector.shape_cast %481 : vector<8xf32> to vector<8x1xf32>
    %483 = tpu.reciprocal %482 {approx = true} : vector<8x1xf32> -> vector<8x1xf32>
    %484 = vector.broadcast %483 : vector<8x1xf32> to vector<8x8xf32>
    %485 = arith.mulf %480, %484 : vector<8x8xf32>
    %cst_213 = arith.constant dense<0.000000e+00> : vector<8x8xf32>
    %486 = tpu.matmul %485, %474, %cst_213 {dimension_numbers = #tpu.dot_dimension_numbers<[1], [0], [0], [1], [0, 0, 1, 1], [], []>} : vector<8x8xf32>, vector<8x8xf32>, vector<8x8xf32> -> vector<8x8xf32>
    %487 = tpu.concatenate %441, %456, %471, %486 in 1 : vector<8x8xf32>, vector<8x8xf32>, vector<8x8xf32>, vector<8x8xf32> -> vector<8x32xf32>
    %cst_214 = arith.constant dense<0.000000e+00> : vector<8x32xf32>
    %488 = tpu.matmul %487, %412, %cst_214 {dimension_numbers = #tpu.dot_dimension_numbers<[1], [0], [0], [1], [0, 0, 1, 1], [], []>} : vector<8x32xf32>, vector<32x32xf32>, vector<8x32xf32> -> vector<8x32xf32>
    %489 = vector.broadcast %414 : vector<1x32xf32> to vector<8x32xf32>
    %490 = arith.addf %488, %489 : vector<8x32xf32>
    %491 = arith.addf %406, %490 : vector<8x32xf32>
    %c0_215 = arith.constant 0 : index
    %c0_216 = arith.constant 0 : index
    %c0_217 = arith.constant 0 : index
    %492 = vector.load %arg25[%c0_215, %c0_216, %c0_217] : memref<2x1x32xf32, #tpu.memory_space<vmem>>, vector<1x1x32xf32>
    %493 = vector.shape_cast %492 : vector<1x1x32xf32> to vector<1x32xf32>
    %c0_218 = arith.constant 0 : index
    %c0_219 = arith.constant 0 : index
    %c0_220 = arith.constant 0 : index
    %494 = vector.load %arg26[%c0_218, %c0_219, %c0_220] : memref<2x1x32xf32, #tpu.memory_space<vmem>>, vector<1x1x32xf32>
    %495 = vector.shape_cast %494 : vector<1x1x32xf32> to vector<1x32xf32>
    %cst_221 = arith.constant dense<0.000000e+00> : vector<8xf32>
    %496 = vector.multi_reduction <add>, %491, %cst_221 [1] : vector<8x32xf32> to vector<8xf32>
    %497 = vector.shape_cast %496 : vector<8xf32> to vector<8x1xf32>
    %cst_222 = arith.constant 3.200000e+01 : f32
    %498 = vector.broadcast %cst_222 : f32 to vector<8x1xf32>
    %499 = arith.divf %497, %498 : vector<8x1xf32>
    %500 = vector.broadcast %499 : vector<8x1xf32> to vector<8x32xf32>
    %501 = arith.subf %491, %500 : vector<8x32xf32>
    %502 = arith.mulf %501, %501 : vector<8x32xf32>
    %cst_223 = arith.constant dense<0.000000e+00> : vector<8xf32>
    %503 = vector.multi_reduction <add>, %502, %cst_223 [1] : vector<8x32xf32> to vector<8xf32>
    %504 = vector.shape_cast %503 : vector<8xf32> to vector<8x1xf32>
    %cst_224 = arith.constant 3.200000e+01 : f32
    %505 = vector.broadcast %cst_224 : f32 to vector<8x1xf32>
    %506 = arith.divf %504, %505 : vector<8x1xf32>
    %cst_225 = arith.constant 9.99999974E-6 : f32
    %507 = vector.broadcast %cst_225 : f32 to vector<8x1xf32>
    %508 = arith.addf %506, %507 : vector<8x1xf32>
    %509 = math.rsqrt %508 : vector<8x1xf32>
    %510 = vector.broadcast %509 : vector<8x1xf32> to vector<8x32xf32>
    %511 = arith.mulf %501, %510 : vector<8x32xf32>
    %512 = vector.broadcast %493 : vector<1x32xf32> to vector<8x32xf32>
    %513 = arith.mulf %511, %512 : vector<8x32xf32>
    %514 = vector.broadcast %495 : vector<1x32xf32> to vector<8x32xf32>
    %515 = arith.addf %513, %514 : vector<8x32xf32>
    %c0_226 = arith.constant 0 : index
    %c0_227 = arith.constant 0 : index
    %c0_228 = arith.constant 0 : index
    %516 = vector.load %arg27[%c0_226, %c0_227, %c0_228] : memref<2x32x64xf32, #tpu.memory_space<vmem>>, vector<1x32x64xf32>
    %517 = vector.shape_cast %516 : vector<1x32x64xf32> to vector<32x64xf32>
    %c0_229 = arith.constant 0 : index
    %c0_230 = arith.constant 0 : index
    %c0_231 = arith.constant 0 : index
    %518 = vector.load %arg28[%c0_229, %c0_230, %c0_231] : memref<2x1x64xf32, #tpu.memory_space<vmem>>, vector<1x1x64xf32>
    %519 = vector.shape_cast %518 : vector<1x1x64xf32> to vector<1x64xf32>
    %c0_232 = arith.constant 0 : index
    %c0_233 = arith.constant 0 : index
    %c0_234 = arith.constant 0 : index
    %520 = vector.load %arg29[%c0_232, %c0_233, %c0_234] : memref<2x64x32xf32, #tpu.memory_space<vmem>>, vector<1x64x32xf32>
    %521 = vector.shape_cast %520 : vector<1x64x32xf32> to vector<64x32xf32>
    %c0_235 = arith.constant 0 : index
    %c0_236 = arith.constant 0 : index
    %c0_237 = arith.constant 0 : index
    %522 = vector.load %arg30[%c0_235, %c0_236, %c0_237] : memref<2x1x32xf32, #tpu.memory_space<vmem>>, vector<1x1x32xf32>
    %523 = vector.shape_cast %522 : vector<1x1x32xf32> to vector<1x32xf32>
    %cst_238 = arith.constant dense<0.000000e+00> : vector<8x64xf32>
    %524 = tpu.matmul %515, %517, %cst_238 {dimension_numbers = #tpu.dot_dimension_numbers<[1], [0], [0], [1], [0, 0, 1, 1], [], []>} : vector<8x32xf32>, vector<32x64xf32>, vector<8x64xf32> -> vector<8x64xf32>
    %525 = vector.broadcast %519 : vector<1x64xf32> to vector<8x64xf32>
    %526 = arith.addf %524, %525 : vector<8x64xf32>
    %cst_239 = arith.constant 0.000000e+00 : f32
    %527 = vector.broadcast %cst_239 : f32 to vector<8x64xf32>
    %528 = arith.maximumf %526, %527 : vector<8x64xf32>
    %cst_240 = arith.constant dense<0.000000e+00> : vector<8x32xf32>
    %529 = tpu.matmul %528, %521, %cst_240 {dimension_numbers = #tpu.dot_dimension_numbers<[1], [0], [0], [1], [0, 0, 1, 1], [], []>} : vector<8x64xf32>, vector<64x32xf32>, vector<8x32xf32> -> vector<8x32xf32>
    %530 = vector.broadcast %523 : vector<1x32xf32> to vector<8x32xf32>
    %531 = arith.addf %529, %530 : vector<8x32xf32>
    %532 = arith.addf %515, %531 : vector<8x32xf32>
    %c0_241 = arith.constant 0 : index
    %c0_242 = arith.constant 0 : index
    %c0_243 = arith.constant 0 : index
    %533 = vector.load %arg31[%c0_241, %c0_242, %c0_243] : memref<2x1x32xf32, #tpu.memory_space<vmem>>, vector<1x1x32xf32>
    %534 = vector.shape_cast %533 : vector<1x1x32xf32> to vector<1x32xf32>
    %c0_244 = arith.constant 0 : index
    %c0_245 = arith.constant 0 : index
    %c0_246 = arith.constant 0 : index
    %535 = vector.load %arg32[%c0_244, %c0_245, %c0_246] : memref<2x1x32xf32, #tpu.memory_space<vmem>>, vector<1x1x32xf32>
    %536 = vector.shape_cast %535 : vector<1x1x32xf32> to vector<1x32xf32>
    %cst_247 = arith.constant dense<0.000000e+00> : vector<8xf32>
    %537 = vector.multi_reduction <add>, %532, %cst_247 [1] : vector<8x32xf32> to vector<8xf32>
    %538 = vector.shape_cast %537 : vector<8xf32> to vector<8x1xf32>
    %cst_248 = arith.constant 3.200000e+01 : f32
    %539 = vector.broadcast %cst_248 : f32 to vector<8x1xf32>
    %540 = arith.divf %538, %539 : vector<8x1xf32>
    %541 = vector.broadcast %540 : vector<8x1xf32> to vector<8x32xf32>
    %542 = arith.subf %532, %541 : vector<8x32xf32>
    %543 = arith.mulf %542, %542 : vector<8x32xf32>
    %cst_249 = arith.constant dense<0.000000e+00> : vector<8xf32>
    %544 = vector.multi_reduction <add>, %543, %cst_249 [1] : vector<8x32xf32> to vector<8xf32>
    %545 = vector.shape_cast %544 : vector<8xf32> to vector<8x1xf32>
    %cst_250 = arith.constant 3.200000e+01 : f32
    %546 = vector.broadcast %cst_250 : f32 to vector<8x1xf32>
    %547 = arith.divf %545, %546 : vector<8x1xf32>
    %cst_251 = arith.constant 9.99999974E-6 : f32
    %548 = vector.broadcast %cst_251 : f32 to vector<8x1xf32>
    %549 = arith.addf %547, %548 : vector<8x1xf32>
    %550 = math.rsqrt %549 : vector<8x1xf32>
    %551 = vector.broadcast %550 : vector<8x1xf32> to vector<8x32xf32>
    %552 = arith.mulf %542, %551 : vector<8x32xf32>
    %553 = vector.broadcast %534 : vector<1x32xf32> to vector<8x32xf32>
    %554 = arith.mulf %552, %553 : vector<8x32xf32>
    %555 = vector.broadcast %536 : vector<1x32xf32> to vector<8x32xf32>
    %556 = arith.addf %554, %555 : vector<8x32xf32>
    %c1_252 = arith.constant 1 : index
    %c0_253 = arith.constant 0 : index
    %c0_254 = arith.constant 0 : index
    %557 = vector.load %arg15[%c1_252, %c0_253, %c0_254] : memref<2x32x96xf32, #tpu.memory_space<vmem>>, vector<1x32x96xf32>
    %558 = vector.shape_cast %557 : vector<1x32x96xf32> to vector<32x96xf32>
    %c1_255 = arith.constant 1 : index
    %c0_256 = arith.constant 0 : index
    %c0_257 = arith.constant 0 : index
    %559 = vector.load %arg16[%c1_255, %c0_256, %c0_257] : memref<2x1x96xf32, #tpu.memory_space<vmem>>, vector<1x1x96xf32>
    %560 = vector.shape_cast %559 : vector<1x1x96xf32> to vector<1x96xf32>
    %c1_258 = arith.constant 1 : index
    %c0_259 = arith.constant 0 : index
    %c0_260 = arith.constant 0 : index
    %561 = vector.load %arg17[%c1_258, %c0_259, %c0_260] : memref<2x32x32xf32, #tpu.memory_space<vmem>>, vector<1x32x32xf32>
    %562 = vector.shape_cast %561 : vector<1x32x32xf32> to vector<32x32xf32>
    %c1_261 = arith.constant 1 : index
    %c0_262 = arith.constant 0 : index
    %c0_263 = arith.constant 0 : index
    %563 = vector.load %arg18[%c1_261, %c0_262, %c0_263] : memref<2x1x32xf32, #tpu.memory_space<vmem>>, vector<1x1x32xf32>
    %564 = vector.shape_cast %563 : vector<1x1x32xf32> to vector<1x32xf32>
    %cst_264 = arith.constant dense<0.000000e+00> : vector<8x96xf32>
    %565 = tpu.matmul %556, %558, %cst_264 {dimension_numbers = #tpu.dot_dimension_numbers<[1], [0], [0], [1], [0, 0, 1, 1], [], []>} : vector<8x32xf32>, vector<32x96xf32>, vector<8x96xf32> -> vector<8x96xf32>
    %566 = vector.broadcast %560 : vector<1x96xf32> to vector<8x96xf32>
    %567 = arith.addf %565, %566 : vector<8x96xf32>
    %568 = vector.extract_strided_slice %567 {offsets = [0, 0], sizes = [8, 32], strides = [1, 1]} : vector<8x96xf32> to vector<8x32xf32>
    %569 = vector.extract_strided_slice %567 {offsets = [0, 32], sizes = [8, 32], strides = [1, 1]} : vector<8x96xf32> to vector<8x32xf32>
    %570 = vector.extract_strided_slice %567 {offsets = [0, 64], sizes = [8, 32], strides = [1, 1]} : vector<8x96xf32> to vector<8x32xf32>
    %571 = vector.extract_strided_slice %568 {offsets = [0, 0], sizes = [8, 8], strides = [1, 1]} : vector<8x32xf32> to vector<8x8xf32>
    %572 = vector.extract_strided_slice %569 {offsets = [0, 0], sizes = [8, 8], strides = [1, 1]} : vector<8x32xf32> to vector<8x8xf32>
    %573 = vector.extract_strided_slice %570 {offsets = [0, 0], sizes = [8, 8], strides = [1, 1]} : vector<8x32xf32> to vector<8x8xf32>
    %cst_265 = arith.constant dense<0.000000e+00> : vector<8x8xf32>
    %574 = tpu.matmul %571, %572, %cst_265 {dimension_numbers = #tpu.dot_dimension_numbers<[1], [1], [0], [0], [0, 0, 1, 0], [], []>} : vector<8x8xf32>, vector<8x8xf32>, vector<8x8xf32> -> vector<8x8xf32>
    %cst_266 = arith.constant dense<0xFF800000> : vector<8xf32>
    %575 = vector.multi_reduction <maximumf>, %574, %cst_266 [1] : vector<8x8xf32> to vector<8xf32>
    %576 = vector.shape_cast %575 : vector<8xf32> to vector<8x1xf32>
    %577 = vector.broadcast %576 : vector<8x1xf32> to vector<8x8xf32>
    %578 = arith.subf %574, %577 : vector<8x8xf32>
    %579 = math.exp %578 : vector<8x8xf32>
    %cst_267 = arith.constant dense<0.000000e+00> : vector<8xf32>
    %580 = vector.multi_reduction <add>, %579, %cst_267 [1] : vector<8x8xf32> to vector<8xf32>
    %581 = vector.shape_cast %580 : vector<8xf32> to vector<8x1xf32>
    %582 = tpu.reciprocal %581 {approx = true} : vector<8x1xf32> -> vector<8x1xf32>
    %583 = vector.broadcast %582 : vector<8x1xf32> to vector<8x8xf32>
    %584 = arith.mulf %579, %583 : vector<8x8xf32>
    %cst_268 = arith.constant dense<0.000000e+00> : vector<8x8xf32>
    %585 = tpu.matmul %584, %573, %cst_268 {dimension_numbers = #tpu.dot_dimension_numbers<[1], [0], [0], [1], [0, 0, 1, 1], [], []>} : vector<8x8xf32>, vector<8x8xf32>, vector<8x8xf32> -> vector<8x8xf32>
    %586 = vector.extract_strided_slice %568 {offsets = [0, 8], sizes = [8, 8], strides = [1, 1]} : vector<8x32xf32> to vector<8x8xf32>
    %587 = vector.extract_strided_slice %569 {offsets = [0, 8], sizes = [8, 8], strides = [1, 1]} : vector<8x32xf32> to vector<8x8xf32>
    %588 = vector.extract_strided_slice %570 {offsets = [0, 8], sizes = [8, 8], strides = [1, 1]} : vector<8x32xf32> to vector<8x8xf32>
    %cst_269 = arith.constant dense<0.000000e+00> : vector<8x8xf32>
    %589 = tpu.matmul %586, %587, %cst_269 {dimension_numbers = #tpu.dot_dimension_numbers<[1], [1], [0], [0], [0, 0, 1, 0], [], []>} : vector<8x8xf32>, vector<8x8xf32>, vector<8x8xf32> -> vector<8x8xf32>
    %cst_270 = arith.constant dense<0xFF800000> : vector<8xf32>
    %590 = vector.multi_reduction <maximumf>, %589, %cst_270 [1] : vector<8x8xf32> to vector<8xf32>
    %591 = vector.shape_cast %590 : vector<8xf32> to vector<8x1xf32>
    %592 = vector.broadcast %591 : vector<8x1xf32> to vector<8x8xf32>
    %593 = arith.subf %589, %592 : vector<8x8xf32>
    %594 = math.exp %593 : vector<8x8xf32>
    %cst_271 = arith.constant dense<0.000000e+00> : vector<8xf32>
    %595 = vector.multi_reduction <add>, %594, %cst_271 [1] : vector<8x8xf32> to vector<8xf32>
    %596 = vector.shape_cast %595 : vector<8xf32> to vector<8x1xf32>
    %597 = tpu.reciprocal %596 {approx = true} : vector<8x1xf32> -> vector<8x1xf32>
    %598 = vector.broadcast %597 : vector<8x1xf32> to vector<8x8xf32>
    %599 = arith.mulf %594, %598 : vector<8x8xf32>
    %cst_272 = arith.constant dense<0.000000e+00> : vector<8x8xf32>
    %600 = tpu.matmul %599, %588, %cst_272 {dimension_numbers = #tpu.dot_dimension_numbers<[1], [0], [0], [1], [0, 0, 1, 1], [], []>} : vector<8x8xf32>, vector<8x8xf32>, vector<8x8xf32> -> vector<8x8xf32>
    %601 = vector.extract_strided_slice %568 {offsets = [0, 16], sizes = [8, 8], strides = [1, 1]} : vector<8x32xf32> to vector<8x8xf32>
    %602 = vector.extract_strided_slice %569 {offsets = [0, 16], sizes = [8, 8], strides = [1, 1]} : vector<8x32xf32> to vector<8x8xf32>
    %603 = vector.extract_strided_slice %570 {offsets = [0, 16], sizes = [8, 8], strides = [1, 1]} : vector<8x32xf32> to vector<8x8xf32>
    %cst_273 = arith.constant dense<0.000000e+00> : vector<8x8xf32>
    %604 = tpu.matmul %601, %602, %cst_273 {dimension_numbers = #tpu.dot_dimension_numbers<[1], [1], [0], [0], [0, 0, 1, 0], [], []>} : vector<8x8xf32>, vector<8x8xf32>, vector<8x8xf32> -> vector<8x8xf32>
    %cst_274 = arith.constant dense<0xFF800000> : vector<8xf32>
    %605 = vector.multi_reduction <maximumf>, %604, %cst_274 [1] : vector<8x8xf32> to vector<8xf32>
    %606 = vector.shape_cast %605 : vector<8xf32> to vector<8x1xf32>
    %607 = vector.broadcast %606 : vector<8x1xf32> to vector<8x8xf32>
    %608 = arith.subf %604, %607 : vector<8x8xf32>
    %609 = math.exp %608 : vector<8x8xf32>
    %cst_275 = arith.constant dense<0.000000e+00> : vector<8xf32>
    %610 = vector.multi_reduction <add>, %609, %cst_275 [1] : vector<8x8xf32> to vector<8xf32>
    %611 = vector.shape_cast %610 : vector<8xf32> to vector<8x1xf32>
    %612 = tpu.reciprocal %611 {approx = true} : vector<8x1xf32> -> vector<8x1xf32>
    %613 = vector.broadcast %612 : vector<8x1xf32> to vector<8x8xf32>
    %614 = arith.mulf %609, %613 : vector<8x8xf32>
    %cst_276 = arith.constant dense<0.000000e+00> : vector<8x8xf32>
    %615 = tpu.matmul %614, %603, %cst_276 {dimension_numbers = #tpu.dot_dimension_numbers<[1], [0], [0], [1], [0, 0, 1, 1], [], []>} : vector<8x8xf32>, vector<8x8xf32>, vector<8x8xf32> -> vector<8x8xf32>
    %616 = vector.extract_strided_slice %568 {offsets = [0, 24], sizes = [8, 8], strides = [1, 1]} : vector<8x32xf32> to vector<8x8xf32>
    %617 = vector.extract_strided_slice %569 {offsets = [0, 24], sizes = [8, 8], strides = [1, 1]} : vector<8x32xf32> to vector<8x8xf32>
    %618 = vector.extract_strided_slice %570 {offsets = [0, 24], sizes = [8, 8], strides = [1, 1]} : vector<8x32xf32> to vector<8x8xf32>
    %cst_277 = arith.constant dense<0.000000e+00> : vector<8x8xf32>
    %619 = tpu.matmul %616, %617, %cst_277 {dimension_numbers = #tpu.dot_dimension_numbers<[1], [1], [0], [0], [0, 0, 1, 0], [], []>} : vector<8x8xf32>, vector<8x8xf32>, vector<8x8xf32> -> vector<8x8xf32>
    %cst_278 = arith.constant dense<0xFF800000> : vector<8xf32>
    %620 = vector.multi_reduction <maximumf>, %619, %cst_278 [1] : vector<8x8xf32> to vector<8xf32>
    %621 = vector.shape_cast %620 : vector<8xf32> to vector<8x1xf32>
    %622 = vector.broadcast %621 : vector<8x1xf32> to vector<8x8xf32>
    %623 = arith.subf %619, %622 : vector<8x8xf32>
    %624 = math.exp %623 : vector<8x8xf32>
    %cst_279 = arith.constant dense<0.000000e+00> : vector<8xf32>
    %625 = vector.multi_reduction <add>, %624, %cst_279 [1] : vector<8x8xf32> to vector<8xf32>
    %626 = vector.shape_cast %625 : vector<8xf32> to vector<8x1xf32>
    %627 = tpu.reciprocal %626 {approx = true} : vector<8x1xf32> -> vector<8x1xf32>
    %628 = vector.broadcast %627 : vector<8x1xf32> to vector<8x8xf32>
    %629 = arith.mulf %624, %628 : vector<8x8xf32>
    %cst_280 = arith.constant dense<0.000000e+00> : vector<8x8xf32>
    %630 = tpu.matmul %629, %618, %cst_280 {dimension_numbers = #tpu.dot_dimension_numbers<[1], [0], [0], [1], [0, 0, 1, 1], [], []>} : vector<8x8xf32>, vector<8x8xf32>, vector<8x8xf32> -> vector<8x8xf32>
    %631 = tpu.concatenate %585, %600, %615, %630 in 1 : vector<8x8xf32>, vector<8x8xf32>, vector<8x8xf32>, vector<8x8xf32> -> vector<8x32xf32>
    %cst_281 = arith.constant dense<0.000000e+00> : vector<8x32xf32>
    %632 = tpu.matmul %631, %562, %cst_281 {dimension_numbers = #tpu.dot_dimension_numbers<[1], [0], [0], [1], [0, 0, 1, 1], [], []>} : vector<8x32xf32>, vector<32x32xf32>, vector<8x32xf32> -> vector<8x32xf32>
    %633 = vector.broadcast %564 : vector<1x32xf32> to vector<8x32xf32>
    %634 = arith.addf %632, %633 : vector<8x32xf32>
    %635 = arith.addf %556, %634 : vector<8x32xf32>
    %c1_282 = arith.constant 1 : index
    %c0_283 = arith.constant 0 : index
    %c0_284 = arith.constant 0 : index
    %636 = vector.load %arg19[%c1_282, %c0_283, %c0_284] : memref<2x1x32xf32, #tpu.memory_space<vmem>>, vector<1x1x32xf32>
    %637 = vector.shape_cast %636 : vector<1x1x32xf32> to vector<1x32xf32>
    %c1_285 = arith.constant 1 : index
    %c0_286 = arith.constant 0 : index
    %c0_287 = arith.constant 0 : index
    %638 = vector.load %arg20[%c1_285, %c0_286, %c0_287] : memref<2x1x32xf32, #tpu.memory_space<vmem>>, vector<1x1x32xf32>
    %639 = vector.shape_cast %638 : vector<1x1x32xf32> to vector<1x32xf32>
    %cst_288 = arith.constant dense<0.000000e+00> : vector<8xf32>
    %640 = vector.multi_reduction <add>, %635, %cst_288 [1] : vector<8x32xf32> to vector<8xf32>
    %641 = vector.shape_cast %640 : vector<8xf32> to vector<8x1xf32>
    %cst_289 = arith.constant 3.200000e+01 : f32
    %642 = vector.broadcast %cst_289 : f32 to vector<8x1xf32>
    %643 = arith.divf %641, %642 : vector<8x1xf32>
    %644 = vector.broadcast %643 : vector<8x1xf32> to vector<8x32xf32>
    %645 = arith.subf %635, %644 : vector<8x32xf32>
    %646 = arith.mulf %645, %645 : vector<8x32xf32>
    %cst_290 = arith.constant dense<0.000000e+00> : vector<8xf32>
    %647 = vector.multi_reduction <add>, %646, %cst_290 [1] : vector<8x32xf32> to vector<8xf32>
    %648 = vector.shape_cast %647 : vector<8xf32> to vector<8x1xf32>
    %cst_291 = arith.constant 3.200000e+01 : f32
    %649 = vector.broadcast %cst_291 : f32 to vector<8x1xf32>
    %650 = arith.divf %648, %649 : vector<8x1xf32>
    %cst_292 = arith.constant 9.99999974E-6 : f32
    %651 = vector.broadcast %cst_292 : f32 to vector<8x1xf32>
    %652 = arith.addf %650, %651 : vector<8x1xf32>
    %653 = math.rsqrt %652 : vector<8x1xf32>
    %654 = vector.broadcast %653 : vector<8x1xf32> to vector<8x32xf32>
    %655 = arith.mulf %645, %654 : vector<8x32xf32>
    %656 = vector.broadcast %637 : vector<1x32xf32> to vector<8x32xf32>
    %657 = arith.mulf %655, %656 : vector<8x32xf32>
    %658 = vector.broadcast %639 : vector<1x32xf32> to vector<8x32xf32>
    %659 = arith.addf %657, %658 : vector<8x32xf32>
    %c1_293 = arith.constant 1 : index
    %c0_294 = arith.constant 0 : index
    %c0_295 = arith.constant 0 : index
    %660 = vector.load %arg21[%c1_293, %c0_294, %c0_295] : memref<2x32x96xf32, #tpu.memory_space<vmem>>, vector<1x32x96xf32>
    %661 = vector.shape_cast %660 : vector<1x32x96xf32> to vector<32x96xf32>
    %c1_296 = arith.constant 1 : index
    %c0_297 = arith.constant 0 : index
    %c0_298 = arith.constant 0 : index
    %662 = vector.load %arg22[%c1_296, %c0_297, %c0_298] : memref<2x1x96xf32, #tpu.memory_space<vmem>>, vector<1x1x96xf32>
    %663 = vector.shape_cast %662 : vector<1x1x96xf32> to vector<1x96xf32>
    %c1_299 = arith.constant 1 : index
    %c0_300 = arith.constant 0 : index
    %c0_301 = arith.constant 0 : index
    %664 = vector.load %arg23[%c1_299, %c0_300, %c0_301] : memref<2x32x32xf32, #tpu.memory_space<vmem>>, vector<1x32x32xf32>
    %665 = vector.shape_cast %664 : vector<1x32x32xf32> to vector<32x32xf32>
    %c1_302 = arith.constant 1 : index
    %c0_303 = arith.constant 0 : index
    %c0_304 = arith.constant 0 : index
    %666 = vector.load %arg24[%c1_302, %c0_303, %c0_304] : memref<2x1x32xf32, #tpu.memory_space<vmem>>, vector<1x1x32xf32>
    %667 = vector.shape_cast %666 : vector<1x1x32xf32> to vector<1x32xf32>
    %668 = vector.extract_strided_slice %661 {offsets = [0, 0], sizes = [32, 32], strides = [1, 1]} : vector<32x96xf32> to vector<32x32xf32>
    %cst_305 = arith.constant dense<0.000000e+00> : vector<8x32xf32>
    %669 = tpu.matmul %659, %668, %cst_305 {dimension_numbers = #tpu.dot_dimension_numbers<[1], [0], [0], [1], [0, 0, 1, 1], [], []>} : vector<8x32xf32>, vector<32x32xf32>, vector<8x32xf32> -> vector<8x32xf32>
    %670 = vector.extract_strided_slice %663 {offsets = [0, 0], sizes = [1, 32], strides = [1, 1]} : vector<1x96xf32> to vector<1x32xf32>
    %671 = vector.broadcast %670 : vector<1x32xf32> to vector<8x32xf32>
    %672 = arith.addf %669, %671 : vector<8x32xf32>
    %673 = vector.extract_strided_slice %661 {offsets = [0, 32], sizes = [32, 64], strides = [1, 1]} : vector<32x96xf32> to vector<32x64xf32>
    %cst_306 = arith.constant dense<0.000000e+00> : vector<8x64xf32>
    %674 = tpu.matmul %303, %673, %cst_306 {dimension_numbers = #tpu.dot_dimension_numbers<[1], [0], [0], [1], [0, 0, 1, 1], [], []>} : vector<8x32xf32>, vector<32x64xf32>, vector<8x64xf32> -> vector<8x64xf32>
    %675 = vector.extract_strided_slice %663 {offsets = [0, 32], sizes = [1, 64], strides = [1, 1]} : vector<1x96xf32> to vector<1x64xf32>
    %676 = vector.broadcast %675 : vector<1x64xf32> to vector<8x64xf32>
    %677 = arith.addf %674, %676 : vector<8x64xf32>
    %678 = vector.extract_strided_slice %677 {offsets = [0, 0], sizes = [8, 32], strides = [1, 1]} : vector<8x64xf32> to vector<8x32xf32>
    %679 = vector.extract_strided_slice %677 {offsets = [0, 32], sizes = [8, 32], strides = [1, 1]} : vector<8x64xf32> to vector<8x32xf32>
    %680 = vector.extract_strided_slice %672 {offsets = [0, 0], sizes = [8, 8], strides = [1, 1]} : vector<8x32xf32> to vector<8x8xf32>
    %681 = vector.extract_strided_slice %678 {offsets = [0, 0], sizes = [8, 8], strides = [1, 1]} : vector<8x32xf32> to vector<8x8xf32>
    %682 = vector.extract_strided_slice %679 {offsets = [0, 0], sizes = [8, 8], strides = [1, 1]} : vector<8x32xf32> to vector<8x8xf32>
    %cst_307 = arith.constant dense<0.000000e+00> : vector<8x8xf32>
    %683 = tpu.matmul %680, %681, %cst_307 {dimension_numbers = #tpu.dot_dimension_numbers<[1], [1], [0], [0], [0, 0, 1, 0], [], []>} : vector<8x8xf32>, vector<8x8xf32>, vector<8x8xf32> -> vector<8x8xf32>
    %cst_308 = arith.constant dense<0xFF800000> : vector<8xf32>
    %684 = vector.multi_reduction <maximumf>, %683, %cst_308 [1] : vector<8x8xf32> to vector<8xf32>
    %685 = vector.shape_cast %684 : vector<8xf32> to vector<8x1xf32>
    %686 = vector.broadcast %685 : vector<8x1xf32> to vector<8x8xf32>
    %687 = arith.subf %683, %686 : vector<8x8xf32>
    %688 = math.exp %687 : vector<8x8xf32>
    %cst_309 = arith.constant dense<0.000000e+00> : vector<8xf32>
    %689 = vector.multi_reduction <add>, %688, %cst_309 [1] : vector<8x8xf32> to vector<8xf32>
    %690 = vector.shape_cast %689 : vector<8xf32> to vector<8x1xf32>
    %691 = tpu.reciprocal %690 {approx = true} : vector<8x1xf32> -> vector<8x1xf32>
    %692 = vector.broadcast %691 : vector<8x1xf32> to vector<8x8xf32>
    %693 = arith.mulf %688, %692 : vector<8x8xf32>
    %cst_310 = arith.constant dense<0.000000e+00> : vector<8x8xf32>
    %694 = tpu.matmul %693, %682, %cst_310 {dimension_numbers = #tpu.dot_dimension_numbers<[1], [0], [0], [1], [0, 0, 1, 1], [], []>} : vector<8x8xf32>, vector<8x8xf32>, vector<8x8xf32> -> vector<8x8xf32>
    %695 = vector.extract_strided_slice %672 {offsets = [0, 8], sizes = [8, 8], strides = [1, 1]} : vector<8x32xf32> to vector<8x8xf32>
    %696 = vector.extract_strided_slice %678 {offsets = [0, 8], sizes = [8, 8], strides = [1, 1]} : vector<8x32xf32> to vector<8x8xf32>
    %697 = vector.extract_strided_slice %679 {offsets = [0, 8], sizes = [8, 8], strides = [1, 1]} : vector<8x32xf32> to vector<8x8xf32>
    %cst_311 = arith.constant dense<0.000000e+00> : vector<8x8xf32>
    %698 = tpu.matmul %695, %696, %cst_311 {dimension_numbers = #tpu.dot_dimension_numbers<[1], [1], [0], [0], [0, 0, 1, 0], [], []>} : vector<8x8xf32>, vector<8x8xf32>, vector<8x8xf32> -> vector<8x8xf32>
    %cst_312 = arith.constant dense<0xFF800000> : vector<8xf32>
    %699 = vector.multi_reduction <maximumf>, %698, %cst_312 [1] : vector<8x8xf32> to vector<8xf32>
    %700 = vector.shape_cast %699 : vector<8xf32> to vector<8x1xf32>
    %701 = vector.broadcast %700 : vector<8x1xf32> to vector<8x8xf32>
    %702 = arith.subf %698, %701 : vector<8x8xf32>
    %703 = math.exp %702 : vector<8x8xf32>
    %cst_313 = arith.constant dense<0.000000e+00> : vector<8xf32>
    %704 = vector.multi_reduction <add>, %703, %cst_313 [1] : vector<8x8xf32> to vector<8xf32>
    %705 = vector.shape_cast %704 : vector<8xf32> to vector<8x1xf32>
    %706 = tpu.reciprocal %705 {approx = true} : vector<8x1xf32> -> vector<8x1xf32>
    %707 = vector.broadcast %706 : vector<8x1xf32> to vector<8x8xf32>
    %708 = arith.mulf %703, %707 : vector<8x8xf32>
    %cst_314 = arith.constant dense<0.000000e+00> : vector<8x8xf32>
    %709 = tpu.matmul %708, %697, %cst_314 {dimension_numbers = #tpu.dot_dimension_numbers<[1], [0], [0], [1], [0, 0, 1, 1], [], []>} : vector<8x8xf32>, vector<8x8xf32>, vector<8x8xf32> -> vector<8x8xf32>
    %710 = vector.extract_strided_slice %672 {offsets = [0, 16], sizes = [8, 8], strides = [1, 1]} : vector<8x32xf32> to vector<8x8xf32>
    %711 = vector.extract_strided_slice %678 {offsets = [0, 16], sizes = [8, 8], strides = [1, 1]} : vector<8x32xf32> to vector<8x8xf32>
    %712 = vector.extract_strided_slice %679 {offsets = [0, 16], sizes = [8, 8], strides = [1, 1]} : vector<8x32xf32> to vector<8x8xf32>
    %cst_315 = arith.constant dense<0.000000e+00> : vector<8x8xf32>
    %713 = tpu.matmul %710, %711, %cst_315 {dimension_numbers = #tpu.dot_dimension_numbers<[1], [1], [0], [0], [0, 0, 1, 0], [], []>} : vector<8x8xf32>, vector<8x8xf32>, vector<8x8xf32> -> vector<8x8xf32>
    %cst_316 = arith.constant dense<0xFF800000> : vector<8xf32>
    %714 = vector.multi_reduction <maximumf>, %713, %cst_316 [1] : vector<8x8xf32> to vector<8xf32>
    %715 = vector.shape_cast %714 : vector<8xf32> to vector<8x1xf32>
    %716 = vector.broadcast %715 : vector<8x1xf32> to vector<8x8xf32>
    %717 = arith.subf %713, %716 : vector<8x8xf32>
    %718 = math.exp %717 : vector<8x8xf32>
    %cst_317 = arith.constant dense<0.000000e+00> : vector<8xf32>
    %719 = vector.multi_reduction <add>, %718, %cst_317 [1] : vector<8x8xf32> to vector<8xf32>
    %720 = vector.shape_cast %719 : vector<8xf32> to vector<8x1xf32>
    %721 = tpu.reciprocal %720 {approx = true} : vector<8x1xf32> -> vector<8x1xf32>
    %722 = vector.broadcast %721 : vector<8x1xf32> to vector<8x8xf32>
    %723 = arith.mulf %718, %722 : vector<8x8xf32>
    %cst_318 = arith.constant dense<0.000000e+00> : vector<8x8xf32>
    %724 = tpu.matmul %723, %712, %cst_318 {dimension_numbers = #tpu.dot_dimension_numbers<[1], [0], [0], [1], [0, 0, 1, 1], [], []>} : vector<8x8xf32>, vector<8x8xf32>, vector<8x8xf32> -> vector<8x8xf32>
    %725 = vector.extract_strided_slice %672 {offsets = [0, 24], sizes = [8, 8], strides = [1, 1]} : vector<8x32xf32> to vector<8x8xf32>
    %726 = vector.extract_strided_slice %678 {offsets = [0, 24], sizes = [8, 8], strides = [1, 1]} : vector<8x32xf32> to vector<8x8xf32>
    %727 = vector.extract_strided_slice %679 {offsets = [0, 24], sizes = [8, 8], strides = [1, 1]} : vector<8x32xf32> to vector<8x8xf32>
    %cst_319 = arith.constant dense<0.000000e+00> : vector<8x8xf32>
    %728 = tpu.matmul %725, %726, %cst_319 {dimension_numbers = #tpu.dot_dimension_numbers<[1], [1], [0], [0], [0, 0, 1, 0], [], []>} : vector<8x8xf32>, vector<8x8xf32>, vector<8x8xf32> -> vector<8x8xf32>
    %cst_320 = arith.constant dense<0xFF800000> : vector<8xf32>
    %729 = vector.multi_reduction <maximumf>, %728, %cst_320 [1] : vector<8x8xf32> to vector<8xf32>
    %730 = vector.shape_cast %729 : vector<8xf32> to vector<8x1xf32>
    %731 = vector.broadcast %730 : vector<8x1xf32> to vector<8x8xf32>
    %732 = arith.subf %728, %731 : vector<8x8xf32>
    %733 = math.exp %732 : vector<8x8xf32>
    %cst_321 = arith.constant dense<0.000000e+00> : vector<8xf32>
    %734 = vector.multi_reduction <add>, %733, %cst_321 [1] : vector<8x8xf32> to vector<8xf32>
    %735 = vector.shape_cast %734 : vector<8xf32> to vector<8x1xf32>
    %736 = tpu.reciprocal %735 {approx = true} : vector<8x1xf32> -> vector<8x1xf32>
    %737 = vector.broadcast %736 : vector<8x1xf32> to vector<8x8xf32>
    %738 = arith.mulf %733, %737 : vector<8x8xf32>
    %cst_322 = arith.constant dense<0.000000e+00> : vector<8x8xf32>
    %739 = tpu.matmul %738, %727, %cst_322 {dimension_numbers = #tpu.dot_dimension_numbers<[1], [0], [0], [1], [0, 0, 1, 1], [], []>} : vector<8x8xf32>, vector<8x8xf32>, vector<8x8xf32> -> vector<8x8xf32>
    %740 = tpu.concatenate %694, %709, %724, %739 in 1 : vector<8x8xf32>, vector<8x8xf32>, vector<8x8xf32>, vector<8x8xf32> -> vector<8x32xf32>
    %cst_323 = arith.constant dense<0.000000e+00> : vector<8x32xf32>
    %741 = tpu.matmul %740, %665, %cst_323 {dimension_numbers = #tpu.dot_dimension_numbers<[1], [0], [0], [1], [0, 0, 1, 1], [], []>} : vector<8x32xf32>, vector<32x32xf32>, vector<8x32xf32> -> vector<8x32xf32>
    %742 = vector.broadcast %667 : vector<1x32xf32> to vector<8x32xf32>
    %743 = arith.addf %741, %742 : vector<8x32xf32>
    %744 = arith.addf %659, %743 : vector<8x32xf32>
    %c1_324 = arith.constant 1 : index
    %c0_325 = arith.constant 0 : index
    %c0_326 = arith.constant 0 : index
    %745 = vector.load %arg25[%c1_324, %c0_325, %c0_326] : memref<2x1x32xf32, #tpu.memory_space<vmem>>, vector<1x1x32xf32>
    %746 = vector.shape_cast %745 : vector<1x1x32xf32> to vector<1x32xf32>
    %c1_327 = arith.constant 1 : index
    %c0_328 = arith.constant 0 : index
    %c0_329 = arith.constant 0 : index
    %747 = vector.load %arg26[%c1_327, %c0_328, %c0_329] : memref<2x1x32xf32, #tpu.memory_space<vmem>>, vector<1x1x32xf32>
    %748 = vector.shape_cast %747 : vector<1x1x32xf32> to vector<1x32xf32>
    %cst_330 = arith.constant dense<0.000000e+00> : vector<8xf32>
    %749 = vector.multi_reduction <add>, %744, %cst_330 [1] : vector<8x32xf32> to vector<8xf32>
    %750 = vector.shape_cast %749 : vector<8xf32> to vector<8x1xf32>
    %cst_331 = arith.constant 3.200000e+01 : f32
    %751 = vector.broadcast %cst_331 : f32 to vector<8x1xf32>
    %752 = arith.divf %750, %751 : vector<8x1xf32>
    %753 = vector.broadcast %752 : vector<8x1xf32> to vector<8x32xf32>
    %754 = arith.subf %744, %753 : vector<8x32xf32>
    %755 = arith.mulf %754, %754 : vector<8x32xf32>
    %cst_332 = arith.constant dense<0.000000e+00> : vector<8xf32>
    %756 = vector.multi_reduction <add>, %755, %cst_332 [1] : vector<8x32xf32> to vector<8xf32>
    %757 = vector.shape_cast %756 : vector<8xf32> to vector<8x1xf32>
    %cst_333 = arith.constant 3.200000e+01 : f32
    %758 = vector.broadcast %cst_333 : f32 to vector<8x1xf32>
    %759 = arith.divf %757, %758 : vector<8x1xf32>
    %cst_334 = arith.constant 9.99999974E-6 : f32
    %760 = vector.broadcast %cst_334 : f32 to vector<8x1xf32>
    %761 = arith.addf %759, %760 : vector<8x1xf32>
    %762 = math.rsqrt %761 : vector<8x1xf32>
    %763 = vector.broadcast %762 : vector<8x1xf32> to vector<8x32xf32>
    %764 = arith.mulf %754, %763 : vector<8x32xf32>
    %765 = vector.broadcast %746 : vector<1x32xf32> to vector<8x32xf32>
    %766 = arith.mulf %764, %765 : vector<8x32xf32>
    %767 = vector.broadcast %748 : vector<1x32xf32> to vector<8x32xf32>
    %768 = arith.addf %766, %767 : vector<8x32xf32>
    %c1_335 = arith.constant 1 : index
    %c0_336 = arith.constant 0 : index
    %c0_337 = arith.constant 0 : index
    %769 = vector.load %arg27[%c1_335, %c0_336, %c0_337] : memref<2x32x64xf32, #tpu.memory_space<vmem>>, vector<1x32x64xf32>
    %770 = vector.shape_cast %769 : vector<1x32x64xf32> to vector<32x64xf32>
    %c1_338 = arith.constant 1 : index
    %c0_339 = arith.constant 0 : index
    %c0_340 = arith.constant 0 : index
    %771 = vector.load %arg28[%c1_338, %c0_339, %c0_340] : memref<2x1x64xf32, #tpu.memory_space<vmem>>, vector<1x1x64xf32>
    %772 = vector.shape_cast %771 : vector<1x1x64xf32> to vector<1x64xf32>
    %c1_341 = arith.constant 1 : index
    %c0_342 = arith.constant 0 : index
    %c0_343 = arith.constant 0 : index
    %773 = vector.load %arg29[%c1_341, %c0_342, %c0_343] : memref<2x64x32xf32, #tpu.memory_space<vmem>>, vector<1x64x32xf32>
    %774 = vector.shape_cast %773 : vector<1x64x32xf32> to vector<64x32xf32>
    %c1_344 = arith.constant 1 : index
    %c0_345 = arith.constant 0 : index
    %c0_346 = arith.constant 0 : index
    %775 = vector.load %arg30[%c1_344, %c0_345, %c0_346] : memref<2x1x32xf32, #tpu.memory_space<vmem>>, vector<1x1x32xf32>
    %776 = vector.shape_cast %775 : vector<1x1x32xf32> to vector<1x32xf32>
    %cst_347 = arith.constant dense<0.000000e+00> : vector<8x64xf32>
    %777 = tpu.matmul %768, %770, %cst_347 {dimension_numbers = #tpu.dot_dimension_numbers<[1], [0], [0], [1], [0, 0, 1, 1], [], []>} : vector<8x32xf32>, vector<32x64xf32>, vector<8x64xf32> -> vector<8x64xf32>
    %778 = vector.broadcast %772 : vector<1x64xf32> to vector<8x64xf32>
    %779 = arith.addf %777, %778 : vector<8x64xf32>
    %cst_348 = arith.constant 0.000000e+00 : f32
    %780 = vector.broadcast %cst_348 : f32 to vector<8x64xf32>
    %781 = arith.maximumf %779, %780 : vector<8x64xf32>
    %cst_349 = arith.constant dense<0.000000e+00> : vector<8x32xf32>
    %782 = tpu.matmul %781, %774, %cst_349 {dimension_numbers = #tpu.dot_dimension_numbers<[1], [0], [0], [1], [0, 0, 1, 1], [], []>} : vector<8x64xf32>, vector<64x32xf32>, vector<8x32xf32> -> vector<8x32xf32>
    %783 = vector.broadcast %776 : vector<1x32xf32> to vector<8x32xf32>
    %784 = arith.addf %782, %783 : vector<8x32xf32>
    %785 = arith.addf %768, %784 : vector<8x32xf32>
    %c1_350 = arith.constant 1 : index
    %c0_351 = arith.constant 0 : index
    %c0_352 = arith.constant 0 : index
    %786 = vector.load %arg31[%c1_350, %c0_351, %c0_352] : memref<2x1x32xf32, #tpu.memory_space<vmem>>, vector<1x1x32xf32>
    %787 = vector.shape_cast %786 : vector<1x1x32xf32> to vector<1x32xf32>
    %c1_353 = arith.constant 1 : index
    %c0_354 = arith.constant 0 : index
    %c0_355 = arith.constant 0 : index
    %788 = vector.load %arg32[%c1_353, %c0_354, %c0_355] : memref<2x1x32xf32, #tpu.memory_space<vmem>>, vector<1x1x32xf32>
    %789 = vector.shape_cast %788 : vector<1x1x32xf32> to vector<1x32xf32>
    %cst_356 = arith.constant dense<0.000000e+00> : vector<8xf32>
    %790 = vector.multi_reduction <add>, %785, %cst_356 [1] : vector<8x32xf32> to vector<8xf32>
    %791 = vector.shape_cast %790 : vector<8xf32> to vector<8x1xf32>
    %cst_357 = arith.constant 3.200000e+01 : f32
    %792 = vector.broadcast %cst_357 : f32 to vector<8x1xf32>
    %793 = arith.divf %791, %792 : vector<8x1xf32>
    %794 = vector.broadcast %793 : vector<8x1xf32> to vector<8x32xf32>
    %795 = arith.subf %785, %794 : vector<8x32xf32>
    %796 = arith.mulf %795, %795 : vector<8x32xf32>
    %cst_358 = arith.constant dense<0.000000e+00> : vector<8xf32>
    %797 = vector.multi_reduction <add>, %796, %cst_358 [1] : vector<8x32xf32> to vector<8xf32>
    %798 = vector.shape_cast %797 : vector<8xf32> to vector<8x1xf32>
    %cst_359 = arith.constant 3.200000e+01 : f32
    %799 = vector.broadcast %cst_359 : f32 to vector<8x1xf32>
    %800 = arith.divf %798, %799 : vector<8x1xf32>
    %cst_360 = arith.constant 9.99999974E-6 : f32
    %801 = vector.broadcast %cst_360 : f32 to vector<8x1xf32>
    %802 = arith.addf %800, %801 : vector<8x1xf32>
    %803 = math.rsqrt %802 : vector<8x1xf32>
    %804 = vector.broadcast %803 : vector<8x1xf32> to vector<8x32xf32>
    %805 = arith.mulf %795, %804 : vector<8x32xf32>
    %806 = vector.broadcast %787 : vector<1x32xf32> to vector<8x32xf32>
    %807 = arith.mulf %805, %806 : vector<8x32xf32>
    %808 = vector.broadcast %789 : vector<1x32xf32> to vector<8x32xf32>
    %809 = arith.addf %807, %808 : vector<8x32xf32>
    %c0_361 = arith.constant 0 : index
    %c0_362 = arith.constant 0 : index
    %810 = vector.load %arg35[%c0_361, %c0_362] : memref<32x32xf32, #tpu.memory_space<vmem>>, vector<32x32xf32>
    %cst_363 = arith.constant dense<0.000000e+00> : vector<8x32xf32>
    %811 = tpu.matmul %809, %810, %cst_363 {dimension_numbers = #tpu.dot_dimension_numbers<[1], [0], [0], [1], [0, 0, 1, 1], [], []>} : vector<8x32xf32>, vector<32x32xf32>, vector<8x32xf32> -> vector<8x32xf32>
    %c0_364 = arith.constant 0 : index
    %c0_365 = arith.constant 0 : index
    %812 = vector.load %arg36[%c0_364, %c0_365] : memref<1x32xf32, #tpu.memory_space<vmem>>, vector<1x32xf32>
    %813 = vector.broadcast %812 : vector<1x32xf32> to vector<8x32xf32>
    %814 = arith.addf %811, %813 : vector<8x32xf32>
    %c0_366 = arith.constant 0 : index
    %c0_367 = arith.constant 0 : index
    %c0_368 = arith.constant 0 : index
    %815 = vector.load %arg37[%c0_366, %c0_367, %c0_368] : memref<1x8x32xf32, #tpu.memory_space<vmem>>, vector<1x8x32xf32>
    %816 = vector.shape_cast %815 : vector<1x8x32xf32> to vector<8x32xf32>
    %817 = vector.shape_cast %814 : vector<8x32xf32> to vector<1x8x32xf32>
    tpu.vector_store %arg37[%c0_366, %c0_367, %c0_368], %817 {strides = array<i32>} : memref<1x8x32xf32, #tpu.memory_space<vmem>>, vector<1x8x32xf32>,
    %c0_369 = arith.constant 0 : index
    %c0_370 = arith.constant 0 : index
    %c0_371 = arith.constant 0 : index
    %818 = vector.load %arg38[%c0_369, %c0_370, %c0_371] : memref<1x8x32xf32, #tpu.memory_space<vmem>>, vector<1x8x32xf32>
    %819 = vector.shape_cast %818 : vector<1x8x32xf32> to vector<8x32xf32>
    %820 = vector.shape_cast %303 : vector<8x32xf32> to vector<1x8x32xf32>
    tpu.vector_store %arg38[%c0_369, %c0_370, %c0_371], %820 {strides = array<i32>} : memref<1x8x32xf32, #tpu.memory_space<vmem>>, vector<1x8x32xf32>,
    %c0_372 = arith.constant 0 : index
    %c0_373 = arith.constant 0 : index
    %c0_374 = arith.constant 0 : index
    %821 = vector.load %arg39[%c0_372, %c0_373, %c0_374] : memref<1x8x32xf32, #tpu.memory_space<vmem>>, vector<1x8x32xf32>
    %822 = vector.shape_cast %821 : vector<1x8x32xf32> to vector<8x32xf32>
    %823 = vector.shape_cast %297 : vector<8x32xf32> to vector<1x8x32xf32>
    tpu.vector_store %arg39[%c0_372, %c0_373, %c0_374], %823 {strides = array<i32>} : memref<1x8x32xf32, #tpu.memory_space<vmem>>, vector<1x8x32xf32>,
    %c0_375 = arith.constant 0 : index
    %c0_376 = arith.constant 0 : index
    %c0_377 = arith.constant 0 : index
    %824 = vector.load %arg40[%c0_375, %c0_376, %c0_377] : memref<1x8x32xf32, #tpu.memory_space<vmem>>, vector<1x8x32xf32>
    %825 = vector.shape_cast %824 : vector<1x8x32xf32> to vector<8x32xf32>
    %826 = vector.shape_cast %298 : vector<8x32xf32> to vector<1x8x32xf32>
    tpu.vector_store %arg40[%c0_375, %c0_376, %c0_377], %826 {strides = array<i32>} : memref<1x8x32xf32, #tpu.memory_space<vmem>>, vector<1x8x32xf32>,
    return
  }
  func.func @transform_0(%arg0: i32) -> (i32, i32, i32) {
    %c0_i32 = arith.constant 0 : i32
    %c0_i32_0 = arith.constant 0 : i32
    %c0_i32_1 = arith.constant 0 : i32
    return %arg0, %c0_i32, %c0_i32_0 : i32, i32, i32
  }
  func.func @transform_1(%arg0: i32) -> (i32, i32, i32) {
    %c0_i32 = arith.constant 0 : i32
    %c0_i32_0 = arith.constant 0 : i32
    %c0_i32_1 = arith.constant 0 : i32
    return %arg0, %c0_i32, %c0_i32_0 : i32, i32, i32
  }
  func.func @transform_2(%arg0: i32) -> (i32, i32, i32) {
    %c0_i32 = arith.constant 0 : i32
    %c0_i32_0 = arith.constant 0 : i32
    %c0_i32_1 = arith.constant 0 : i32
    %c0_i32_2 = arith.constant 0 : i32
    return %c0_i32, %c0_i32_0, %c0_i32_1 : i32, i32, i32
  }
  func.func @transform_3(%arg0: i32) -> (i32, i32, i32) {
    %c0_i32 = arith.constant 0 : i32
    %c0_i32_0 = arith.constant 0 : i32
    %c0_i32_1 = arith.constant 0 : i32
    %c0_i32_2 = arith.constant 0 : i32
    return %c0_i32, %c0_i32_0, %c0_i32_1 : i32, i32, i32
  }
  func.func @transform_4(%arg0: i32) -> (i32, i32, i32) {
    %c0_i32 = arith.constant 0 : i32
    %c0_i32_0 = arith.constant 0 : i32
    %c0_i32_1 = arith.constant 0 : i32
    %c0_i32_2 = arith.constant 0 : i32
    return %c0_i32, %c0_i32_0, %c0_i32_1 : i32, i32, i32
  }
  func.func @transform_5(%arg0: i32) -> (i32, i32, i32) {
    %c0_i32 = arith.constant 0 : i32
    %c0_i32_0 = arith.constant 0 : i32
    %c0_i32_1 = arith.constant 0 : i32
    %c0_i32_2 = arith.constant 0 : i32
    return %c0_i32, %c0_i32_0, %c0_i32_1 : i32, i32, i32
  }
  func.func @transform_6(%arg0: i32) -> (i32, i32, i32) {
    %c0_i32 = arith.constant 0 : i32
    %c0_i32_0 = arith.constant 0 : i32
    %c0_i32_1 = arith.constant 0 : i32
    %c0_i32_2 = arith.constant 0 : i32
    return %c0_i32, %c0_i32_0, %c0_i32_1 : i32, i32, i32
  }
  func.func @transform_7(%arg0: i32) -> (i32, i32, i32) {
    %c0_i32 = arith.constant 0 : i32
    %c0_i32_0 = arith.constant 0 : i32
    %c0_i32_1 = arith.constant 0 : i32
    %c0_i32_2 = arith.constant 0 : i32
    return %c0_i32, %c0_i32_0, %c0_i32_1 : i32, i32, i32
  }
  func.func @transform_8(%arg0: i32) -> (i32, i32, i32) {
    %c0_i32 = arith.constant 0 : i32
    %c0_i32_0 = arith.constant 0 : i32
    %c0_i32_1 = arith.constant 0 : i32
    %c0_i32_2 = arith.constant 0 : i32
    return %c0_i32, %c0_i32_0, %c0_i32_1 : i32, i32, i32
  }
  func.func @transform_9(%arg0: i32) -> (i32, i32, i32) {
    %c0_i32 = arith.constant 0 : i32
    %c0_i32_0 = arith.constant 0 : i32
    %c0_i32_1 = arith.constant 0 : i32
    %c0_i32_2 = arith.constant 0 : i32
    return %c0_i32, %c0_i32_0, %c0_i32_1 : i32, i32, i32
  }
  func.func @transform_10(%arg0: i32) -> (i32, i32, i32) {
    %c0_i32 = arith.constant 0 : i32
    %c0_i32_0 = arith.constant 0 : i32
    %c0_i32_1 = arith.constant 0 : i32
    %c0_i32_2 = arith.constant 0 : i32
    return %c0_i32, %c0_i32_0, %c0_i32_1 : i32, i32, i32
  }
  func.func @transform_11(%arg0: i32) -> (i32, i32, i32) {
    %c0_i32 = arith.constant 0 : i32
    %c0_i32_0 = arith.constant 0 : i32
    %c0_i32_1 = arith.constant 0 : i32
    %c0_i32_2 = arith.constant 0 : i32
    return %c0_i32, %c0_i32_0, %c0_i32_1 : i32, i32, i32
  }
  func.func @transform_12(%arg0: i32) -> (i32, i32, i32) {
    %c0_i32 = arith.constant 0 : i32
    %c0_i32_0 = arith.constant 0 : i32
    %c0_i32_1 = arith.constant 0 : i32
    %c0_i32_2 = arith.constant 0 : i32
    return %c0_i32, %c0_i32_0, %c0_i32_1 : i32, i32, i32
  }
  func.func @transform_13(%arg0: i32) -> (i32, i32, i32) {
    %c0_i32 = arith.constant 0 : i32
    %c0_i32_0 = arith.constant 0 : i32
    %c0_i32_1 = arith.constant 0 : i32
    %c0_i32_2 = arith.constant 0 : i32
    return %c0_i32, %c0_i32_0, %c0_i32_1 : i32, i32, i32
  }
  func.func @transform_14(%arg0: i32) -> (i32, i32, i32) {
    %c0_i32 = arith.constant 0 : i32
    %c0_i32_0 = arith.constant 0 : i32
    %c0_i32_1 = arith.constant 0 : i32
    %c0_i32_2 = arith.constant 0 : i32
    return %c0_i32, %c0_i32_0, %c0_i32_1 : i32, i32, i32
  }
  func.func @transform_15(%arg0: i32) -> (i32, i32, i32) {
    %c0_i32 = arith.constant 0 : i32
    %c0_i32_0 = arith.constant 0 : i32
    %c0_i32_1 = arith.constant 0 : i32
    %c0_i32_2 = arith.constant 0 : i32
    return %c0_i32, %c0_i32_0, %c0_i32_1 : i32, i32, i32
  }
  func.func @transform_16(%arg0: i32) -> (i32, i32, i32) {
    %c0_i32 = arith.constant 0 : i32
    %c0_i32_0 = arith.constant 0 : i32
    %c0_i32_1 = arith.constant 0 : i32
    %c0_i32_2 = arith.constant 0 : i32
    return %c0_i32, %c0_i32_0, %c0_i32_1 : i32, i32, i32
  }
  func.func @transform_17(%arg0: i32) -> (i32, i32, i32) {
    %c0_i32 = arith.constant 0 : i32
    %c0_i32_0 = arith.constant 0 : i32
    %c0_i32_1 = arith.constant 0 : i32
    %c0_i32_2 = arith.constant 0 : i32
    return %c0_i32, %c0_i32_0, %c0_i32_1 : i32, i32, i32
  }
  func.func @transform_18(%arg0: i32) -> (i32, i32, i32) {
    %c0_i32 = arith.constant 0 : i32
    %c0_i32_0 = arith.constant 0 : i32
    %c0_i32_1 = arith.constant 0 : i32
    %c0_i32_2 = arith.constant 0 : i32
    return %c0_i32, %c0_i32_0, %c0_i32_1 : i32, i32, i32
  }
  func.func @transform_19(%arg0: i32) -> (i32, i32, i32) {
    %c0_i32 = arith.constant 0 : i32
    %c0_i32_0 = arith.constant 0 : i32
    %c0_i32_1 = arith.constant 0 : i32
    %c0_i32_2 = arith.constant 0 : i32
    return %c0_i32, %c0_i32_0, %c0_i32_1 : i32, i32, i32
  }
  func.func @transform_20(%arg0: i32) -> (i32, i32, i32) {
    %c0_i32 = arith.constant 0 : i32
    %c0_i32_0 = arith.constant 0 : i32
    %c0_i32_1 = arith.constant 0 : i32
    %c0_i32_2 = arith.constant 0 : i32
    return %c0_i32, %c0_i32_0, %c0_i32_1 : i32, i32, i32
  }
  func.func @transform_21(%arg0: i32) -> (i32, i32, i32) {
    %c0_i32 = arith.constant 0 : i32
    %c0_i32_0 = arith.constant 0 : i32
    %c0_i32_1 = arith.constant 0 : i32
    %c0_i32_2 = arith.constant 0 : i32
    return %c0_i32, %c0_i32_0, %c0_i32_1 : i32, i32, i32
  }
  func.func @transform_22(%arg0: i32) -> (i32, i32, i32) {
    %c0_i32 = arith.constant 0 : i32
    %c0_i32_0 = arith.constant 0 : i32
    %c0_i32_1 = arith.constant 0 : i32
    %c0_i32_2 = arith.constant 0 : i32
    return %c0_i32, %c0_i32_0, %c0_i32_1 : i32, i32, i32
  }
  func.func @transform_23(%arg0: i32) -> (i32, i32, i32) {
    %c0_i32 = arith.constant 0 : i32
    %c0_i32_0 = arith.constant 0 : i32
    %c0_i32_1 = arith.constant 0 : i32
    %c0_i32_2 = arith.constant 0 : i32
    return %c0_i32, %c0_i32_0, %c0_i32_1 : i32, i32, i32
  }
  func.func @transform_24(%arg0: i32) -> (i32, i32, i32) {
    %c0_i32 = arith.constant 0 : i32
    %c0_i32_0 = arith.constant 0 : i32
    %c0_i32_1 = arith.constant 0 : i32
    %c0_i32_2 = arith.constant 0 : i32
    return %c0_i32, %c0_i32_0, %c0_i32_1 : i32, i32, i32
  }
  func.func @transform_25(%arg0: i32) -> (i32, i32, i32) {
    %c0_i32 = arith.constant 0 : i32
    %c0_i32_0 = arith.constant 0 : i32
    %c0_i32_1 = arith.constant 0 : i32
    %c0_i32_2 = arith.constant 0 : i32
    return %c0_i32, %c0_i32_0, %c0_i32_1 : i32, i32, i32
  }
  func.func @transform_26(%arg0: i32) -> (i32, i32, i32) {
    %c0_i32 = arith.constant 0 : i32
    %c0_i32_0 = arith.constant 0 : i32
    %c0_i32_1 = arith.constant 0 : i32
    %c0_i32_2 = arith.constant 0 : i32
    return %c0_i32, %c0_i32_0, %c0_i32_1 : i32, i32, i32
  }
  func.func @transform_27(%arg0: i32) -> (i32, i32, i32) {
    %c0_i32 = arith.constant 0 : i32
    %c0_i32_0 = arith.constant 0 : i32
    %c0_i32_1 = arith.constant 0 : i32
    %c0_i32_2 = arith.constant 0 : i32
    return %c0_i32, %c0_i32_0, %c0_i32_1 : i32, i32, i32
  }
  func.func @transform_28(%arg0: i32) -> (i32, i32, i32) {
    %c0_i32 = arith.constant 0 : i32
    %c0_i32_0 = arith.constant 0 : i32
    %c0_i32_1 = arith.constant 0 : i32
    %c0_i32_2 = arith.constant 0 : i32
    return %c0_i32, %c0_i32_0, %c0_i32_1 : i32, i32, i32
  }
  func.func @transform_29(%arg0: i32) -> (i32, i32, i32) {
    %c0_i32 = arith.constant 0 : i32
    %c0_i32_0 = arith.constant 0 : i32
    %c0_i32_1 = arith.constant 0 : i32
    %c0_i32_2 = arith.constant 0 : i32
    return %c0_i32, %c0_i32_0, %c0_i32_1 : i32, i32, i32
  }
  func.func @transform_30(%arg0: i32) -> (i32, i32, i32) {
    %c0_i32 = arith.constant 0 : i32
    %c0_i32_0 = arith.constant 0 : i32
    %c0_i32_1 = arith.constant 0 : i32
    %c0_i32_2 = arith.constant 0 : i32
    return %c0_i32, %c0_i32_0, %c0_i32_1 : i32, i32, i32
  }
  func.func @transform_31(%arg0: i32) -> (i32, i32, i32) {
    %c0_i32 = arith.constant 0 : i32
    %c0_i32_0 = arith.constant 0 : i32
    %c0_i32_1 = arith.constant 0 : i32
    %c0_i32_2 = arith.constant 0 : i32
    return %c0_i32, %c0_i32_0, %c0_i32_1 : i32, i32, i32
  }
  func.func @transform_32(%arg0: i32) -> (i32, i32) {
    %c0_i32 = arith.constant 0 : i32
    %c0_i32_0 = arith.constant 0 : i32
    %c0_i32_1 = arith.constant 0 : i32
    return %c0_i32, %c0_i32_0 : i32, i32
  }
  func.func @transform_33(%arg0: i32) -> (i32, i32) {
    %c0_i32 = arith.constant 0 : i32
    %c0_i32_0 = arith.constant 0 : i32
    %c0_i32_1 = arith.constant 0 : i32
    return %c0_i32, %c0_i32_0 : i32, i32
  }
  func.func @transform_34(%arg0: i32) -> (i32, i32) {
    %c0_i32 = arith.constant 0 : i32
    %c0_i32_0 = arith.constant 0 : i32
    %c0_i32_1 = arith.constant 0 : i32
    return %c0_i32, %c0_i32_0 : i32, i32
  }
  func.func @transform_35(%arg0: i32) -> (i32, i32) {
    %c0_i32 = arith.constant 0 : i32
    %c0_i32_0 = arith.constant 0 : i32
    %c0_i32_1 = arith.constant 0 : i32
    return %c0_i32, %c0_i32_0 : i32, i32
  }
  func.func @transform_36(%arg0: i32) -> (i32, i32, i32) {
    %c0_i32 = arith.constant 0 : i32
    %c0_i32_0 = arith.constant 0 : i32
    %c0_i32_1 = arith.constant 0 : i32
    return %arg0, %c0_i32, %c0_i32_0 : i32, i32, i32
  }
  func.func @transform_37(%arg0: i32) -> (i32, i32, i32) {
    %c0_i32 = arith.constant 0 : i32
    %c0_i32_0 = arith.constant 0 : i32
    %c0_i32_1 = arith.constant 0 : i32
    return %arg0, %c0_i32, %c0_i32_0 : i32, i32, i32
  }
  func.func @transform_38(%arg0: i32) -> (i32, i32, i32) {
    %c0_i32 = arith.constant 0 : i32
    %c0_i32_0 = arith.constant 0 : i32
    %c0_i32_1 = arith.constant 0 : i32
    return %arg0, %c0_i32, %c0_i32_0 : i32, i32, i32
  }
  func.func @transform_39(%arg0: i32) -> (i32, i32, i32) {
    %c0_i32 = arith.constant 0 : i32
    %c0_i32_0 = arith.constant 0 : i32
    %c0_i32_1 = arith.constant 0 : i32
    return %arg0, %c0_i32, %c0_i32_0 : i32, i32, i32
  }
}

</mosaic_0001>

<bundles_post_ra>
// kernel: transformer_vae_v2_forward.1
= control target key start
LH: loop header
LB: loop body
LE: loop exit
PB: predicated region body
PF: predicated region fallthrough
CT: control target
= control target key end

     0   :  { %s10114_s6 = smov 1   ;;  %s10115_s10 = smov 2   ;;  %s11416_s0 = inlined_call_operand.smem [shape: u32[40], index: -1, kind: input, shape index: {}] }
   0x1   :  { %s10198_s5 = sld [smem:[%s11416_s0]]   ;;  %s10116_s14 = smov 3  }
   0x2   :  { %s10203_s9 = sld [smem:[%s11416_s0 + %s10114_s6]]   ;;  %s10117_s18 = smov 4  }
   0x3   :  { %s10208_s13 = sld [smem:[%s11416_s0 + %s10115_s10]]   ;;  %s10118_s22 = smov 5  }
   0x4   :  { %s10213_s17 = sld [smem:[%s11416_s0 + %s10116_s14]]   ;;  %s10119_s26 = smov 6  }
   0x5   :  { %s10218_s21 = sld [smem:[%s11416_s0 + %s10117_s18]]   ;;  %s10120_s30 = smov 7  }
   0x6   :  { %s10223_s25 = sld [smem:[%s11416_s0 + %s10118_s22]]   ;;  %s10121_s4 = smov 8  }
   0x7   :  { %11475 = sst [smem:[#allocation37_spill]] %s10198_s5  ;;  %s10122_s10 = smov 9  }
   0x8   :  { %11476 = sst [smem:[#allocation38_spill]] %s10203_s9  ;;  %s10123_s15 = smov 10  }
   0x9   :  { %11477 = sst [smem:[#allocation39_spill]] %s10208_s13  ;;  %s10124_s20 = smov 11  }
   0xa   :  { %11478 = sst [smem:[#allocation40_spill]] %s10213_s17  ;;  %s10126_s1 = smov 13  }
   0xb   :  { %11479 = sst [smem:[#allocation41_spill]] %s10218_s21  ;;  %s10127_s7 = smov 14  }
   0xc   :  { %11480 = sst [smem:[#allocation42_spill]] %s10223_s25  ;;  %s10129_s22 = smov 16  }
   0xd   :  { %s10228_s29 = sld [smem:[%s11416_s0 + %s10119_s26]]   ;;  %s10125_s26 = smov 12  }
   0xe   :  { %s10233_s3 = sld [smem:[%s11416_s0 + %s10120_s30]]   ;;  %s10130_s28 = smov 17  }
   0xf   :  { %s10238_s8 = sld [smem:[%s11416_s0 + %s10121_s4]]  }
  0x10   :  { %s10243_s14 = sld [smem:[%s11416_s0 + %s10122_s10]]  }
  0x11   :  { %s10248_s19 = sld [smem:[%s11416_s0 + %s10123_s15]]   ;;  %s10128_s15 = smov 15  }
  0x12   :  { %s10253_s24 = sld [smem:[%s11416_s0 + %s10124_s20]]  }
  0x13   :  { %11481 = sst [smem:[#allocation43_spill]] %s10228_s29 }
  0x14   :  { %11482 = sst [smem:[#allocation44_spill]] %s10233_s3 }
  0x15   :  { %11483 = sst [smem:[#allocation45_spill]] %s10238_s8 }
  0x16   :  { %11484 = sst [smem:[#allocation46_spill]] %s10243_s14 }
  0x17   :  { %11485 = sst [smem:[#allocation47_spill]] %s10248_s19 }
  0x18   :  { %11486 = sst [smem:[#allocation48_spill]] %s10253_s24 }
  0x19   :  { %s10258_s30 = sld [smem:[%s11416_s0 + %s10125_s26]]  }
  0x1a   :  { %s10263_s6 = sld [smem:[%s11416_s0 + %s10126_s1]]  }
  0x1b   :  { %s10268_s12 = sld [smem:[%s11416_s0 + %s10127_s7]]   ;;  %s10131_s7 = smov 18  }
  0x1c   :  { %s10273_s20 = sld [smem:[%s11416_s0 + %s10128_s15]]   ;;  %s10132_s15 = smov 19  }
  0x1d   :  { %s10278_s27 = sld [smem:[%s11416_s0 + %s10129_s22]]   ;;  %s10133_s22 = smov 20  }
  0x1e   :  { %s10283_s4 = sld [smem:[%s11416_s0 + %s10130_s28]]   ;;  %s10134_s28 = smov 21  }
  0x1f   :  { %s10288_s9 = sld [smem:[%s11416_s0 + %s10131_s7]]   ;;  %s10135_s7 = smov 22  }
  0x20   :  { %11487 = sst [smem:[#allocation49_spill]] %s10263_s6 }
  0x21   :  { %11488 = sst [smem:[#allocation50_spill]] %s10268_s12 }
  0x22   :  { %11489 = sst [smem:[#allocation51_spill]] %s10273_s20 }
  0x23   :  { %11490 = sst [smem:[#allocation52_spill]] %s10278_s27 }
  0x24   :  { %11491 = sst [smem:[#allocation53_spill]] %s10283_s4 }
  0x25   :  { %11492 = sst [smem:[#allocation54_spill]] %s10288_s9 }
  0x26   :  { %s10293_s12 = sld [smem:[%s11416_s0 + %s10132_s15]]   ;;  %s10136_s15 = smov 23  }
  0x27   :  { %s10298_s27 = sld [smem:[%s11416_s0 + %s10133_s22]]   ;;  %s10137_s22 = smov 24  }
  0x28   :  { %s10303_s29 = sld [smem:[%s11416_s0 + %s10134_s28]]   ;;  %s10138_s28 = smov 25  }
  0x29   :  { %s10308_s9 = sld [smem:[%s11416_s0 + %s10135_s7]]   ;;  %s10139_s7 = smov 26  }
  0x2a   :  { %s10318_s19 = sld [smem:[%s11416_s0 + %s10137_s22]]   ;;  %s10141_s22 = smov 28  }
  0x2b   :  { %s10328_s8 = sld [smem:[%s11416_s0 + %s10139_s7]]   ;;  %s10143_s7 = smov 30  }
  0x2c   :  { %11493 = sst [smem:[#allocation55_spill]] %s10293_s12 }
  0x2d   :  { %11494 = sst [smem:[#allocation56_spill]] %s10298_s27 }
  0x2e   :  { %11495 = sst [smem:[#allocation57_spill]] %s10303_s29 }
  0x2f   :  { %11496 = sst [smem:[#allocation58_spill]] %s10308_s9 }
  0x30   :  { %s10313_s12 = sld [smem:[%s11416_s0 + %s10136_s15]]   ;;  %s10140_s15 = smov 27  }
  0x31   :  { %11498 = sst [smem:[#allocation60_spill]] %s10318_s19 }
  0x32   :  { %s10323_s29 = sld [smem:[%s11416_s0 + %s10138_s28]]   ;;  %s10142_s28 = smov 29  }
  0x33   :  { %11500 = sst [smem:[#allocation62_spill]] %s10328_s8 }
  0x34   :  { %s10338_s25 = sld [smem:[%s11416_s0 + %s10141_s22]]   ;;  %s10145_s22 = smov 32  }
  0x35   :  { %s10348_s21 = sld [smem:[%s11416_s0 + %s10143_s7]]   ;;  %s10147_s7 = smov 34  }
  0x36   :  { %11497 = sst [smem:[#allocation59_spill]] %s10313_s12 }
  0x37   :  { %s10333_s12 = sld [smem:[%s11416_s0 + %s10140_s15]]   ;;  %s10144_s15 = smov 31  }
  0x38   :  { %11499 = sst [smem:[#allocation61_spill]] %s10323_s29 }
  0x39   :  { %s10343_s29 = sld [smem:[%s11416_s0 + %s10142_s28]]   ;;  %s10146_s28 = smov 33  }
  0x3a   :  { %11502 = sst [smem:[#allocation64_spill]] %s10338_s25 }
  0x3b   :  { %11504 = sst [smem:[#allocation66_spill]] %s10348_s21 }
  0x3c   :  { %s10358_s25 = sld [smem:[%s11416_s0 + %s10145_s22]]   ;;  %s10149_s22 = smov 36  }
  0x3d   :  { %11501 = sst [smem:[#allocation63_spill]] %s10333_s12 }
  0x3e   :  { %s10353_s12 = sld [smem:[%s11416_s0 + %s10144_s15]]   ;;  %s10148_s15 = smov 35  }
  0x3f   :  { %11503 = sst [smem:[#allocation65_spill]] %s10343_s29 }
  0x40   :  { %s10363_s29 = sld [smem:[%s11416_s0 + %s10146_s28]]   ;;  %s10150_s28 = smov 37  }
  0x41   :  { %s10368_s17 = sld [smem:[%s11416_s0 + %s10147_s7]]   ;;  %s10151_s7 = smov 38  }
  0x42   :  { %11506 = sst [smem:[#allocation68_spill]] %s10358_s25 }
  0x43   :  { %s10373_s5 = sld [smem:[%s11416_s0 + %s10148_s15]]   ;;  %s10152_s15 = smov 39  }
  0x44   :  { %11505 = sst [smem:[#allocation67_spill]] %s10353_s12 }
  0x45   :  { %s10378_s13 = sld [smem:[%s11416_s0 + %s10149_s22]]  }
  0x46   :  { %11507 = sst [smem:[#allocation69_spill]] %s10363_s29 }
  0x47   :  { %11508 = sst [smem:[#allocation70_spill]] %s10368_s17 }
  0x48   :  { %s10383_s29 = sld [smem:[%s11416_s0 + %s10150_s28]]  }
  0x49   :  { %11509 = sst [smem:[#allocation71_spill]] %s10373_s5 }
  0x4a   :  { %s10388_s12 = sld [smem:[%s11416_s0 + %s10151_s7]]  }
  0x4b   :  { %s10393_s5 = sld [smem:[%s11416_s0 + %s10152_s15]]  }
  0x50   :  { %11510 = sst [smem:[#allocation72_spill]] %s10388_s12 }
  0x51   :  { %85 = vsyncpa [#allocation3], 0 }
  0x52   :  { %86 = vsyncpa [#allocation5], 0 }
  0x53   :  { %87 = vsyncpa [#allocation8], 0 }
  0x54   :  { %88 = vsyncpa [#allocation11], 0 }
  0x55   :  { %89 = vsyncpa [#allocation14], 0 }
  0x56   :  { %90 = vsyncpa [#allocation17], 0 }
  0x57   :  { %91 = vsyncpa [#allocation20], 0 }
  0x58   :  { %92 = vsyncpa [#allocation23], 0 }
  0x59   :  { %93 = vsyncpa [#allocation26], 0  ;;  %s10395_s22 = smov 0  }
  0x5a LB: > { %s10401_s0 = sadd.s32 4294967295, %s10112_s22   ;;  %p8275_p0 = scmp.ge.s32.totalorder %s10112_s22, 1  ;;  %s10112_s22 = sphi %s10395_s22, %s99_s22  }
  0x5b   : > { %p974_p1 = scmp.lt.s32.totalorder %s10112_s22, 3  ;;  %p11438_p2 = scmp.eq.s32.totalorder %s10401_s0, 0 }
  0x5c   : > { %s10153_s26 = smov [#allocation4]   ;;  %s10154_s1 = smov [#allocation7]  }
  0x5d   : > { %p10406_p3 = pnand %p8275_p0, %p974_p1  ;;  %s1017_s28 = sshll.u32 %s10153_s26, 4  ;;  %s1018_s28 = int_to_ptr.vmem [resolvable:$true] %s1017_s28 }
  0x5e   : > { %s1046_s2 = sshll.u32 %s10154_s1, 4  ;;  %s10155_s10 = smov [#allocation10]   ;;  %s10412_s2 = int_to_ptr.vmem [resolvable:$true] %s1046_s2 }
  0x5f   : > { %p9340_p4 = pneg %p10406_p3  ;;  %s1075_s11 = sshll.u32 %s10155_s10, 4  ;;  %s10420_s11 = int_to_ptr.vmem [resolvable:$true] %s1075_s11 }
  0x60   : > { %s10156_s15 = smov [#allocation13]   ;;  %s9639_s26 = scalar_lea.vmem %s1018_s28, 32 }
  0x61   : > { %p10416_p5 = pnand %p11438_p2, %p9340_p4  ;;  %s10422_s16 = sshll.u32 %s10156_s15, 4  ;;  %s1111_s16 = int_to_ptr.vmem [resolvable:$true] %s10422_s16 }
  0x62   : > { %p9640_p7 = scmp.ne.s32.totalorder %s1018_s28, %s9639_s26  ;;  %p9647_p10 = scmp.lt.s32.totalorder %s1018_s28, %s1018_s28 }
  0x63   : > { %p10426_p6 = pneg %p10416_p5  ;;  %p9648_p11 = scmp.lt.s32.totalorder %s9639_s26, %s9639_s26 }
  0x65   : > { %p9642_p8 = pnand %p9640_p7, %p10426_p6  ;;  %p9649_p12 = por %p9648_p11, %p9647_p10 }
  0x67   : > { %p9643_p9 = pneg %p9642_p8 }
  0x69   : > { %p9650_p13 = pnand %p9649_p12, %p9643_p9 }
  0x6b   : > { %9653 = shalt.err (!%p9650_p13)
}
  0x6c   : > { %s11434_s1 = smov 16   ;;  %s11514_s14 = sld [smem:[#allocation46_spill]] }
  0x6d   : > { %s11436_s10 = smov 1   ;;  %s9665_s15 = scalar_lea.vmem %s10412_s2, 32 }
  0x6e   : > { %p9666_p0 = scmp.ne.s32.totalorder %s10412_s2, %s9665_s15  ;;  %p9673_p7 = scmp.lt.s32.totalorder %s10412_s2, %s10412_s2 }
  0x6f   : > { %p9674_p8 = scmp.lt.s32.totalorder %s9665_s15, %s9665_s15 }
  0x70   : > { %p9668_p1 = pnand %p9666_p0, %p10426_p6 }
  0x71   : > { %p9675_p9 = por %p9674_p8, %p9673_p7 }
  0x72   : > { %9346 = dma.hbm_to_vmem [thread:$0]  (!%p10416_p5), %s11514_s14, 32, %s1018_s28, [#allocation5], %s11434_s1, %s11434_s1, %s11436_s10  }
  0x73   : > { %p9669_p4 = pneg %p9668_p1 }
  0x75   : > { %p9676_p10 = pnand %p9675_p9, %p9669_p4 }
  0x77   : > { %9679 = shalt.err (!%p9676_p10)
}
  0x78   : > { %9352 = dma.hbm_to_vmem [thread:$0]  (!%p10416_p5), %s10258_s30, 32, %s10412_s2, [#allocation8], %s11434_s1, %s11434_s1, %s11436_s10  }
  0x79   : > { %s9691_s28 = scalar_lea.vmem %s10420_s11, 32  ;;  %p9699_p0 = scmp.lt.s32.totalorder %s10420_s11, %s10420_s11 }
  0x7a   : > { %p9692_p11 = scmp.ne.s32.totalorder %s10420_s11, %s9691_s28  ;;  %p9700_p1 = scmp.lt.s32.totalorder %s9691_s28, %s9691_s28 }
  0x7c   : > { %p9694_p12 = pnand %p9692_p11, %p10426_p6  ;;  %p9701_p4 = por %p9700_p1, %p9699_p0 }
  0x7e   : > { %p9695_p13 = pneg %p9694_p12 }
  0x80   : > { %p9702_p7 = pnand %p9701_p4, %p9695_p13 }
  0x82   : > { %9705 = shalt.err (!%p9702_p7)
}
  0x83   : > { %s11515_s20 = sld [smem:[#allocation51_spill]]  ;;  %s9717_s2 = scalar_lea.vmem %s1111_s16, 1024 }
  0x84   : > { %p9718_p8 = scmp.ne.s32.totalorder %s1111_s16, %s9717_s2  ;;  %p9725_p11 = scmp.lt.s32.totalorder %s1111_s16, %s1111_s16 }
  0x85   : > { %p9726_p12 = scmp.lt.s32.totalorder %s9717_s2, %s9717_s2 }
  0x86   : > { %p9720_p9 = pnand %p9718_p8, %p10426_p6 }
  0x87   : > { %p9727_p13 = por %p9726_p12, %p9725_p11 }
  0x88   : > { %p9721_p10 = pneg %p9720_p9 }
  0x89   : > { %9358 = dma.hbm_to_vmem [thread:$0]  (!%p10416_p5), %s11515_s20, 32, %s10420_s11, [#allocation11], %s11434_s1, %s11434_s1, %s11436_s10  }
  0x8a   : > { %p9728_p0 = pnand %p9727_p13, %p9721_p10 }
  0x8c   : > { %9731 = shalt.err (!%p9728_p0)
}
  0x8d   : > { %s11439_s26 = smov 128   ;;  %s11516_s27 = sld [smem:[#allocation56_spill]] }
  0x8e   : > { %s10160_s15 = smov 8   ;;  %s10161_s11 = smov [#allocation16]  }
  0x8f   : > { %s1142_s28 = sshll.u32 %s10161_s11, 4  ;;  %s10162_s1 = smov [#allocation19]   ;;  %s1143_s28 = int_to_ptr.vmem [resolvable:$true] %s1142_s28 }
  0x90   : > { %s1180_s10 = sshll.u32 %s10162_s1, 4  ;;  %s9743_s14 = scalar_lea.vmem %s1143_s28, 32  ;;  %s1181_s10 = int_to_ptr.vmem [resolvable:$true] %s1180_s10 }
  0x91   : > { %p9744_p1 = scmp.ne.s32.totalorder %s1143_s28, %s9743_s14  ;;  %p9751_p8 = scmp.lt.s32.totalorder %s1143_s28, %s1143_s28 }
  0x92   : > { %p9752_p9 = scmp.lt.s32.totalorder %s9743_s14, %s9743_s14 }
  0x93   : > { %9364 = dma.hbm_to_vmem [thread:$0]  (!%p10416_p5), %s11516_s27, 1024, %s1111_s16, [#allocation14], %s11439_s26, %s11439_s26, %s10160_s15  }
  0x94   : > { %p9746_p4 = pnand %p9744_p1, %p10426_p6  ;;  %p9753_p10 = por %p9752_p9, %p9751_p8 }
  0x96   : > { %p9747_p7 = pneg %p9746_p4 }
  0x98   : > { %p9754_p11 = pnand %p9753_p10, %p9747_p7 }
  0x9a   : > { %9757 = shalt.err (!%p9754_p11)
}
  0x9b   : > { %s11517_s2 = smov 1   ;;  %s11518_s20 = smov 16  }
  0x9c   : > { %s11519_s19 = sld [smem:[#allocation60_spill]]  ;;  %s9769_s16 = scalar_lea.vmem %s1181_s10, 32 }
  0x9d   : > { %p9770_p12 = scmp.ne.s32.totalorder %s1181_s10, %s9769_s16  ;;  %p9777_p1 = scmp.lt.s32.totalorder %s1181_s10, %s1181_s10 }
  0x9e   : > { %p9778_p4 = scmp.lt.s32.totalorder %s9769_s16, %s9769_s16 }
  0x9f   : > { %p9772_p13 = pnand %p9770_p12, %p10426_p6 }
  0xa0   : > { %p9779_p2 = por %p9778_p4, %p9777_p1 }
  0xa1   : > { %p9773_p0 = pneg %p9772_p13 }
  0xa2   : > { %9370 = dma.hbm_to_vmem [thread:$0]  (!%p10416_p5), %s11519_s19, 32, %s1143_s28, [#allocation17], %s11518_s20, %s11518_s20, %s11517_s2  }
  0xa3   : > { %p9780_p8 = pnand %p9779_p2, %p9773_p0 }
  0xa5   : > { %9783 = shalt.err (!%p9780_p8)
}
  0xa6   : > { %s11520_s21 = sld [smem:[#allocation66_spill]]  ;;  %s10163_s14 = smov [#allocation22]  }
  0xa7   : > { %s1206_s1 = sshll.u32 %s10163_s14, 4  ;;  %s10164_s11 = smov [#allocation25]   ;;  %s1207_s1 = int_to_ptr.vmem [resolvable:$true] %s1206_s1 }
  0xa8   : > { %s1230_s28 = sshll.u32 %s10164_s11, 4  ;;  %s9795_s26 = scalar_lea.vmem %s1207_s1, 512  ;;  %s1231_s28 = int_to_ptr.vmem [resolvable:$true] %s1230_s28 }
  0xa9   : > { %p9796_p7 = scmp.ne.s32.totalorder %s1207_s1, %s9795_s26  ;;  %p9803_p2 = scmp.lt.s32.totalorder %s1207_s1, %s1207_s1 }
  0xaa   : > { %p9804_p11 = scmp.lt.s32.totalorder %s9795_s26, %s9795_s26 }
  0xab   : > { %p9798_p9 = pnand %p9796_p7, %p10426_p6 }
  0xac   : > { %9376 = dma.hbm_to_vmem [thread:$0]  (!%p10416_p5), %s11520_s21, 32, %s1181_s10, [#allocation20], %s11518_s20, %s11518_s20, %s11517_s2  }
  0xad   : > { %p9799_p10 = pneg %p9798_p9  ;;  %p9805_p12 = por %p9804_p11, %p9803_p2 }
  0xaf   : > { %p9806_p13 = pnand %p9805_p12, %p9799_p10 }
  0xb1   : > { %9809 = shalt.err (!%p9806_p13)
}
  0xb2   : > { %s11521_s16 = smov 128   ;;  %s11522_s25 = sld [smem:[#allocation68_spill]] }
  0xb3   : > { %s9821_s10 = scalar_lea.vmem %s1231_s28, 512  ;;  %p9829_p8 = scmp.lt.s32.totalorder %s1231_s28, %s1231_s28 }
  0xb4   : > { %p9822_p0 = scmp.ne.s32.totalorder %s1231_s28, %s9821_s10  ;;  %p9830_p7 = scmp.lt.s32.totalorder %s9821_s10, %s9821_s10 }
  0xb6   : > { %p9824_p1 = pnand %p9822_p0, %p10426_p6  ;;  %p9831_p9 = por %p9830_p7, %p9829_p8 }
  0xb8   : > { %9382 = dma.hbm_to_vmem [thread:$0]  (!%p10416_p5), %s11522_s25, 512, %s1207_s1, [#allocation23], %s11521_s16, %s11521_s16, %s10160_s15  }
  0xb9   : > { %p9825_p4 = pneg %p9824_p1 }
  0xbb   : > { %p9832_p2 = pnand %p9831_p9, %p9825_p4 }
  0xbd   : > { %9835 = shalt.err (!%p9832_p2)
}
  0xbe   : > { %s11523_s17 = sld [smem:[#allocation70_spill]]  ;;  %s10165_s26 = smov [#allocation2]  }
  0xbf   : > { %s1001_s14 = sshll.u32 %s10165_s26, 4  ;;  %s10166_s1 = smov [#allocation6]   ;;  %s1002_s14 = int_to_ptr.vmem [resolvable:$true] %s1001_s14 }
  0xc0   : > { %s1033_s11 = sshll.u32 %s10166_s1, 4  ;;  %s9847_s19 = scalar_lea.vmem %s1002_s14, 32  ;;  %s1034_s11 = int_to_ptr.vmem [resolvable:$true] %s1033_s11 }
  0xc1   : > { %p9848_p10 = scmp.ne.s32.totalorder %s1002_s14, %s9847_s19  ;;  %p9855_p13 = scmp.lt.s32.totalorder %s1002_s14, %s1002_s14 }
  0xc2   : > { %p9856_p0 = scmp.lt.s32.totalorder %s9847_s19, %s9847_s19 }
  0xc3   : > { %p9850_p11 = pnand %p9848_p10, %p10426_p6 }
  0xc4   : > { %9388 = dma.hbm_to_vmem [thread:$0]  (!%p10416_p5), %s11523_s17, 512, %s1231_s28, [#allocation26], %s11521_s16, %s11521_s16, %s10160_s15  }
  0xc5   : > { %p9851_p12 = pneg %p9850_p11  ;;  %p9857_p1 = por %p9856_p0, %p9855_p13 }
  0xc7   : > { %p9858_p4 = pnand %p9857_p1, %p9851_p12 }
  0xc9   : > { %9861 = shalt.err (!%p9858_p4)
}
  0xca   : > { %s11524_s3 = sld [smem:[#allocation44_spill]]  ;;  %s9873_s28 = scalar_lea.vmem %s1034_s11, 32 }
  0xcb   : > { %p9874_p8 = scmp.ne.s32.totalorder %s1034_s11, %s9873_s28  ;;  %p9881_p2 = scmp.lt.s32.totalorder %s1034_s11, %s1034_s11 }
  0xcc   : > { %p9882_p10 = scmp.lt.s32.totalorder %s9873_s28, %s9873_s28 }
  0xcd   : > { %p9876_p7 = pnand %p9874_p8, %p10426_p6 }
  0xce   : > { %p9883_p11 = por %p9882_p10, %p9881_p2 }
  0xcf   : > { %p9877_p9 = pneg %p9876_p7 }
  0xd0   : > { %9343 = dma.hbm_to_vmem [thread:$0]  (!%p10416_p5), %s11524_s3, 32, %s1002_s14, [#allocation3], %s11518_s20, %s11518_s20, %s11517_s2  }
  0xd1   : > { %p9884_p13 = pnand %p9883_p11, %p9877_p9 }
  0xd3   : > { %9887 = shalt.err (!%p9884_p13)
}
  0xd4   : > { %s11525_s24 = sld [smem:[#allocation48_spill]]  ;;  %s10167_s19 = smov [#allocation9]  }
  0xd5   : > { %s1059_s10 = sshll.u32 %s10167_s19, 4  ;;  %s10168_s26 = smov [#allocation12]   ;;  %s1060_s10 = int_to_ptr.vmem [resolvable:$true] %s1059_s10 }
  0xd6   : > { %s1091_s14 = sshll.u32 %s10168_s26, 4  ;;  %s9899_s1 = scalar_lea.vmem %s1060_s10, 32  ;;  %s1092_s14 = int_to_ptr.vmem [resolvable:$true] %s1091_s14 }
  0xd7   : > { %p9900_p12 = scmp.ne.s32.totalorder %s1060_s10, %s9899_s1  ;;  %p9907_p4 = scmp.lt.s32.totalorder %s1060_s10, %s1060_s10 }
  0xd8   : > { %p9908_p8 = scmp.lt.s32.totalorder %s9899_s1, %s9899_s1 }
  0xd9   : > { %p9902_p0 = pnand %p9900_p12, %p10426_p6 }
  0xda   : > { %9349 = dma.hbm_to_vmem [thread:$0]  (!%p10416_p5), %s11525_s24, 32, %s1034_s11, [#allocation5], %s11518_s20, %s11518_s20, %s11517_s2  }
  0xdb   : > { %p9903_p1 = pneg %p9902_p0  ;;  %p9909_p7 = por %p9908_p8, %p9907_p4 }
  0xdd   : > { %p9910_p9 = pnand %p9909_p7, %p9903_p1 }
  0xdf   : > { %9913 = shalt.err (!%p9910_p9)
}
  0xe0   : > { %s11526_s6 = sld [smem:[#allocation49_spill]]  ;;  %s9925_s11 = scalar_lea.vmem %s1092_s14, 32 }
  0xe1   : > { %p9926_p2 = scmp.ne.s32.totalorder %s1092_s14, %s9925_s11  ;;  %p9933_p13 = scmp.lt.s32.totalorder %s1092_s14, %s1092_s14 }
  0xe2   : > { %p9934_p12 = scmp.lt.s32.totalorder %s9925_s11, %s9925_s11 }
  0xe3   : > { %p9928_p10 = pnand %p9926_p2, %p10426_p6 }
  0xe4   : > { %p9935_p0 = por %p9934_p12, %p9933_p13 }
  0xe5   : > { %p9929_p11 = pneg %p9928_p10 }
  0xe6   : > { %9355 = dma.hbm_to_vmem [thread:$0]  (!%p10416_p5), %s11526_s6, 32, %s1060_s10, [#allocation8], %s11518_s20, %s11518_s20, %s11517_s2  }
  0xe7   : > { %p9936_p4 = pnand %p9935_p0, %p9929_p11 }
  0xe9   : > { %9939 = shalt.err (!%p9936_p4)
}
  0xea   : > { %s11527_s4 = sld [smem:[#allocation53_spill]]  ;;  %s10169_s28 = smov [#allocation15]  }
  0xeb   : > { %s1126_s19 = sshll.u32 %s10169_s28, 4  ;;  %s10170_s10 = smov [#allocation18]   ;;  %s1127_s19 = int_to_ptr.vmem [resolvable:$true] %s1126_s19 }
  0xec   : > { %s1158_s26 = sshll.u32 %s10170_s10, 4  ;;  %s9951_s1 = scalar_lea.vmem %s1127_s19, 1024  ;;  %s1159_s26 = int_to_ptr.vmem [resolvable:$true] %s1158_s26 }
  0xed   : > { %p9952_p1 = scmp.ne.s32.totalorder %s1127_s19, %s9951_s1  ;;  %p9959_p9 = scmp.lt.s32.totalorder %s1127_s19, %s1127_s19 }
  0xee   : > { %p9960_p2 = scmp.lt.s32.totalorder %s9951_s1, %s9951_s1 }
  0xef   : > { %p9954_p8 = pnand %p9952_p1, %p10426_p6 }
  0xf0   : > { %9361 = dma.hbm_to_vmem [thread:$0]  (!%p10416_p5), %s11527_s4, 32, %s1092_s14, [#allocation11], %s11518_s20, %s11518_s20, %s11517_s2  }
  0xf1   : > { %p9955_p7 = pneg %p9954_p8  ;;  %p9961_p10 = por %p9960_p2, %p9959_p9 }
  0xf3   : > { %p9962_p11 = pnand %p9961_p10, %p9955_p7 }
  0xf5   : > { %9965 = shalt.err (!%p9962_p11)
}
  0xf6   : > { %s11528_s9 = sld [smem:[#allocation58_spill]]  ;;  %s9977_s14 = scalar_lea.vmem %s1159_s26, 1024 }
  0xf7   : > { %p9978_p13 = scmp.ne.s32.totalorder %s1159_s26, %s9977_s14  ;;  %p9985_p4 = scmp.lt.s32.totalorder %s1159_s26, %s1159_s26 }
  0xf8   : > { %p9986_p1 = scmp.lt.s32.totalorder %s9977_s14, %s9977_s14 }
  0xf9   : > { %p9980_p12 = pnand %p9978_p13, %p10426_p6 }
  0xfa   : > { %p9987_p8 = por %p9986_p1, %p9985_p4 }
  0xfb   : > { %p9981_p0 = pneg %p9980_p12 }
  0xfc   : > { %9367 = dma.hbm_to_vmem [thread:$0]  (!%p10416_p5), %s11528_s9, 1024, %s1127_s19, [#allocation14], %s11521_s16, %s11521_s16, %s10160_s15  }
  0xfd   : > { %p9988_p9 = pnand %p9987_p8, %p9981_p0 }
  0xff   : > { %9991 = shalt.err (!%p9988_p9)
}
 0x100   : > { %s11529_s8 = sld [smem:[#allocation62_spill]]  ;;  %s10171_s11 = smov [#allocation21]  }
 0x101   : > { %s1193_s28 = sshll.u32 %s10171_s11, 4  ;;  %s10172_s19 = smov [#allocation24]   ;;  %s1194_s28 = int_to_ptr.vmem [resolvable:$true] %s1193_s28 }
 0x102   : > { %s1220_s10 = sshll.u32 %s10172_s19, 4  ;;  %s10003_s1 = scalar_lea.vmem %s1194_s28, 32  ;;  %s1221_s10 = int_to_ptr.vmem [resolvable:$true] %s1220_s10 }
 0x103   : > { %p10004_p7 = scmp.ne.s32.totalorder %s1194_s28, %s10003_s1  ;;  %p10011_p11 = scmp.lt.s32.totalorder %s1194_s28, %s1194_s28 }
 0x104   : > { %p10012_p13 = scmp.lt.s32.totalorder %s10003_s1, %s10003_s1 }
 0x105   : > { %p10006_p2 = pnand %p10004_p7, %p10426_p6 }
 0x106   : > { %9373 = dma.hbm_to_vmem [thread:$0]  (!%p10416_p5), %s11529_s8, 1024, %s1159_s26, [#allocation17], %s11521_s16, %s11521_s16, %s10160_s15  }
 0x107   : > { %p10007_p10 = pneg %p10006_p2  ;;  %p10013_p12 = por %p10012_p13, %p10011_p11 }
 0x109   : > { %p10014_p0 = pnand %p10013_p12, %p10007_p10 }
 0x10b   : > { %10017 = shalt.err (!%p10014_p0)
}
 0x10c   : > { %s11530_s15 = sld [smem:[#allocation67_spill]]  ;;  %s10029_s16 = scalar_lea.vmem %s1221_s10, 16 }
 0x10d   : > { %p10030_p4 = scmp.ne.s32.totalorder %s1221_s10, %s10029_s16  ;;  %s10036_s26 = scalar_lea.vmem %s1221_s10, 32 }
 0x10e   : > { %p10037_p9 = scmp.lt.s32.totalorder %s1221_s10, %s1221_s10  ;;  %p10038_p7 = scmp.lt.s32.totalorder %s10036_s26, %s10029_s16 }
 0x10f   : > { %p10032_p1 = pnand %p10030_p4, %p10426_p6 }
 0x110   : > { %p10039_p2 = por %p10038_p7, %p10037_p9 }
 0x111   : > { %p10033_p8 = pneg %p10032_p1 }
 0x112   : > { %9379 = dma.hbm_to_vmem [thread:$0]  (!%p10416_p5), %s11530_s15, 32, %s1194_s28, [#allocation20], %s11518_s20, %s11518_s20, %s11517_s2  }
 0x113   : > { %p10040_p10 = pnand %p10039_p2, %p10033_p8 }
 0x115   : > { %10043 = shalt.err (!%p10040_p10)
}
 0x116   : > { %s11531_s14 = sld [smem:[#allocation69_spill]]  ;;  %s10173_s11 = smov [#allocation27]  }
 0x117   : > { %s1244_s19 = sshll.u32 %s10173_s11, 4  ;;  %s1245_s19 = int_to_ptr.vmem [resolvable:$true] %s1244_s19 }
 0x118   : > { %s10055_s20 = scalar_lea.vmem %s1245_s19, 16  ;;  %s10062_s2 = scalar_lea.vmem %s1245_s19, 32 }
 0x119   : > { %p10056_p11 = scmp.ne.s32.totalorder %s1245_s19, %s10055_s20  ;;  %p10063_p0 = scmp.lt.s32.totalorder %s1245_s19, %s1245_s19 }
 0x11a   : > { %p10064_p4 = scmp.lt.s32.totalorder %s10062_s2, %s10055_s20 }
 0x11b   : > { %p10058_p13 = pnand %p10056_p11, %p10426_p6 }
 0x11c   : > { %9385 = dma.hbm_to_vmem [thread:$0]  (!%p10416_p5), %s11531_s14, 16, %s1221_s10, [#allocation23]  }
 0x11d   : > { %p10059_p12 = pneg %p10058_p13  ;;  %p10065_p1 = por %p10064_p4, %p10063_p0 }
 0x11f   : > { %p10066_p9 = pnand %p10065_p1, %p10059_p12 }
 0x121   : > { %10069 = shalt.err (!%p10066_p9)
}
 0x122   : > { %s11532_s28 = sld [smem:[#allocation71_spill]]  ;;  %p11533_p8 = scmp.eq.s32.totalorder (!%p10406_p3), %s10401_s0, 0 }
 0x124   : > { %1271 = sbr.rel (%p10406_p3) target bundleno = 14111 (0x371f), region = 164 }
 0x128   : > { %9391 = dma.hbm_to_vmem [thread:$0]  (!%p10416_p5), %s11532_s28, 16, %s1245_s19, [#allocation26]  }
 0x129   : > { %10075 = dma.done.wait (%p11533_p8), [#allocation3], 32   ;;  %p11534_p7 = pmov %p11533_p8 }
 0x12b   : > { %10077 = vsyncadd (%p11534_p7), [#allocation3], 4294967264  ;;  %p11535_p6 = pmov %p11534_p7 }
 0x12d   : > { %10079 = dma.done.wait (%p11535_p6), [#allocation5], 64   ;;  %p11536_p2 = pmov %p11535_p6 }
 0x12f   : > { %10081 = vsyncadd (%p11536_p2), [#allocation5], 4294967232  ;;  %p11537_p10 = pmov %p11536_p2 }
 0x130   : > { %p11538_p5 = pmov %p11536_p2 }
 0x131   : > { %10083 = dma.done.wait (%p11537_p10), [#allocation8], 64  }
 0x132   : > { %10085 = vsyncadd (%p11538_p5), [#allocation8], 4294967232  ;;  %p11539_p3 = pmov %p11536_p2 }
 0x133   : > { %p11540_p11 = pmov %p11536_p2 }
 0x134   : > { %10087 = dma.done.wait (%p11539_p3), [#allocation11], 64  }
 0x135   : > { %10089 = vsyncadd (%p11540_p11), [#allocation11], 4294967232  ;;  %p11541_p13 = pmov %p11536_p2 }
 0x136   : > { %p11542_p12 = pmov %p11536_p2 }
 0x137   : > { %10091 = dma.done.wait (%p11541_p13), [#allocation14], 2048  }
 0x138   : > { %10093 = vsyncadd (%p11542_p12), [#allocation14], 4294965248  ;;  %p11543_p0 = pmov %p11536_p2 }
 0x13a   : > { %10095 = dma.done.wait (%p11543_p0), [#allocation17], 1056   ;;  %p11544_p4 = pmov %p11543_p0 }
 0x13b   : > { %p11545_p1 = pmov %p11543_p0 }
 0x13c   : > { %10097 = vsyncadd (%p11544_p4), [#allocation17], 4294966240 }
 0x13d   : > { %10099 = dma.done.wait (%p11545_p1), [#allocation20], 64   ;;  %p11546_p9 = pmov %p11543_p0 }
 0x13e   : > { %p11547_p8 = pmov %p11543_p0 }
 0x13f   : > { %10101 = vsyncadd (%p11546_p9), [#allocation20], 4294967232 }
 0x140   : > { %10103 = dma.done.wait (%p11547_p8), [#allocation23], 528   ;;  %p11548_p7 = pmov %p11543_p0 }
 0x141   : > { %p11549_p6 = pmov %p11543_p0 }
 0x142   : > { %10105 = vsyncadd (%p11548_p7), [#allocation23], 4294966768 }
 0x143   : > { %10107 = dma.done.wait (%p11549_p6), [#allocation26], 528   ;;  %p11550_p2 = pmov %p11543_p0 }
 0x144   : > { %s11551_s23 = sld [smem:[#allocation39_spill]]  ;;  %p1445_p10 = scmp.lt.s32.totalorder %s10401_s0, 1  ;;  %v10174_v0 = vmov 0.0   ;;  %vm10175_vm0 = vmmov 0   ;;  %vm1487_vm1 = vcmask 261120   ;;  %vm1564_vm2 = vcmask 64512  }
 0x145   : > { %10109 = vsyncadd (%p11550_p2), [#allocation26], 4294966768  ;;  %s11552_s7 = sld [smem:[#allocation37_spill]]  ;;  %8736 = vmatprep.subr.mxu0 %v10174_v0  ;;  %8744 = vmatprep.mubr.msk.f32.mxu0 %vm10175_vm0, %v10174_v0  ;;  %s11467_s15 = smov 96   ;;  %vm2234_vm3 = vcmask 130048   ;;  %vm2236_vm4 = vcmask 195584  }
 0x146   : > { %s11586_s0 = smov (!%p1445_p10, %s10401_s0), 1  ;;  %8747 = vmatprep.subr.mxu1 %v10174_v0  ;;  %8749 = vmatprep.mubr.msk.f32.mxu1 %vm10175_vm0, %v10174_v0  ;;  %s11553_s10 = sld [smem:[#allocation40_spill]]  ;;  %vm2448_vm5 = vcmask 523264  }
 0x147   : > { %s10617_s18 = sshll.u32 %s11586_s0, 3  ;;  %s11445_s0 = smov 64  }
 0x148   : > { %s11465_s16 = smov 88   ;;  %s11463_s26 = smov 120  }
 0x149   : > { %s11461_s14 = smov 80   ;;  %s11457_s11 = smov 72  }
 0x14a   : > { %v1474_v1 = vld [vmem:[%s11551_s23 + $0x18] sm:$0xff]  ;;  %v1473_v2 = vld [vmem:[%s11551_s23 + $0x10] sm:$0xff]  ;;  %v1472_v3 = vld [vmem:[%s11551_s23 + $0x8] sm:$0xff]  ;;  %s11459_s19 = smov 112   ;;  %s11455_s20 = smov 104  }
 0x14b   : > { %8737 = vmatpush3.msra.mxu0 %v1474_v1  ;;  %s1448_s1 = scalar_lea.vmem %s11552_s7, %s10617_s18  ;;  %v1471_v4 = vld [vmem:[%s11551_s23] sm:$0xff]  ;;  %s11447_s2 = smov 56  }
 0x14c   : > { %8738 = vmatprep.subr.mxu0 %v10174_v0  ;;  %v10627_v5 = vld [vmem:[%s1448_s1] sm:$0xff]  ;;  %s11443_s28 = smov 48   ;;  %s11441_s7 = smov 40  }
 0x14d   : > { %8739 = vmatpush3.msra.mxu0 %v1473_v2  ;;  %v8318_v6 = vld [vmem:[%s11553_s10] ss:$0 sm:$0xff]  ;;  %s11554_s1 = sld [smem:[#allocation41_spill]]  ;;  %s11569_s3 = smov 96  }
 0x14e   : > { %8740 = vmatprep.subr.mxu0 %v10174_v0  ;;  %s11567_s12 = sld [smem:[#allocation72_spill]]  ;;  %s1460_s6 = scalar_lea.vmem %s10383_s29, %s10617_s18 }
 0x14f   : > { %8741 = vmatpush3.msra.mxu0 %v1472_v3  ;;  %s11575_s8 = smov 104   ;;  %s11576_s9 = sld [smem:[#allocation52_spill]] }
 0x150   : > { %8742 = vmatprep.subr.mxu0 %v10174_v0  ;;  %s11579_s17 = sld [smem:[#allocation55_spill]] }
 0x151   : > { %8743 = vmatpush3.msra.mxu0 %v1471_v4  ;;  %s11580_s21 = sld [smem:[#allocation59_spill]] }
 0x152   : > { %8745 = vmatmul.mubr.msk.f32.vlgmr.msra.gmra.mxu0 %vm1487_vm1, %v10627_v5  ;;  %8767 = vmatprep.subr.mxu0 %v10174_v0  ;;  %s11582_s24 = sld [smem:[#allocation61_spill]] }
 0x153   : > { %8769 = vmatprep.mubr.msk.f32.mxu0 %vm10175_vm0, %v10174_v0  ;;  %v1479_v4 = vld [vmem:[%s11554_s1 + $0x18] sm:$0xff]  ;;  %s11583_s25 = sld [smem:[#allocation63_spill]] }
 0x154   : > { %s11584_s27 = sld [smem:[#allocation65_spill]] }
 0x212   : > { %v1557_v7 = vpop.f32.mrf.mxu0 }
 0x213   : > { %v10636_v8 = vadd.f32 %v8318_v6, %v1557_v7  ;;  %v1478_v6 = vld [vmem:[%s11554_s1 + $0x10] sm:$0xff]  ;;  %v1477_v7 = vld [vmem:[%s11554_s1 + $0x8] sm:$0xff] }
 0x214   : > { %v8746_v9 = vpop.f32.mrf.mxu0 }
 0x215   : > { %1650 = vrot.lane.b32.xlu1 %v10636_v8, %s11445_s0  ;;  %1562 = vrot.lane.b32.xlu0 %v10636_v8, %s11467_s15  ;;  %s11555_s0 = sld [smem:[#allocation42_spill]] }
 0x219   : > { %1728 = vrot.lane.b32.xlu1 %v10636_v8, %s11465_s16 }
 0x21d   : > { %1726 = vrot.lane.b32.xlu1 %v10636_v8, %s11463_s26 }
 0x221   : > { %1893 = vrot.lane.b32.xlu1 %v10636_v8, %s11461_s14 }
 0x287   : > { %v1651_v10 = vpop.permute.xlu1 %1650  ;;  %v1563_v11 = vpop.permute.xlu0 %1562 }
 0x288   : > { %8748 = vmatpush3.xpose.msk.msra.mxu1 %vm1564_vm2, %v1563_v11 }
 0x289   : > { %8752 = vmatprep.subr.mxu1 %v10174_v0 }
 0x28b   : > { %v1729_v12 = vpop.permute.xlu1 %1728  ;;  %8750 = vmatmul.mubr.msk.f32.vlgmr.msra.gmra.mxu1 %vm1564_vm2, %v10636_v8 }
 0x28c   : > { %8753 = vmatpush3.msra.mxu1 %v1651_v10  ;;  %8754 = vmatprep.mubr.msk.f32.mxu1 %vm10175_vm0, %v10174_v0 }
 0x28d   : > { %8757 = vmatprep.subr.mxu1 %v10174_v0 }
 0x28f   : > { %v1727_v13 = vpop.permute.xlu1 %1726 }
 0x293   : > { %v1894_v14 = vpop.permute.xlu1 %1893 }
 0x294   : > { %8768 = vmatpush3.xpose.msk.msra.mxu0 %vm1564_vm2, %v1894_v14 }
 0x295   : > { %8777 = vmatprep.subr.mxu0 %v10174_v0 }
 0x34b   : > { %v1635_v15 = vpop.f32.mrf.mxu1 }
 0x34c   : > { %v1639_v16 = vsel %vm1564_vm2, %v1635_v15, -inf }
 0x34d   : > { %1640 = vmax.xlane.f32.xlu0 %v1639_v16  ;;  %v8751_v17 = vpop.f32.mrf.mxu1 }
 0x363   : > { %2058 = vrot.lane.b32.xlu0 %v10636_v8, %s11457_s11 }
 0x3d6   : > { %v1641_v18 = vpop.xlane.xlu0 %1640 }
 0x3d7   : > { %v1642_v19 = vsub.f32 %v1635_v15, %v1641_v18 }
 0x3d9   : > { %v1643_v20 = vmul.f32 1.442695, %v1642_v19 }
 0x3da   : > { %v2059_v25 = vpop.permute.xlu0 %2058 }
 0x3db   : > { %9510 = vpow2.f32 %v1643_v20 }
 0x3e8   : > { %v9511_v21 = vpop.eup %9510 }
 0x3e9   : > { %v1645_v22 = vsel %vm1564_vm2, %v9511_v21, 0.0 }
 0x3ea   : > { %1646 = vadd.xlane.f32.xlu1 %v1645_v22 }
 0x3fb   : > { %1891 = vrot.lane.b32.xlu1 %v10636_v8, %s11459_s19 }
 0x3ff   : > { %2056 = vrot.lane.b32.xlu1 %v10636_v8, %s11455_s20 }
 0x473   : > { %v1647_v23 = vpop.xlane.xlu1 %1646 }
 0x474   : > { %9512 = vrcp.f32 %v1647_v23 }
 0x477   : > { %v1892_v24 = vpop.permute.xlu1 %1891 }
 0x478   : > { %8770 = vmatmul.mubr.msk.f32.vlgmr.msra.gmra.mxu0 %vm1564_vm2, %v1892_v24 }
 0x479   : > { %8778 = vmatpush3.xpose.msk.msra.mxu0 %vm1564_vm2, %v2059_v25  ;;  %8779 = vmatprep.mubr.msk.f32.mxu0 %vm10175_vm0, %v10174_v0 }
 0x47a   : > { %8787 = vmatprep.subr.mxu0 %v10174_v0 }
 0x47b   : > { %v2057_v26 = vpop.permute.xlu1 %2056 }
 0x47c   : > { %8780 = vmatmul.mubr.msk.f32.vlgmr.msra.gmra.mxu0 %vm1564_vm2, %v2057_v26 }
 0x47d   : > { %8795 = vmatprep.mubr.msk.f32.mxu0 %vm10175_vm0, %v10174_v0  ;;  %8788 = vmatpush3.msra.mxu0 %v1479_v4 }
 0x47e   : > { %8789 = vmatprep.subr.mxu0 %v10174_v0 }
 0x47f   : > { %8790 = vmatpush3.msra.mxu0 %v1478_v6  ;;  %v8345_v6 = vld [vmem:[%s11551_s23 + $0x38] sm:$0xff] }
 0x480   : > { %8791 = vmatprep.subr.mxu0 %v10174_v0 }
 0x481   : > { %v9513_v27 = vpop.eup %9512  ;;  %8792 = vmatpush3.msra.mxu0 %v1477_v7  ;;  %v8344_v7 = vld [vmem:[%s11551_s23 + $0x30] sm:$0xff] }
 0x482   : > { %v1649_v28 = vmul.f32 %v9513_v27, %v9511_v21  ;;  %8793 = vmatprep.subr.mxu0 %v10174_v0  ;;  %v8332_v21 = vld [vmem:[%s11555_s0] ss:$0 sm:$0xff] }
 0x484   : > { %8755 = vmatmul.mubr.msk.f32.vlgmr.msra.gmra.mxu1 %vm1564_vm2, %v1649_v28 }
 0x485   : > { %8758 = vmatpush3.xpose.msk.msra.mxu1 %vm1564_vm2, %v1729_v12  ;;  %8759 = vmatprep.mubr.msk.f32.mxu1 %vm10175_vm0, %v10174_v0 }
 0x486   : > { %8762 = vmatprep.subr.mxu1 %v10174_v0 }
 0x488   : > { %8760 = vmatmul.mubr.msk.f32.vlgmr.msra.gmra.mxu1 %vm1564_vm2, %v1727_v13 }
 0x489   : > { %8764 = vmatprep.mubr.msk.f32.mxu1 %vm10175_vm0, %v10174_v0 }
 0x538   : > { %v1965_v29 = vpop.f32.mrf.mxu0 }
 0x539   : > { %v1969_v30 = vsel %vm1564_vm2, %v1965_v29, -inf }
 0x53a   : > { %1970 = vmax.xlane.f32.xlu0 %v1969_v30  ;;  %v8771_v31 = vpop.f32.mrf.mxu0 }
 0x53c   : > { %v2130_v32 = vpop.f32.mrf.mxu0 }
 0x53d   : > { %v2134_v39 = vsel %vm1564_vm2, %v2130_v32, -inf }
 0x53e   : > { %v8781_v33 = vpop.f32.mrf.mxu0 }
 0x544   : > { %v10682_v34 = vpop.f32.mrf.mxu1 }
 0x546   : > { %v8756_v35 = vpop.f32.mrf.mxu1 }
 0x548   : > { %v1800_v36 = vpop.f32.mrf.mxu1 }
 0x549   : > { %v1804_v37 = vsel %vm1564_vm2, %v1800_v36, -inf }
 0x54a   : > { %1805 = vmax.xlane.f32.xlu1 %v1804_v37  ;;  %v8761_v38 = vpop.f32.mrf.mxu1 }
 0x54e   : > { %2135 = vmax.xlane.f32.xlu1 %v2134_v39 }
 0x5c3   : > { %v1971_v40 = vpop.xlane.xlu0 %1970 }
 0x5c4   : > { %v1972_v41 = vsub.f32 %v1965_v29, %v1971_v40 }
 0x5c6   : > { %v1973_v42 = vmul.f32 1.442695, %v1972_v41 }
 0x5c8   : > { %9514 = vpow2.f32 %v1973_v42 }
 0x5d3   : > { %v1806_v43 = vpop.xlane.xlu1 %1805 }
 0x5d4   : > { %v1807_v51 = vsub.f32 %v1800_v36, %v1806_v43 }
 0x5d5   : > { %v9515_v44 = vpop.eup %9514 }
 0x5d6   : > { %v1975_v45 = vsel %vm1564_vm2, %v9515_v44, 0.0  ;;  %v1808_v52 = vmul.f32 1.442695, %v1807_v51 }
 0x5d7   : > { %1976 = vadd.xlane.f32.xlu1 %v1975_v45  ;;  %v2136_v46 = vpop.xlane.xlu1 %2135 }
 0x5d8   : > { %v2137_v47 = vsub.f32 %v2130_v32, %v2136_v46  ;;  %v8335_v46 = vld [vmem:[#allocation2] ss:$0 sm:$0xff] }
 0x5da   : > { %v2138_v48 = vmul.f32 1.442695, %v2137_v47 }
 0x5dc   : > { %9516 = vpow2.f32 %v2138_v48 }
 0x5dd   : > { %9518 = vpow2.f32 %v1808_v52  ;;  %v8336_v52 = vld [vmem:[#allocation4] ss:$0 sm:$0xff] }
 0x5e8   : > { %1815 = vrot.lane.b32.xlu1 %v10636_v8, %s11447_s2  ;;  %s11451_s2 = smov 24  }
 0x5e9   : > { %v9517_v49 = vpop.eup %9516 }
 0x5ea   : > { %v2140_v50 = vsel %vm1564_vm2, %v9517_v49, 0.0  ;;  %v9519_v53 = vpop.eup %9518 }
 0x5eb   : > { %2141 = vadd.xlane.f32.xlu0 %v2140_v50  ;;  %v1810_v54 = vsel %vm1564_vm2, %v9519_v53, 0.0 }
 0x601   : > { %1980 = vrot.lane.b32.xlu0 %v10636_v8, %s11443_s28  ;;  %s11449_s28 = smov 16  }
 0x60c   : > { %1811 = vadd.xlane.f32.xlu1 %v1810_v54 }
 0x61d   : > { %2145 = vrot.lane.b32.xlu1 %v10636_v8, %s11441_s7  ;;  %v1476_v8 = vld [vmem:[%s11554_s1] sm:$0xff]  ;;  %s11453_s7 = smov 8  }
 0x61e   : > { %8794 = vmatpush3.msra.mxu0 %v1476_v8  ;;  %v8343_v8 = vld [vmem:[%s11551_s23 + $0x28] sm:$0xff] }
 0x61f   : > { %8809 = vmatprep.subr.mxu0 %v10174_v0 }
 0x660   : > { %v1977_v55 = vpop.xlane.xlu1 %1976 }
 0x664   : > { %v1816_v56 = vpop.permute.xlu1 %1815 }
 0x665   : > { %8763 = vmatpush3.msra.mxu1 %v1816_v56 }
 0x666   : > { %8772 = vmatprep.subr.mxu1 %v10174_v0 }
 0x674   : > { %v2142_v58 = vpop.xlane.xlu0 %2141 }
 0x678   : > { %v1981_v62 = vpop.permute.xlu0 %1980 }
 0x695   : > { %v1812_v57 = vpop.xlane.xlu1 %1811 }
 0x696   : > { %9520 = vrcp.f32 %v1812_v57  ;;  %v8338_v57 = vld [vmem:[#allocation6] ss:$0 sm:$0xff] }
 0x697   : > { %9522 = vrcp.f32 %v1977_v55 }
 0x698   : > { %9524 = vrcp.f32 %v2142_v58 }
 0x699   : > { %v2146_v2 = vpop.permute.xlu1 %2145 }
 0x6a3   : > { %v9521_v59 = vpop.eup %9520 }
 0x6a4   : > { %v1814_v60 = vmul.f32 %v9521_v59, %v9519_v53  ;;  %v9523_v61 = vpop.eup %9522 }
 0x6a5   : > { %v1979_v63 = vmul.f32 %v9523_v61, %v9515_v44  ;;  %v9525_v1 = vpop.eup %9524 }
 0x6a6   : > { %8765 = vmatmul.mubr.msk.f32.vlgmr.msra.gmra.mxu1 %vm1564_vm2, %v1814_v60  ;;  %v2144_v3 = vmul.f32 %v9525_v1, %v9517_v49 }
 0x6a7   : > { %8773 = vmatpush3.msra.mxu1 %v1981_v62  ;;  %8774 = vmatprep.mubr.msk.f32.mxu1 %vm10175_vm0, %v10174_v0 }
 0x6a8   : > { %8782 = vmatprep.subr.mxu1 %v10174_v0 }
 0x6aa   : > { %8775 = vmatmul.mubr.msk.f32.vlgmr.msra.gmra.mxu1 %vm1564_vm2, %v1979_v63 }
 0x6ab   : > { %8783 = vmatpush3.msra.mxu1 %v2146_v2  ;;  %8784 = vmatprep.mubr.msk.f32.mxu1 %vm10175_vm0, %v10174_v0 }
 0x6ac   : > { %8798 = vmatprep.subr.mxu1 %v10174_v0 }
 0x6ae   : > { %8785 = vmatmul.mubr.msk.f32.vlgmr.msra.gmra.mxu1 %vm1564_vm2, %v2144_v3 }
 0x6af   : > { %8806 = vmatprep.mubr.msk.f32.mxu1 %vm10175_vm0, %v10174_v0 }
 0x766   : > { %v1887_v9 = vpop.f32.mrf.mxu1 }
 0x767   : > { %2222 = vrot.lane.b32.xlu1 %v1887_v9, %s11453_s7  ;;  %s11558_s7 = sld [smem:[#allocation43_spill]]  ;;  %v8342_v9 = vld [vmem:[%s11551_s23 + $0x20] sm:$0xff] }
 0x768   : > { %v8766_v10 = vpop.f32.mrf.mxu1  ;;  %s11581_s23 = sld [smem:[#allocation64_spill]] }
 0x76a   : > { %v2052_v11 = vpop.f32.mrf.mxu1 }
 0x76b   : > { %2226 = vrot.lane.b32.xlu0 %v2052_v11, %s11449_s28  ;;  %s11556_s28 = sld [smem:[#allocation45_spill]] }
 0x76c   : > { %v8776_v12 = vpop.f32.mrf.mxu1 }
 0x76d   : > { %v8334_v44 = vld [vmem:[%s11558_s7] ss:$0 sm:$0xff] }
 0x76e   : > { %v2217_v13 = vpop.f32.mrf.mxu1 }
 0x76f   : > { %2230 = vrot.lane.b32.xlu1 %v2217_v13, %s11451_s2  ;;  %s11557_s2 = sld [smem:[#allocation47_spill]] }
 0x770   : > { %v8786_v14 = vpop.f32.mrf.mxu1 }
 0x771   : > { %v2351_v32 = vld [vmem:[%s11556_s28 + $0x18] sm:$0xff]  ;;  %v2350_v33 = vld [vmem:[%s11556_s28 + $0x10] sm:$0xff]  ;;  %v8340_v14 = vld [vmem:[#allocation7] ss:$0 sm:$0xff] }
 0x772   : > { %8799 = vmatpush3.msra.mxu1 %v2351_v32 }
 0x773   : > { %8800 = vmatprep.subr.mxu1 %v10174_v0 }
 0x774   : > { %8801 = vmatpush3.msra.mxu1 %v2350_v33 }
 0x775   : > { %8802 = vmatprep.subr.mxu1 %v10174_v0  ;;  %v2360_v35 = vld [vmem:[%s11557_s2 + $0x38] sm:$0xff]  ;;  %v2359_v36 = vld [vmem:[%s11557_s2 + $0x30] sm:$0xff]  ;;  %v2358_v37 = vld [vmem:[%s11557_s2 + $0x28] sm:$0xff] }
 0x776   : > { %v2357_v38 = vld [vmem:[%s11557_s2 + $0x20] sm:$0xff]  ;;  %v2356_v39 = vld [vmem:[%s11557_s2 + $0x18] sm:$0xff]  ;;  %v2355_v49 = vld [vmem:[%s11557_s2 + $0x10] sm:$0xff] }
 0x777   : > { %v2354_v50 = vld [vmem:[%s11557_s2 + $0x8] sm:$0xff]  ;;  %v2353_v51 = vld [vmem:[%s11557_s2] sm:$0xff] }
 0x7d9   : > { %v2223_v15 = vpop.permute.xlu1 %2222 }
 0x7da   : > { %v2233_v17 = vsel %vm1564_vm2, %v10682_v34, %v2223_v15  ;;  %v2348_v34 = vld [vmem:[%s11556_s28] sm:$0xff] }
 0x7dd   : > { %v2227_v16 = vpop.permute.xlu0 %2226 }
 0x7de   : > { %v2235_v18 = vsel %vm2234_vm3, %v2233_v17, %v2227_v16  ;;  %v8341_v16 = vld [vmem:[#allocation9] ss:$0 sm:$0xff] }
 0x7e1   : > { %v2231_v19 = vpop.permute.xlu1 %2230 }
 0x7e2   : > { %v2237_v20 = vsel %vm2236_vm4, %v2235_v18, %v2231_v19  ;;  %v8352_v19 = vld [vmem:[%s11553_s10 + $0x1] ss:$0 sm:$0xff]  ;;  %s11577_s10 = sld [smem:[#allocation57_spill]] }
 0x7e3   : > { %8796 = vmatmul.mubr.msk.f32.vlgmr.msra.gmra.mxu0 %vm1487_vm1, %v2237_v20 }
 0x7e4   : > { %8825 = vmatprep.mubr.msk.f32.mxu0 %vm10175_vm0, %v10174_v0  ;;  %8810 = vmatpush3.msra.mxu0 %v2360_v35 }
 0x7e5   : > { %8811 = vmatprep.subr.mxu0 %v10174_v0 }
 0x7e6   : > { %8812 = vmatpush3.msra.mxu0 %v2359_v36 }
 0x7e7   : > { %8813 = vmatprep.subr.mxu0 %v10174_v0 }
 0x7e8   : > { %8814 = vmatpush3.msra.mxu0 %v2358_v37 }
 0x7e9   : > { %8815 = vmatprep.subr.mxu0 %v10174_v0 }
 0x7ea   : > { %8816 = vmatpush3.msra.mxu0 %v2357_v38 }
 0x7eb   : > { %8817 = vmatprep.subr.mxu0 %v10174_v0 }
 0x7ec   : > { %8818 = vmatpush3.msra.mxu0 %v2356_v39 }
 0x7ed   : > { %8819 = vmatprep.subr.mxu0 %v10174_v0 }
 0x7ee   : > { %8820 = vmatpush3.msra.mxu0 %v2355_v49 }
 0x7ef   : > { %8821 = vmatprep.subr.mxu0 %v10174_v0 }
 0x7f0   : > { %8822 = vmatpush3.msra.mxu0 %v2354_v50 }
 0x7f1   : > { %8823 = vmatprep.subr.mxu0 %v10174_v0 }
 0x7f2   : > { %8824 = vmatpush3.msra.mxu0 %v2353_v51 }
 0x7f3   : > { %8849 = vmatprep.subr.mxu0 %v10174_v0 }
 0x8a3   : > { %v2313_v22 = vpop.f32.mrf.mxu0 }
 0x8a4   : > { %v2314_v23 = vadd.f32 %v8332_v21, %v2313_v22 }
 0x8a5   : > { %v8797_v24 = vpop.f32.mrf.mxu0 }
 0x8a6   : > { %v2317_v25 = vadd.f32 %v2314_v23, %v10627_v5  ;;  %v2349_v5 = vld [vmem:[%s11556_s28 + $0x8] sm:$0xff] }
 0x8a7   : > { %8803 = vmatpush3.msra.mxu1 %v2349_v5 }
 0x8a8   : > { %v2320_v26 = vsel %vm1487_vm1, %v2317_v25, 0.0  ;;  %8804 = vmatprep.subr.mxu1 %v10174_v0 }
 0x8a9   : > { %2321 = vadd.xlane.f32.xlu0 %v2320_v26  ;;  %8805 = vmatpush3.msra.mxu1 %v2348_v34 }
 0x8aa   : > { %8828 = vmatprep.subr.mxu1 %v10174_v0 }
 0x932   : > { %v2322_v27 = vpop.xlane.xlu0 %2321 }
 0x933   : > { %v2324_v28 = vmul.f32 0.03125, %v2322_v27 }
 0x935   : > { %v2325_v29 = vsub.f32 %v2317_v25, %v2324_v28 }
 0x937   : > { %v2326_v30 = vmul.f32 %v2325_v29, %v2325_v29 }
 0x939   : > { %v2327_v31 = vsel %vm1487_vm1, %v2326_v30, 0.0 }
 0x93a   : > { %2328 = vadd.xlane.f32.xlu1 %v2327_v31 }
 0x9c3   : > { %v2329_v40 = vpop.xlane.xlu1 %2328 }
 0x9c4   : > { %v2330_v41 = vmul.f32 0.03125, %v2329_v40 }
 0x9c6   : > { %v2331_v42 = vadd.f32 1e-05, %v2330_v41 }
 0x9c8   : > { %9526 = vrsqrt.f32 %v2331_v42 }
 0x9d5   : > { %v9527_v43 = vpop.eup %9526 }
 0x9d6   : > { %v2333_v45 = vmul.f32 %v9527_v43, %v2325_v29 }
 0x9d8   : > { %v2340_v47 = vmul.f32 %v8334_v44, %v2333_v45 }
 0x9da   : > { %v2347_v48 = vadd.f32 %v8335_v46, %v2340_v47 }
 0x9dc   : > { %8807 = vmatmul.mubr.msk.f32.vlgmr.msra.gmra.mxu1 %vm1487_vm1, %v2347_v48 }
 0x9dd   : > { %8836 = vmatprep.mubr.msk.f32.mxu1 %vm10175_vm0, %v10174_v0  ;;  %8829 = vmatpush3.msra.mxu1 %v8345_v6 }
 0x9de   : > { %8830 = vmatprep.subr.mxu1 %v10174_v0 }
 0x9df   : > { %8831 = vmatpush3.msra.mxu1 %v8344_v7 }
 0x9e0   : > { %8832 = vmatprep.subr.mxu1 %v10174_v0 }
 0x9e1   : > { %8833 = vmatpush3.msra.mxu1 %v8343_v8 }
 0x9e2   : > { %8834 = vmatprep.subr.mxu1 %v10174_v0 }
 0x9e3   : > { %8835 = vmatpush3.msra.mxu1 %v8342_v9 }
 0x9e4   : > { %8839 = vmatprep.subr.mxu1 %v10174_v0 }
 0xa9c   : > { %v2437_v53 = vpop.f32.mrf.mxu1 }
 0xa9d   : > { %v2438_v54 = vadd.f32 %v8336_v52, %v2437_v53 }
 0xa9e   : > { %v8808_v55 = vpop.f32.mrf.mxu1 }
 0xa9f   : > { %v2441_v56 = vmax.f32 %v2438_v54, 0.0 }
 0xaa1   : > { %8826 = vmatmul.mubr.msk.f32.vlgmr.msra.gmra.mxu0 %vm2448_vm5, %v2441_v56 }
 0xaa2   : > { %8851 = vmatprep.mubr.msk.f32.mxu0 %vm10175_vm0, %v10174_v0 }
 0xb61   : > { %v2518_v58 = vpop.f32.mrf.mxu0 }
 0xb62   : > { %v2519_v59 = vadd.f32 %v8338_v57, %v2518_v58 }
 0xb63   : > { %v8827_v60 = vpop.f32.mrf.mxu0 }
 0xb64   : > { %v2522_v61 = vadd.f32 %v2519_v59, %v2347_v48 }
 0xb66   : > { %v2525_v62 = vsel %vm1487_vm1, %v2522_v61, 0.0 }
 0xb67   : > { %2526 = vadd.xlane.f32.xlu0 %v2525_v62 }
 0xbf0   : > { %v2527_v63 = vpop.xlane.xlu0 %2526 }
 0xbf1   : > { %v2528_v1 = vmul.f32 0.03125, %v2527_v63 }
 0xbf3   : > { %v2529_v2 = vsub.f32 %v2522_v61, %v2528_v1 }
 0xbf5   : > { %v2530_v3 = vmul.f32 %v2529_v2, %v2529_v2 }
 0xbf7   : > { %v2531_v4 = vsel %vm1487_vm1, %v2530_v3, 0.0 }
 0xbf8   : > { %2532 = vadd.xlane.f32.xlu0 %v2531_v4 }
 0xc81   : > { %v2533_v10 = vpop.xlane.xlu0 %2532 }
 0xc82   : > { %v2534_v11 = vmul.f32 0.03125, %v2533_v10 }
 0xc84   : > { %v2535_v12 = vadd.f32 1e-05, %v2534_v11 }
 0xc86   : > { %9528 = vrsqrt.f32 %v2535_v12 }
 0xc93   : > { %v9529_v13 = vpop.eup %9528 }
 0xc94   : > { %v2537_v15 = vmul.f32 %v9529_v13, %v2529_v2 }
 0xc96   : > { %v2544_v17 = vmul.f32 %v8340_v14, %v2537_v15  ;;  %v8350_v15 = vld [vmem:[%s11554_s1 + $0x38] sm:$0xff] }
 0xc98   : > { %v10770_v18 = vadd.f32 %v8341_v16, %v2544_v17 }
 0xc9a   : > { %8837 = vmatmul.mubr.msk.f32.vlgmr.msra.gmra.mxu1 %vm1487_vm1, %v10770_v18 }
 0xc9b   : > { %8841 = vmatprep.mubr.msk.f32.mxu1 %vm10175_vm0, %v10174_v0 }
 0xd5a   : > { %v2641_v20 = vpop.f32.mrf.mxu1 }
 0xd5b   : > { %v10777_v21 = vadd.f32 %v8352_v19, %v2641_v20 }
 0xd5c   : > { %v8838_v22 = vpop.f32.mrf.mxu1 }
 0xd5d   : > { %2811 = vrot.lane.b32.xlu0 %v10777_v21, %s11465_s16  ;;  %2646 = vrot.lane.b32.xlu1 %v10777_v21, %s11467_s15  ;;  %v8348_v22 = vld [vmem:[%s11554_s1 + $0x28] sm:$0xff]  ;;  %s11564_s16 = smov 16   ;;  %s11565_s15 = smov 24  }
 0xd61   : > { %2974 = vrot.lane.b32.xlu0 %v10777_v21, %s11459_s19  ;;  %2809 = vrot.lane.b32.xlu1 %v10777_v21, %s11463_s26  ;;  %s11561_s19 = smov 48   ;;  %s11563_s26 = smov 8  }
 0xd65   : > { %3139 = vrot.lane.b32.xlu0 %v10777_v21, %s11455_s20  ;;  %2976 = vrot.lane.b32.xlu1 %v10777_v21, %s11461_s14  ;;  %s11559_s20 = smov 56   ;;  %s11562_s14 = smov 40  }
 0xd69   : > { %3141 = vrot.lane.b32.xlu1 %v10777_v21, %s11457_s11  ;;  %s11560_s11 = smov 64  }
 0xdcf   : > { %v2812_v23 = vpop.permute.xlu0 %2811  ;;  %v2647_v24 = vpop.permute.xlu1 %2646 }
 0xdd0   : > { %8840 = vmatpush3.xpose.msk.msra.mxu1 %vm1564_vm2, %v2647_v24  ;;  %8850 = vmatpush3.xpose.msk.msra.mxu0 %vm1564_vm2, %v2812_v23  ;;  %v8347_v23 = vld [vmem:[%s11554_s1 + $0x20] sm:$0xff] }
 0xdd1   : > { %8859 = vmatprep.subr.mxu0 %v10174_v0  ;;  %8844 = vmatprep.subr.mxu1 %v10174_v0 }
 0xdd3   : > { %8842 = vmatmul.mubr.msk.f32.vlgmr.msra.gmra.mxu1 %vm1564_vm2, %v10777_v21  ;;  %v2810_v25 = vpop.permute.xlu1 %2809  ;;  %v2975_v27 = vpop.permute.xlu0 %2974 }
 0xdd4   : > { %8852 = vmatmul.mubr.msk.f32.vlgmr.msra.gmra.mxu0 %vm1564_vm2, %v2810_v25  ;;  %8846 = vmatprep.mubr.msk.f32.mxu1 %vm10175_vm0, %v10174_v0 }
 0xdd5   : > { %8861 = vmatprep.mubr.msk.f32.mxu0 %vm10175_vm0, %v10174_v0 }
 0xdd7   : > { %v2977_v26 = vpop.permute.xlu1 %2976  ;;  %v3140_v29 = vpop.permute.xlu0 %3139 }
 0xdd8   : > { %8860 = vmatpush3.xpose.msk.msra.mxu0 %vm1564_vm2, %v2977_v26 }
 0xdd9   : > { %8869 = vmatprep.subr.mxu0 %v10174_v0 }
 0xddb   : > { %8862 = vmatmul.mubr.msk.f32.vlgmr.msra.gmra.mxu0 %vm1564_vm2, %v2975_v27  ;;  %v3142_v28 = vpop.permute.xlu1 %3141 }
 0xddc   : > { %8870 = vmatpush3.xpose.msk.msra.mxu0 %vm1564_vm2, %v3142_v28  ;;  %8871 = vmatprep.mubr.msk.f32.mxu0 %vm10175_vm0, %v10174_v0 }
 0xddd   : > { %8879 = vmatprep.subr.mxu0 %v10174_v0 }
 0xddf   : > { %8872 = vmatmul.mubr.msk.f32.vlgmr.msra.gmra.mxu0 %vm1564_vm2, %v3140_v29 }
 0xde0   : > { %8887 = vmatprep.mubr.msk.f32.mxu0 %vm10175_vm0, %v10174_v0  ;;  %8880 = vmatpush3.msra.mxu0 %v8350_v15 }
 0xde1   : > { %8881 = vmatprep.subr.mxu0 %v10174_v0 }
 0xe93   : > { %v2718_v30 = vpop.f32.mrf.mxu1 }
 0xe94   : > { %v2883_v31 = vpop.f32.mrf.mxu0  ;;  %v2722_v32 = vsel %vm1564_vm2, %v2718_v30, -inf }
 0xe95   : > { %2723 = vmax.xlane.f32.xlu1 %v2722_v32  ;;  %v8843_v33 = vpop.f32.mrf.mxu1  ;;  %v2887_v5 = vsel %vm1564_vm2, %v2883_v31, -inf }
 0xe96   : > { %2888 = vmax.xlane.f32.xlu0 %v2887_v5  ;;  %v8853_v34 = vpop.f32.mrf.mxu0  ;;  %v8366_v5 = vld [vmem:[%s11555_s0 + $0x1] ss:$0 sm:$0xff]  ;;  %s11566_s0 = sld [smem:[#allocation50_spill]] }
 0xe9b   : > { %v3048_v35 = vpop.f32.mrf.mxu0 }
 0xe9c   : > { %v3052_v36 = vsel %vm1564_vm2, %v3048_v35, -inf }
 0xe9d   : > { %3053 = vmax.xlane.f32.xlu0 %v3052_v36  ;;  %v8863_v37 = vpop.f32.mrf.mxu0 }
 0xe9f   : > { %v3213_v38 = vpop.f32.mrf.mxu0 }
 0xea0   : > { %v3217_v39 = vsel %vm1564_vm2, %v3213_v38, -inf }
 0xea1   : > { %3218 = vmax.xlane.f32.xlu1 %v3217_v39  ;;  %v8873_v40 = vpop.f32.mrf.mxu0 }
 0xeb2   : > { %2898 = vrot.lane.b32.xlu1 %v10777_v21, %s11559_s20 }
 0xf1e   : > { %v2724_v41 = vpop.xlane.xlu1 %2723 }
 0xf1f   : > { %v2725_v42 = vsub.f32 %v2718_v30, %v2724_v41  ;;  %v2889_v43 = vpop.xlane.xlu0 %2888 }
 0xf20   : > { %v2890_v44 = vsub.f32 %v2883_v31, %v2889_v43 }
 0xf21   : > { %v2726_v45 = vmul.f32 1.442695, %v2725_v42 }
 0xf22   : > { %v2891_v46 = vmul.f32 1.442695, %v2890_v44  ;;  %v8374_v44 = vld [vmem:[%s11556_s28 + $0x38] sm:$0xff] }
 0xf23   : > { %9530 = vpow2.f32 %v2726_v45  ;;  %v8373_v45 = vld [vmem:[%s11556_s28 + $0x30] sm:$0xff] }
 0xf24   : > { %9532 = vpow2.f32 %v2891_v46  ;;  %v8371_v46 = vld [vmem:[%s11556_s28 + $0x20] sm:$0xff] }
 0xf26   : > { %v3054_v56 = vpop.xlane.xlu0 %3053 }
 0xf27   : > { %v3055_v57 = vsub.f32 %v3048_v35, %v3054_v56  ;;  %v8369_v56 = vld [vmem:[%s11558_s7 + $0x1] ss:$0 sm:$0xff]  ;;  %s11574_s7 = smov 72  }
 0xf29   : > { %v3056_v58 = vmul.f32 1.442695, %v3055_v57 }
 0xf2a   : > { %v3219_v47 = vpop.xlane.xlu1 %3218 }
 0xf2b   : > { %v3220_v48 = vsub.f32 %v3213_v38, %v3219_v47  ;;  %v8382_v47 = vld [vmem:[%s11557_s2 + $0x78] sm:$0xff] }
 0xf2d   : > { %v3221_v49 = vmul.f32 1.442695, %v3220_v48  ;;  %v8381_v48 = vld [vmem:[%s11557_s2 + $0x70] sm:$0xff] }
 0xf2e   : > { %v2899_v61 = vpop.permute.xlu1 %2898 }
 0xf2f   : > { %9534 = vpow2.f32 %v3221_v49  ;;  %v8380_v49 = vld [vmem:[%s11557_s2 + $0x68] sm:$0xff] }
 0xf30   : > { %v9531_v50 = vpop.eup %9530  ;;  %9536 = vpow2.f32 %v3056_v58  ;;  %v8370_v58 = vld [vmem:[#allocation2 + $0x1] ss:$0 sm:$0xff] }
 0xf31   : > { %v9533_v51 = vpop.eup %9532  ;;  %v2728_v52 = vsel %vm1564_vm2, %v9531_v50, 0.0 }
 0xf32   : > { %2729 = vadd.xlane.f32.xlu0 %v2728_v52  ;;  %v2893_v53 = vsel %vm1564_vm2, %v9533_v51, 0.0 }
 0xf33   : > { %2894 = vadd.xlane.f32.xlu1 %v2893_v53 }
 0xf3c   : > { %v9535_v54 = vpop.eup %9534 }
 0xf3d   : > { %v3223_v55 = vsel %vm1564_vm2, %v9535_v54, 0.0  ;;  %v9537_v59 = vpop.eup %9536 }
 0xf3e   : > { %3224 = vadd.xlane.f32.xlu1 %v3223_v55  ;;  %v3058_v60 = vsel %vm1564_vm2, %v9537_v59, 0.0 }
 0xf48   : > { %2733 = vrot.lane.b32.xlu0 %v10777_v21, %s11560_s11 }
 0xf4f   : > { %3063 = vrot.lane.b32.xlu1 %v10777_v21, %s11561_s19 }
 0xf67   : > { %3059 = vadd.xlane.f32.xlu0 %v3058_v60 }
 0xf7d   : > { %3228 = vrot.lane.b32.xlu0 %v10777_v21, %s11562_s14  ;;  %v8349_v21 = vld [vmem:[%s11554_s1 + $0x30] sm:$0xff]  ;;  %s1464_s1 = scalar_lea.vmem %s11567_s12, %s10617_s18  ;;  %s11578_s12 = sld [smem:[#allocation54_spill]] }
 0xf7e   : > { %8882 = vmatpush3.msra.mxu0 %v8349_v21  ;;  %v3640_v21 = vld [vmem:[#allocation22 + $0x8] sm:$0xff] }
 0xf7f   : > { %8883 = vmatprep.subr.mxu0 %v10174_v0 }
 0xf80   : > { %8884 = vmatpush3.msra.mxu0 %v8348_v22  ;;  %v3639_v22 = vld [vmem:[#allocation22] sm:$0xff] }
 0xf81   : > { %8885 = vmatprep.subr.mxu0 %v10174_v0 }
 0xf82   : > { %8886 = vmatpush3.msra.mxu0 %v8347_v23 }
 0xf83   : > { %8901 = vmatprep.subr.mxu0 %v10174_v0 }
 0xfbb   : > { %v2730_v62 = vpop.xlane.xlu0 %2729 }
 0xfbc   : > { %9538 = vrcp.f32 %v2730_v62  ;;  %v2895_v63 = vpop.xlane.xlu1 %2894  ;;  %v8376_v62 = vld [vmem:[%s11557_s2 + $0x48] sm:$0xff] }
 0xfbd   : > { %9540 = vrcp.f32 %v2895_v63  ;;  %v8375_v63 = vld [vmem:[%s11557_s2 + $0x40] sm:$0xff] }
 0xfbf   : > { %v2734_v1 = vpop.permute.xlu0 %2733 }
 0xfc0   : > { %8845 = vmatpush3.msra.mxu1 %v2734_v1  ;;  %v8383_v1 = vld [vmem:[#allocation4 + $0x1] ss:$0 sm:$0xff] }
 0xfc1   : > { %8854 = vmatprep.subr.mxu1 %v10174_v0 }
 0xfc7   : > { %v3225_v3 = vpop.xlane.xlu1 %3224 }
 0xfc9   : > { %v9539_v2 = vpop.eup %9538 }
 0xfca   : > { %v2732_v4 = vmul.f32 %v9539_v2, %v9531_v50  ;;  %v9541_v6 = vpop.eup %9540  ;;  %v8379_v50 = vld [vmem:[%s11557_s2 + $0x60] sm:$0xff] }
 0xfcb   : > { %v2897_v7 = vmul.f32 %v9541_v6, %v9533_v51  ;;  %v3064_v8 = vpop.permute.xlu1 %3063  ;;  %v8378_v51 = vld [vmem:[%s11557_s2 + $0x58] sm:$0xff] }
 0xfcc   : > { %8847 = vmatmul.mubr.msk.f32.vlgmr.msra.gmra.mxu1 %vm1564_vm2, %v2732_v4 }
 0xfcd   : > { %8855 = vmatpush3.msra.mxu1 %v2899_v61  ;;  %8856 = vmatprep.mubr.msk.f32.mxu1 %vm10175_vm0, %v10174_v0  ;;  %v8377_v61 = vld [vmem:[%s11557_s2 + $0x50] sm:$0xff]  ;;  %s11568_s2 = sld [smem:[#allocation38_spill]] }
 0xfce   : > { %8864 = vmatprep.subr.mxu1 %v10174_v0 }
 0xfd0   : > { %8857 = vmatmul.mubr.msk.f32.vlgmr.msra.gmra.mxu1 %vm1564_vm2, %v2897_v7  ;;  %v8385_v7 = vld [vmem:[#allocation6 + $0x1] ss:$0 sm:$0xff] }
 0xfd1   : > { %8865 = vmatpush3.msra.mxu1 %v3064_v8  ;;  %8866 = vmatprep.mubr.msk.f32.mxu1 %vm10175_vm0, %v10174_v0 }
 0xfd2   : > { %8874 = vmatprep.subr.mxu1 %v10174_v0 }
 0xfd3   : > { %s1452_s4 = scalar_lea.vmem %s11568_s2, %s10617_s18  ;;  %s11571_s2 = smov 120  }
 0xff0   : > { %v3060_v9 = vpop.xlane.xlu0 %3059 }
 0xff1   : > { %9542 = vrcp.f32 %v3060_v9 }
 0xff2   : > { %9544 = vrcp.f32 %v3225_v3 }
 0xff4   : > { %v3229_v13 = vpop.permute.xlu0 %3228 }
 0xffe   : > { %v9543_v10 = vpop.eup %9542 }
 0xfff   : > { %v3062_v11 = vmul.f32 %v9543_v10, %v9537_v59  ;;  %v9545_v12 = vpop.eup %9544 }
0x1000   : > { %v3227_v14 = vmul.f32 %v9545_v12, %v9535_v54 }
0x1001   : > { %8867 = vmatmul.mubr.msk.f32.vlgmr.msra.gmra.mxu1 %vm1564_vm2, %v3062_v11 }
0x1002   : > { %8875 = vmatpush3.msra.mxu1 %v3229_v13  ;;  %8876 = vmatprep.mubr.msk.f32.mxu1 %vm10175_vm0, %v10174_v0 }
0x1003   : > { %8890 = vmatprep.subr.mxu1 %v10174_v0 }
0x1005   : > { %8877 = vmatmul.mubr.msk.f32.vlgmr.msra.gmra.mxu1 %vm1564_vm2, %v3227_v14 }
0x1006   : > { %8898 = vmatprep.mubr.msk.f32.mxu1 %vm10175_vm0, %v10174_v0  ;;  %8891 = vmatpush3.msra.mxu1 %v8374_v44 }
0x1007   : > { %8892 = vmatprep.subr.mxu1 %v10174_v0 }
0x1008   : > { %8893 = vmatpush3.msra.mxu1 %v8373_v45 }
0x1009   : > { %8894 = vmatprep.subr.mxu1 %v10174_v0 }
0x108c   : > { %v2805_v16 = vpop.f32.mrf.mxu1 }
0x108e   : > { %v8848_v17 = vpop.f32.mrf.mxu1 }
0x1090   : > { %v2970_v19 = vpop.f32.mrf.mxu1 }
0x1091   : > { %3305 = vrot.lane.b32.xlu1 %v2970_v19, %s11563_s26  ;;  %v3642_v19 = vld [vmem:[#allocation22 + $0x18] sm:$0xff] }
0x1092   : > { %v8858_v20 = vpop.f32.mrf.mxu1 }
0x1093   : > { %v3641_v20 = vld [vmem:[#allocation22 + $0x10] sm:$0xff] }
0x10c1   : > { %v3135_v24 = vpop.f32.mrf.mxu1 }
0x10c2   : > { %3309 = vrot.lane.b32.xlu0 %v3135_v24, %s11564_s16 }
0x10c3   : > { %v8868_v25 = vpop.f32.mrf.mxu1 }
0x10c5   : > { %v3300_v26 = vpop.f32.mrf.mxu1 }
0x10c6   : > { %3313 = vrot.lane.b32.xlu1 %v3300_v26, %s11565_s15 }
0x10c7   : > { %v8878_v27 = vpop.f32.mrf.mxu1 }
0x10c8   : > { %v8387_v27 = vld [vmem:[#allocation7 + $0x1] ss:$0 sm:$0xff] }
0x1103   : > { %v3306_v28 = vpop.permute.xlu1 %3305 }
0x1104   : > { %v3316_v30 = vsel %vm1564_vm2, %v2805_v16, %v3306_v28 }
0x1134   : > { %v3310_v29 = vpop.permute.xlu0 %3309 }
0x1135   : > { %v3317_v31 = vsel %vm2234_vm3, %v3316_v30, %v3310_v29  ;;  %v8388_v29 = vld [vmem:[#allocation9 + $0x1] ss:$0 sm:$0xff] }
0x1138   : > { %v3314_v32 = vpop.permute.xlu1 %3313 }
0x1139   : > { %v3318_v33 = vsel %vm2236_vm4, %v3317_v31, %v3314_v32  ;;  %v3735_v32 = vld [vmem:[%s11566_s0 + $0x18] sm:$0xff] }
0x113a   : > { %8888 = vmatmul.mubr.msk.f32.vlgmr.msra.gmra.mxu0 %vm1487_vm1, %v3318_v33  ;;  %v3734_v33 = vld [vmem:[%s11566_s0 + $0x10] sm:$0xff] }
0x113b   : > { %8917 = vmatprep.mubr.msk.f32.mxu0 %vm10175_vm0, %v10174_v0  ;;  %8902 = vmatpush3.msra.mxu0 %v8382_v47 }
0x113c   : > { %8903 = vmatprep.subr.mxu0 %v10174_v0 }
0x113d   : > { %8904 = vmatpush3.msra.mxu0 %v8381_v48 }
0x113e   : > { %8905 = vmatprep.subr.mxu0 %v10174_v0 }
0x113f   : > { %8906 = vmatpush3.msra.mxu0 %v8380_v49 }
0x1140   : > { %8907 = vmatprep.subr.mxu0 %v10174_v0 }
0x1141   : > { %8908 = vmatpush3.msra.mxu0 %v8379_v50 }
0x1142   : > { %8909 = vmatprep.subr.mxu0 %v10174_v0 }
0x1143   : > { %8910 = vmatpush3.msra.mxu0 %v8378_v51 }
0x1144   : > { %8911 = vmatprep.subr.mxu0 %v10174_v0 }
0x1145   : > { %8912 = vmatpush3.msra.mxu0 %v8377_v61 }
0x1146   : > { %8913 = vmatprep.subr.mxu0 %v10174_v0 }
0x1147   : > { %8914 = vmatpush3.msra.mxu0 %v8376_v62 }
0x1148   : > { %8915 = vmatprep.subr.mxu0 %v10174_v0 }
0x1149   : > { %8916 = vmatpush3.msra.mxu0 %v8375_v63 }
0x114a   : > { %8942 = vmatprep.subr.mxu0 %v10174_v0 }
0x11fa   : > { %v3394_v34 = vpop.f32.mrf.mxu0 }
0x11fb   : > { %v3395_v35 = vadd.f32 %v8366_v5, %v3394_v34  ;;  %v8389_v5 = vld [vmem:[#allocation24] ss:$0 sm:$0xff] }
0x11fc   : > { %v8889_v36 = vpop.f32.mrf.mxu0 }
0x11fd   : > { %v3398_v37 = vadd.f32 %v3395_v35, %v10770_v18  ;;  %v8372_v18 = vld [vmem:[%s11556_s28 + $0x28] sm:$0xff] }
0x11fe   : > { %8895 = vmatpush3.msra.mxu1 %v8372_v18  ;;  %v8391_v18 = vld [vmem:[#allocation10] ss:$0 sm:$0xff] }
0x11ff   : > { %v3403_v38 = vsel %vm1487_vm1, %v3398_v37, 0.0  ;;  %8896 = vmatprep.subr.mxu1 %v10174_v0 }
0x1200   : > { %3404 = vadd.xlane.f32.xlu0 %v3403_v38  ;;  %8897 = vmatpush3.msra.mxu1 %v8371_v46 }
0x1201   : > { %8920 = vmatprep.subr.mxu1 %v10174_v0 }
0x1289   : > { %v3405_v39 = vpop.xlane.xlu0 %3404 }
0x128a   : > { %v3406_v40 = vmul.f32 0.03125, %v3405_v39  ;;  %v3733_v39 = vld [vmem:[%s11566_s0 + $0x8] sm:$0xff] }
0x128c   : > { %v3407_v41 = vsub.f32 %v3398_v37, %v3406_v40  ;;  %v3732_v40 = vld [vmem:[%s11566_s0] sm:$0xff] }
0x128e   : > { %v3408_v42 = vmul.f32 %v3407_v41, %v3407_v41 }
0x1290   : > { %v3409_v43 = vsel %vm1487_vm1, %v3408_v42, 0.0  ;;  %v1470_v42 = vld [vmem:[%s1452_s4] sm:$0xff]  ;;  %s11570_s4 = smov 88  }
0x1291   : > { %3410 = vadd.xlane.f32.xlu1 %v3409_v43 }
0x131a   : > { %v3411_v52 = vpop.xlane.xlu1 %3410 }
0x131b   : > { %v3412_v53 = vmul.f32 0.03125, %v3411_v52 }
0x131d   : > { %v3413_v54 = vadd.f32 1e-05, %v3412_v53 }
0x131f   : > { %9546 = vrsqrt.f32 %v3413_v54 }
0x132c   : > { %v9547_v55 = vpop.eup %9546 }
0x132d   : > { %v3415_v57 = vmul.f32 %v9547_v55, %v3407_v41 }
0x132f   : > { %v3422_v59 = vmul.f32 %v8369_v56, %v3415_v57 }
0x1331   : > { %v3429_v60 = vadd.f32 %v8370_v58, %v3422_v59 }
0x1333   : > { %8899 = vmatmul.mubr.msk.f32.vlgmr.msra.gmra.mxu1 %vm1487_vm1, %v3429_v60 }
0x1334   : > { %8928 = vmatprep.mubr.msk.f32.mxu1 %vm10175_vm0, %v10174_v0  ;;  %8921 = vmatpush3.msra.mxu1 %v3642_v19 }
0x1335   : > { %8922 = vmatprep.subr.mxu1 %v10174_v0 }
0x1336   : > { %8923 = vmatpush3.msra.mxu1 %v3641_v20 }
0x1337   : > { %8924 = vmatprep.subr.mxu1 %v10174_v0 }
0x1338   : > { %8925 = vmatpush3.msra.mxu1 %v3640_v21 }
0x1339   : > { %8926 = vmatprep.subr.mxu1 %v10174_v0 }
0x133a   : > { %8927 = vmatpush3.msra.mxu1 %v3639_v22 }
0x133b   : > { %8931 = vmatprep.subr.mxu1 %v10174_v0 }
0x13f3   : > { %v3523_v2 = vpop.f32.mrf.mxu1 }
0x13f4   : > { %v3524_v3 = vadd.f32 %v8383_v1, %v3523_v2 }
0x13f5   : > { %v8900_v4 = vpop.f32.mrf.mxu1 }
0x13f6   : > { %v3527_v6 = vmax.f32 %v3524_v3, 0.0 }
0x13f8   : > { %8918 = vmatmul.mubr.msk.f32.vlgmr.msra.gmra.mxu0 %vm2448_vm5, %v3527_v6 }
0x13f9   : > { %8944 = vmatprep.mubr.msk.f32.mxu0 %vm10175_vm0, %v10174_v0 }
0x14b8   : > { %v3603_v8 = vpop.f32.mrf.mxu0 }
0x14b9   : > { %v3604_v9 = vadd.f32 %v8385_v7, %v3603_v8 }
0x14ba   : > { %v8919_v10 = vpop.f32.mrf.mxu0 }
0x14bb   : > { %v3607_v11 = vadd.f32 %v3604_v9, %v3429_v60 }
0x14bd   : > { %v3612_v12 = vsel %vm1487_vm1, %v3607_v11, 0.0 }
0x14be   : > { %3613 = vadd.xlane.f32.xlu0 %v3612_v12 }
0x1547   : > { %v3614_v13 = vpop.xlane.xlu0 %3613 }
0x1548   : > { %v3615_v14 = vmul.f32 0.03125, %v3614_v13 }
0x154a   : > { %v3616_v15 = vsub.f32 %v3607_v11, %v3615_v14 }
0x154c   : > { %v3617_v16 = vmul.f32 %v3616_v15, %v3616_v15 }
0x154e   : > { %v3618_v17 = vsel %vm1487_vm1, %v3617_v16, 0.0 }
0x154f   : > { %3619 = vadd.xlane.f32.xlu0 %v3618_v17 }
0x15d8   : > { %v3620_v23 = vpop.xlane.xlu0 %3619 }
0x15d9   : > { %v3621_v24 = vmul.f32 0.03125, %v3620_v23 }
0x15db   : > { %v3622_v25 = vadd.f32 1e-05, %v3621_v24 }
0x15dd   : > { %9548 = vrsqrt.f32 %v3622_v25 }
0x15ea   : > { %v9549_v26 = vpop.eup %9548 }
0x15eb   : > { %v3624_v28 = vmul.f32 %v9549_v26, %v3616_v15 }
0x15ed   : > { %v3631_v30 = vmul.f32 %v8387_v27, %v3624_v28 }
0x15ef   : > { %v3638_v31 = vadd.f32 %v8388_v29, %v3631_v30 }
0x15f1   : > { %8929 = vmatmul.mubr.msk.f32.vlgmr.msra.gmra.mxu1 %vm1487_vm1, %v3638_v31 }
0x15f2   : > { %8939 = vmatprep.mubr.msk.f32.mxu1 %vm10175_vm0, %v10174_v0  ;;  %8932 = vmatpush3.msra.mxu1 %v3735_v32 }
0x15f3   : > { %8933 = vmatprep.subr.mxu1 %v10174_v0 }
0x15f4   : > { %8934 = vmatpush3.msra.mxu1 %v3734_v33 }
0x15f5   : > { %8935 = vmatprep.subr.mxu1 %v10174_v0 }
0x15f6   : > { %8936 = vmatpush3.msra.mxu1 %v3733_v39 }
0x15f7   : > { %8937 = vmatprep.subr.mxu1 %v10174_v0 }
0x15f8   : > { %8938 = vmatpush3.msra.mxu1 %v3732_v40 }
0x15f9   : > { %8947 = vmatprep.subr.mxu1 %v10174_v0 }
0x16b1   : > { %v3719_v34 = vpop.f32.mrf.mxu1 }
0x16b2   : > { %v10913_v35 = vadd.f32 %v8389_v5, %v3719_v34 }
0x16b3   : > { %v8930_v36 = vpop.f32.mrf.mxu1 }
0x16b4   : > { %v3723_v37 = vmul.f32 0.5, %v10913_v35  ;;  %7906 = vst.msk [vmem:[%s1464_s1] sm:$0xff] %vm1487_vm1, %v10913_v35  ;;  %s11573_s1 = smov 112  }
0x16b6   : > { %v3724_v38 = vmul.f32 1.442695, %v3723_v37 }
0x16b8   : > { %9550 = vpow2.f32 %v3724_v38 }
0x16c5   : > { %v9551_v41 = vpop.eup %9550 }
0x16c6   : > { %3727 = vrot.lane.b32.xlu1 %v9551_v41, %s11569_s3 }
0x1738   : > { %v3728_v43 = vpop.permute.xlu1 %3727 }
0x1739   : > { %v3730_v44 = vmul.f32 %v3728_v43, %v1470_v42  ;;  %v3740_v43 = vld [vmem:[%s11576_s9 + $0x18] sm:$0xff] }
0x173b   : > { %v10928_v45 = vadd.f32 %v3730_v44, %v10913_v35  ;;  %v3739_v44 = vld [vmem:[%s11576_s9 + $0x10] sm:$0xff] }
0x173d   : > { %7905 = vst.msk [vmem:[%s1460_s6] sm:$0xff] %vm1487_vm1, %v10928_v45  ;;  %8940 = vmatmul.mubr.msk.f32.vlgmr.msra.gmra.mxu1 %vm1487_vm1, %v10928_v45  ;;  %s11572_s6 = smov 80  }
0x173e   : > { %8949 = vmatprep.mubr.msk.f32.mxu1 %vm10175_vm0, %v10174_v0 }
0x17fd   : > { %v3817_v46 = vpop.f32.mrf.mxu1 }
0x17fe   : > { %v10936_v47 = vadd.f32 %v8391_v18, %v3817_v46  ;;  %v3738_v18 = vld [vmem:[%s11576_s9 + $0x8] sm:$0xff] }
0x17ff   : > { %v8941_v48 = vpop.f32.mrf.mxu1 }
0x1800   : > { %3987 = vrot.lane.b32.xlu1 %v10936_v47, %s11570_s4  ;;  %3822 = vrot.lane.b32.xlu0 %v10936_v47, %s11569_s3 }
0x1804   : > { %3985 = vrot.lane.b32.xlu1 %v10936_v47, %s11571_s2  ;;  %4152 = vrot.lane.b32.xlu0 %v10936_v47, %s11572_s6 }
0x1808   : > { %4150 = vrot.lane.b32.xlu1 %v10936_v47, %s11573_s1  ;;  %4317 = vrot.lane.b32.xlu0 %v10936_v47, %s11574_s7 }
0x180c   : > { %4315 = vrot.lane.b32.xlu1 %v10936_v47, %s11575_s8 }
0x1872   : > { %v3988_v49 = vpop.permute.xlu1 %3987  ;;  %v3823_v50 = vpop.permute.xlu0 %3822 }
0x1873   : > { %8943 = vmatpush3.xpose.msk.msra.mxu0 %vm1564_vm2, %v3823_v50 }
0x1874   : > { %8952 = vmatprep.subr.mxu0 %v10174_v0 }
0x1876   : > { %v3986_v51 = vpop.permute.xlu1 %3985  ;;  %8945 = vmatmul.mubr.msk.f32.vlgmr.msra.gmra.mxu0 %vm1564_vm2, %v10936_v47  ;;  %v4153_v52 = vpop.permute.xlu0 %4152 }
0x1877   : > { %8953 = vmatpush3.xpose.msk.msra.mxu0 %vm1564_vm2, %v3988_v49  ;;  %8954 = vmatprep.mubr.msk.f32.mxu0 %vm10175_vm0, %v10174_v0 }
0x1878   : > { %8962 = vmatprep.subr.mxu0 %v10174_v0 }
0x187a   : > { %8955 = vmatmul.mubr.msk.f32.vlgmr.msra.gmra.mxu0 %vm1564_vm2, %v3986_v51  ;;  %v4151_v53 = vpop.permute.xlu1 %4150  ;;  %v4318_v54 = vpop.permute.xlu0 %4317 }
0x187b   : > { %8963 = vmatpush3.xpose.msk.msra.mxu0 %vm1564_vm2, %v4153_v52  ;;  %8964 = vmatprep.mubr.msk.f32.mxu0 %vm10175_vm0, %v10174_v0 }
0x187c   : > { %8972 = vmatprep.subr.mxu0 %v10174_v0 }
0x187e   : > { %8965 = vmatmul.mubr.msk.f32.vlgmr.msra.gmra.mxu0 %vm1564_vm2, %v4151_v53  ;;  %v4316_v55 = vpop.permute.xlu1 %4315 }
0x187f   : > { %8973 = vmatpush3.xpose.msk.msra.mxu0 %vm1564_vm2, %v4318_v54  ;;  %8974 = vmatprep.mubr.msk.f32.mxu0 %vm10175_vm0, %v10174_v0 }
0x1880   : > { %8982 = vmatprep.subr.mxu0 %v10174_v0 }
0x1882   : > { %8975 = vmatmul.mubr.msk.f32.vlgmr.msra.gmra.mxu0 %vm1564_vm2, %v4316_v55 }
0x1883   : > { %8990 = vmatprep.mubr.msk.f32.mxu0 %vm10175_vm0, %v10174_v0  ;;  %8983 = vmatpush3.msra.mxu0 %v3740_v43 }
0x1884   : > { %8984 = vmatprep.subr.mxu0 %v10174_v0 }
0x1885   : > { %8985 = vmatpush3.msra.mxu0 %v3739_v44 }
0x1886   : > { %8986 = vmatprep.subr.mxu0 %v10174_v0 }
0x1887   : > { %8987 = vmatpush3.msra.mxu0 %v3738_v18 }
0x1888   : > { %8988 = vmatprep.subr.mxu0 %v10174_v0 }
0x1936   : > { %v3894_v56 = vpop.f32.mrf.mxu0 }
0x1937   : > { %v3898_v57 = vsel %vm1564_vm2, %v3894_v56, -inf }
0x1938   : > { %3899 = vmax.xlane.f32.xlu0 %v3898_v57  ;;  %v8946_v58 = vpop.f32.mrf.mxu0 }
0x193a   : > { %v4059_v59 = vpop.f32.mrf.mxu0 }
0x193b   : > { %v4063_v60 = vsel %vm1564_vm2, %v4059_v59, -inf }
0x193c   : > { %4064 = vmax.xlane.f32.xlu1 %v4063_v60  ;;  %v8956_v61 = vpop.f32.mrf.mxu0 }
0x193d   : > { %v8405_v61 = vld [vmem:[#allocation12] ss:$0 sm:$0xff] }
0x193e   : > { %v4224_v62 = vpop.f32.mrf.mxu0 }
0x193f   : > { %v4228_v63 = vsel %vm1564_vm2, %v4224_v62, -inf }
0x1940   : > { %4229 = vmax.xlane.f32.xlu0 %v4228_v63  ;;  %v8966_v1 = vpop.f32.mrf.mxu0 }
0x1942   : > { %v4389_v2 = vpop.f32.mrf.mxu0 }
0x1943   : > { %v4393_v3 = vsel %vm1564_vm2, %v4389_v2, -inf }
0x1944   : > { %4394 = vmax.xlane.f32.xlu0 %v4393_v3  ;;  %v8976_v4 = vpop.f32.mrf.mxu0 }
0x1945   : > { %v4606_v4 = vld [vmem:[#allocation13 + $0x10] sm:$0xff] }
0x194d   : > { %3909 = vrot.lane.b32.xlu1 %v10936_v47, %s11560_s11 }
0x19c1   : > { %v3900_v6 = vpop.xlane.xlu0 %3899 }
0x19c2   : > { %v3901_v7 = vsub.f32 %v3894_v56, %v3900_v6  ;;  %v4607_v6 = vld [vmem:[#allocation13 + $0x18] sm:$0xff] }
0x19c4   : > { %v3902_v8 = vmul.f32 1.442695, %v3901_v7  ;;  %v4605_v7 = vld [vmem:[#allocation13 + $0x8] sm:$0xff] }
0x19c5   : > { %v4065_v9 = vpop.xlane.xlu1 %4064 }
0x19c6   : > { %9552 = vpow2.f32 %v3902_v8  ;;  %v4066_v10 = vsub.f32 %v4059_v59, %v4065_v9  ;;  %v4604_v8 = vld [vmem:[#allocation13] sm:$0xff] }
0x19c8   : > { %v4067_v11 = vmul.f32 1.442695, %v4066_v10 }
0x19c9   : > { %v3910_v12 = vpop.permute.xlu1 %3909  ;;  %v4230_v13 = vpop.xlane.xlu0 %4229 }
0x19ca   : > { %9554 = vpow2.f32 %v4067_v11  ;;  %v4231_v14 = vsub.f32 %v4224_v62, %v4230_v13  ;;  %8948 = vmatpush3.msra.mxu1 %v3910_v12 }
0x19cb   : > { %8957 = vmatprep.subr.mxu1 %v10174_v0 }
0x19cc   : > { %v4232_v15 = vmul.f32 1.442695, %v4231_v14  ;;  %v8409_v14 = vld [vmem:[%s11577_s10] ss:$0 sm:$0xff] }
0x19cd   : > { %v4395_v16 = vpop.xlane.xlu0 %4394 }
0x19ce   : > { %9556 = vpow2.f32 %v4232_v15  ;;  %v4396_v17 = vsub.f32 %v4389_v2, %v4395_v16 }
0x19d0   : > { %v4397_v19 = vmul.f32 1.442695, %v4396_v17 }
0x19d2   : > { %9558 = vpow2.f32 %v4397_v19 }
0x19d3   : > { %v9553_v20 = vpop.eup %9552 }
0x19d4   : > { %v3904_v21 = vsel %vm1564_vm2, %v9553_v20, 0.0 }
0x19d5   : > { %3905 = vadd.xlane.f32.xlu1 %v3904_v21 }
0x19d7   : > { %v9555_v22 = vpop.eup %9554 }
0x19d8   : > { %v4069_v23 = vsel %vm1564_vm2, %v9555_v22, 0.0 }
0x19d9   : > { %4070 = vadd.xlane.f32.xlu0 %v4069_v23 }
0x19db   : > { %v9557_v24 = vpop.eup %9556 }
0x19dc   : > { %v4234_v25 = vsel %vm1564_vm2, %v9557_v24, 0.0 }
0x19dd   : > { %4235 = vadd.xlane.f32.xlu1 %v4234_v25 }
0x19df   : > { %v9559_v26 = vpop.eup %9558 }
0x19e0   : > { %v4399_v27 = vsel %vm1564_vm2, %v9559_v26, 0.0 }
0x19e1   : > { %4400 = vadd.xlane.f32.xlu0 %v4399_v27 }
0x19ee   : > { %4239 = vrot.lane.b32.xlu1 %v10936_v47, %s11561_s19 }
0x19f2   : > { %4404 = vrot.lane.b32.xlu1 %v10936_v47, %s11562_s14 }
0x19f7   : > { %4074 = vrot.lane.b32.xlu0 %v10936_v47, %s11559_s20  ;;  %v3737_v47 = vld [vmem:[%s11576_s9] sm:$0xff] }
0x19f8   : > { %8989 = vmatpush3.msra.mxu0 %v3737_v47 }
0x19f9   : > { %9004 = vmatprep.subr.mxu0 %v10174_v0 }
0x1a5e   : > { %v3906_v28 = vpop.xlane.xlu1 %3905 }
0x1a5f   : > { %9560 = vrcp.f32 %v3906_v28 }
0x1a62   : > { %v4071_v29 = vpop.xlane.xlu0 %4070 }
0x1a63   : > { %9562 = vrcp.f32 %v4071_v29 }
0x1a66   : > { %v4236_v30 = vpop.xlane.xlu1 %4235 }
0x1a67   : > { %9564 = vrcp.f32 %v4236_v30 }
0x1a6a   : > { %v4401_v31 = vpop.xlane.xlu0 %4400  ;;  %v4240_v36 = vpop.permute.xlu1 %4239 }
0x1a6b   : > { %9566 = vrcp.f32 %v4401_v31 }
0x1a6c   : > { %v9561_v32 = vpop.eup %9560 }
0x1a6d   : > { %v3908_v33 = vmul.f32 %v9561_v32, %v9553_v20 }
0x1a6e   : > { %v4075_v5 = vpop.permute.xlu0 %4074  ;;  %v4405_v40 = vpop.permute.xlu1 %4404 }
0x1a6f   : > { %8950 = vmatmul.mubr.msk.f32.vlgmr.msra.gmra.mxu1 %vm1564_vm2, %v3908_v33 }
0x1a70   : > { %v9563_v34 = vpop.eup %9562  ;;  %8958 = vmatpush3.msra.mxu1 %v4075_v5  ;;  %8959 = vmatprep.mubr.msk.f32.mxu1 %vm10175_vm0, %v10174_v0 }
0x1a71   : > { %8967 = vmatprep.subr.mxu1 %v10174_v0  ;;  %v4073_v37 = vmul.f32 %v9563_v34, %v9555_v22 }
0x1a73   : > { %8960 = vmatmul.mubr.msk.f32.vlgmr.msra.gmra.mxu1 %vm1564_vm2, %v4073_v37 }
0x1a74   : > { %v9565_v38 = vpop.eup %9564  ;;  %8968 = vmatpush3.msra.mxu1 %v4240_v36  ;;  %8969 = vmatprep.mubr.msk.f32.mxu1 %vm10175_vm0, %v10174_v0 }
0x1a75   : > { %8977 = vmatprep.subr.mxu1 %v10174_v0  ;;  %v4238_v39 = vmul.f32 %v9565_v38, %v9557_v24  ;;  %v8407_v24 = vld [vmem:[%s11578_s12] ss:$0 sm:$0xff] }
0x1a77   : > { %8970 = vmatmul.mubr.msk.f32.vlgmr.msra.gmra.mxu1 %vm1564_vm2, %v4238_v39 }
0x1a78   : > { %v9567_v41 = vpop.eup %9566  ;;  %8978 = vmatpush3.msra.mxu1 %v4405_v40  ;;  %8979 = vmatprep.mubr.msk.f32.mxu1 %vm10175_vm0, %v10174_v0 }
0x1a79   : > { %v4403_v42 = vmul.f32 %v9567_v41, %v9559_v26  ;;  %8993 = vmatprep.subr.mxu1 %v10174_v0  ;;  %v8408_v26 = vld [vmem:[%s11579_s17] ss:$0 sm:$0xff] }
0x1a7b   : > { %8980 = vmatmul.mubr.msk.f32.vlgmr.msra.gmra.mxu1 %vm1564_vm2, %v4403_v42 }
0x1a7c   : > { %9001 = vmatprep.mubr.msk.f32.mxu1 %vm10175_vm0, %v10174_v0  ;;  %8994 = vmatpush3.msra.mxu1 %v4607_v6 }
0x1a7d   : > { %8995 = vmatprep.subr.mxu1 %v10174_v0 }
0x1a7e   : > { %8996 = vmatpush3.msra.mxu1 %v4606_v4 }
0x1a7f   : > { %8997 = vmatprep.subr.mxu1 %v10174_v0 }
0x1a80   : > { %8998 = vmatpush3.msra.mxu1 %v4605_v7 }
0x1a81   : > { %8999 = vmatprep.subr.mxu1 %v10174_v0 }
0x1a82   : > { %9000 = vmatpush3.msra.mxu1 %v4604_v8 }
0x1a83   : > { %9015 = vmatprep.subr.mxu1 %v10174_v0 }
0x1b2f   : > { %v3981_v46 = vpop.f32.mrf.mxu1 }
0x1b31   : > { %v8951_v48 = vpop.f32.mrf.mxu1 }
0x1b33   : > { %v4146_v49 = vpop.f32.mrf.mxu1 }
0x1b34   : > { %4481 = vrot.lane.b32.xlu0 %v4146_v49, %s11563_s26 }
0x1b35   : > { %v8961_v50 = vpop.f32.mrf.mxu1 }
0x1b37   : > { %v4311_v51 = vpop.f32.mrf.mxu1 }
0x1b38   : > { %4485 = vrot.lane.b32.xlu1 %v4311_v51, %s11564_s16 }
0x1b39   : > { %v8971_v52 = vpop.f32.mrf.mxu1 }
0x1b3b   : > { %v4476_v53 = vpop.f32.mrf.mxu1 }
0x1b3c   : > { %4489 = vrot.lane.b32.xlu0 %v4476_v53, %s11565_s15 }
0x1b3d   : > { %v8981_v54 = vpop.f32.mrf.mxu1 }
0x1ba6   : > { %v4482_v55 = vpop.permute.xlu0 %4481 }
0x1ba7   : > { %v4492_v57 = vsel %vm1564_vm2, %v3981_v46, %v4482_v55 }
0x1baa   : > { %v4486_v56 = vpop.permute.xlu1 %4485 }
0x1bab   : > { %v4493_v58 = vsel %vm2234_vm3, %v4492_v57, %v4486_v56 }
0x1bae   : > { %v4490_v59 = vpop.permute.xlu0 %4489 }
0x1baf   : > { %v4494_v60 = vsel %vm2236_vm4, %v4493_v58, %v4490_v59 }
0x1bb0   : > { %8991 = vmatmul.mubr.msk.f32.vlgmr.msra.gmra.mxu0 %vm1487_vm1, %v4494_v60 }
0x1bb1   : > { %9012 = vmatprep.mubr.msk.f32.mxu0 %vm10175_vm0, %v10174_v0 }
0x1c70   : > { %v4570_v62 = vpop.f32.mrf.mxu0 }
0x1c71   : > { %v4571_v63 = vadd.f32 %v8405_v61, %v4570_v62 }
0x1c72   : > { %v8992_v1 = vpop.f32.mrf.mxu0 }
0x1c73   : > { %v4574_v2 = vadd.f32 %v4571_v63, %v10928_v45 }
0x1c75   : > { %v4577_v3 = vsel %vm1487_vm1, %v4574_v2, 0.0 }
0x1c76   : > { %4578 = vadd.xlane.f32.xlu1 %v4577_v3 }
0x1c87   : > { %4701 = vrot.lane.b32.xlu1 %v4606_v4, %s11569_s3 }
0x1c8b   : > { %4699 = vrot.lane.b32.xlu1 %v4605_v7, %s11569_s3 }
0x1c8f   : > { %4709 = vrot.lane.b32.xlu1 %v8409_v14, %s11569_s3 }
0x1cff   : > { %v4579_v9 = vpop.xlane.xlu1 %4578 }
0x1d00   : > { %v4580_v10 = vmul.f32 0.03125, %v4579_v9 }
0x1d02   : > { %v4581_v11 = vsub.f32 %v4574_v2, %v4580_v10 }
0x1d03   : > { %v4702_v16 = vpop.permute.xlu1 %4701 }
0x1d04   : > { %v4582_v12 = vmul.f32 %v4581_v11, %v4581_v11 }
0x1d06   : > { %v4583_v13 = vsel %vm1487_vm1, %v4582_v12, 0.0 }
0x1d07   : > { %4584 = vadd.xlane.f32.xlu0 %v4583_v13  ;;  %v4700_v21 = vpop.permute.xlu1 %4699 }
0x1d0b   : > { %v4710_v29 = vpop.permute.xlu1 %4709 }
0x1d1d   : > { %4703 = vrot.lane.b32.xlu0 %v4607_v6, %s11569_s3 }
0x1d21   : > { %4697 = vrot.lane.b32.xlu0 %v4604_v8, %s11569_s3 }
0x1d90   : > { %v4585_v15 = vpop.xlane.xlu0 %4584 }
0x1d91   : > { %v4586_v17 = vmul.f32 0.03125, %v4585_v15 }
0x1d93   : > { %v4587_v19 = vadd.f32 1e-05, %v4586_v17 }
0x1d94   : > { %v4704_v20 = vpop.permute.xlu0 %4703 }
0x1d95   : > { %9568 = vrsqrt.f32 %v4587_v19  ;;  %9005 = vmatpush3.msra.mxu0 %v4704_v20 }
0x1d96   : > { %9006 = vmatprep.subr.mxu0 %v10174_v0 }
0x1d97   : > { %9007 = vmatpush3.msra.mxu0 %v4702_v16 }
0x1d98   : > { %9008 = vmatprep.subr.mxu0 %v10174_v0  ;;  %v4698_v22 = vpop.permute.xlu0 %4697 }
0x1d99   : > { %9009 = vmatpush3.msra.mxu0 %v4700_v21 }
0x1d9a   : > { %9010 = vmatprep.subr.mxu0 %v10174_v0 }
0x1d9b   : > { %9011 = vmatpush3.msra.mxu0 %v4698_v22 }
0x1d9c   : > { %9013 = vmatmul.mubr.msk.f32.vlgmr.msra.gmra.mxu0 %vm1487_vm1, %v10928_v45  ;;  %9025 = vmatprep.subr.mxu0 %v10174_v0 }
0x1d9d   : > { %9027 = vmatprep.mubr.msk.f32.mxu0 %vm10175_vm0, %v10174_v0 }
0x1da2   : > { %v9569_v23 = vpop.eup %9568 }
0x1da3   : > { %v4589_v25 = vmul.f32 %v9569_v23, %v4581_v11 }
0x1da5   : > { %v4596_v27 = vmul.f32 %v8407_v24, %v4589_v25 }
0x1da7   : > { %v11045_v28 = vadd.f32 %v8408_v26, %v4596_v27 }
0x1da9   : > { %9002 = vmatmul.mubr.msk.f32.vlgmr.msra.gmra.mxu1 %vm1487_vm1, %v11045_v28 }
0x1daa   : > { %9017 = vmatprep.mubr.msk.f32.mxu1 %vm10175_vm0, %v10174_v0 }
0x1e5c   : > { %v4778_v30 = vpop.f32.mrf.mxu0 }
0x1e5d   : > { %v11051_v31 = vadd.f32 %v4778_v30, %v4710_v29 }
0x1e5e   : > { %v9014_v32 = vpop.f32.mrf.mxu0 }
0x1e5f   : > { %4947 = vrot.lane.b32.xlu0 %v11051_v31, %s11571_s2  ;;  %9016 = vmatpush3.xpose.msk.msra.mxu1 %vm1564_vm2, %v11051_v31  ;;  %v4612_v32 = vld [vmem:[#allocation15 + $0x18] sm:$0xff] }
0x1e60   : > { %9020 = vmatprep.subr.mxu1 %v10174_v0 }
0x1e63   : > { %5112 = vrot.lane.b32.xlu0 %v11051_v31, %s11573_s1 }
0x1e67   : > { %5277 = vrot.lane.b32.xlu0 %v11051_v31, %s11575_s8 }
0x1e69   : > { %v4689_v33 = vpop.f32.mrf.mxu1 }
0x1e6a   : > { %v4690_v5 = vadd.f32 %v8409_v14, %v4689_v33  ;;  %v4611_v33 = vld [vmem:[#allocation15 + $0x10] sm:$0xff] }
0x1e6b   : > { %v9003_v34 = vpop.f32.mrf.mxu1 }
0x1e6c   : > { %4945 = vrot.lane.b32.xlu1 %v4690_v5, %s11571_s2  ;;  %9018 = vmatmul.mubr.msk.f32.vlgmr.msra.gmra.mxu1 %vm1564_vm2, %v4690_v5  ;;  %v4609_v34 = vld [vmem:[#allocation15] sm:$0xff] }
0x1e6d   : > { %9022 = vmatprep.mubr.msk.f32.mxu1 %vm10175_vm0, %v10174_v0 }
0x1e70   : > { %5110 = vrot.lane.b32.xlu1 %v4690_v5, %s11573_s1 }
0x1e74   : > { %5275 = vrot.lane.b32.xlu1 %v4690_v5, %s11575_s8  ;;  %v4610_v5 = vld [vmem:[#allocation15 + $0x8] sm:$0xff] }
0x1ed1   : > { %v4948_v36 = vpop.permute.xlu0 %4947 }
0x1ed2   : > { %9026 = vmatpush3.xpose.msk.msra.mxu0 %vm1564_vm2, %v4948_v36 }
0x1ed3   : > { %9035 = vmatprep.subr.mxu0 %v10174_v0 }
0x1ed5   : > { %v5113_v37 = vpop.permute.xlu0 %5112 }
0x1ed9   : > { %v5278_v40 = vpop.permute.xlu0 %5277 }
0x1ede   : > { %v4946_v38 = vpop.permute.xlu1 %4945 }
0x1edf   : > { %9028 = vmatmul.mubr.msk.f32.vlgmr.msra.gmra.mxu0 %vm1564_vm2, %v4946_v38 }
0x1ee0   : > { %9036 = vmatpush3.xpose.msk.msra.mxu0 %vm1564_vm2, %v5113_v37  ;;  %9037 = vmatprep.mubr.msk.f32.mxu0 %vm10175_vm0, %v10174_v0 }
0x1ee1   : > { %9045 = vmatprep.subr.mxu0 %v10174_v0 }
0x1ee2   : > { %v5111_v39 = vpop.permute.xlu1 %5110 }
0x1ee3   : > { %9038 = vmatmul.mubr.msk.f32.vlgmr.msra.gmra.mxu0 %vm1564_vm2, %v5111_v39 }
0x1ee4   : > { %9046 = vmatpush3.xpose.msk.msra.mxu0 %vm1564_vm2, %v5278_v40  ;;  %9047 = vmatprep.mubr.msk.f32.mxu0 %vm10175_vm0, %v10174_v0 }
0x1ee5   : > { %9055 = vmatprep.subr.mxu0 %v10174_v0 }
0x1ee6   : > { %v5276_v41 = vpop.permute.xlu1 %5275 }
0x1ee7   : > { %9048 = vmatmul.mubr.msk.f32.vlgmr.msra.gmra.mxu0 %vm1564_vm2, %v5276_v41 }
0x1ee8   : > { %9063 = vmatprep.mubr.msk.f32.mxu0 %vm10175_vm0, %v10174_v0  ;;  %9056 = vmatpush3.msra.mxu0 %v4612_v32 }
0x1ee9   : > { %9057 = vmatprep.subr.mxu0 %v10174_v0 }
0x1eea   : > { %9058 = vmatpush3.msra.mxu0 %v4611_v33 }
0x1eeb   : > { %9059 = vmatprep.subr.mxu0 %v10174_v0 }
0x1eec   : > { %9060 = vmatpush3.msra.mxu0 %v4610_v5 }
0x1eed   : > { %9061 = vmatprep.subr.mxu0 %v10174_v0 }
0x1eee   : > { %9062 = vmatpush3.msra.mxu0 %v4609_v34  ;;  %v8437_v34 = vld [vmem:[%s11566_s0 + $0x38] sm:$0xff] }
0x1eef   : > { %9077 = vmatprep.subr.mxu0 %v10174_v0 }
0x1f2c   : > { %v4854_v42 = vpop.f32.mrf.mxu1 }
0x1f2d   : > { %v4858_v43 = vsel %vm1564_vm2, %v4854_v42, -inf }
0x1f2e   : > { %4859 = vmax.xlane.f32.xlu0 %v4858_v43  ;;  %v9019_v44 = vpop.f32.mrf.mxu1 }
0x1f9f   : > { %v5019_v18 = vpop.f32.mrf.mxu0 }
0x1fa0   : > { %v5023_v46 = vsel %vm1564_vm2, %v5019_v18, -inf }
0x1fa1   : > { %5024 = vmax.xlane.f32.xlu1 %v5023_v46  ;;  %v9029_v47 = vpop.f32.mrf.mxu0 }
0x1fa3   : > { %v5184_v48 = vpop.f32.mrf.mxu0 }
0x1fa4   : > { %v5188_v49 = vsel %vm1564_vm2, %v5184_v48, -inf }
0x1fa5   : > { %5189 = vmax.xlane.f32.xlu0 %v5188_v49  ;;  %v9039_v50 = vpop.f32.mrf.mxu0 }
0x1fa7   : > { %v5349_v51 = vpop.f32.mrf.mxu0 }
0x1fa8   : > { %v5353_v52 = vsel %vm1564_vm2, %v5349_v51, -inf }
0x1fa9   : > { %5354 = vmax.xlane.f32.xlu0 %v5353_v52  ;;  %v9049_v53 = vpop.f32.mrf.mxu0 }
0x1fb2   : > { %4869 = vrot.lane.b32.xlu1 %v11051_v31, %s11569_s3 }
0x1fb7   : > { %v4860_v54 = vpop.xlane.xlu0 %4859 }
0x1fb8   : > { %v4861_v55 = vsub.f32 %v4854_v42, %v4860_v54 }
0x1fba   : > { %v4862_v56 = vmul.f32 1.442695, %v4861_v55 }
0x1fbc   : > { %9570 = vpow2.f32 %v4862_v56 }
0x1fc9   : > { %v9571_v57 = vpop.eup %9570 }
0x1fca   : > { %v4864_v58 = vsel %vm1564_vm2, %v9571_v57, 0.0 }
0x1fd6   : > { %4865 = vadd.xlane.f32.xlu1 %v4864_v58 }
0x202a   : > { %v5025_v59 = vpop.xlane.xlu1 %5024 }
0x202b   : > { %v5026_v60 = vsub.f32 %v5019_v18, %v5025_v59  ;;  %v5567_v59 = vld [vmem:[#allocation18 + $0x18] sm:$0xff] }
0x202d   : > { %v5027_v61 = vmul.f32 1.442695, %v5026_v60  ;;  %v5566_v60 = vld [vmem:[#allocation18 + $0x10] sm:$0xff] }
0x202e   : > { %v4870_v62 = vpop.permute.xlu1 %4869  ;;  %v5190_v63 = vpop.xlane.xlu0 %5189 }
0x202f   : > { %9572 = vpow2.f32 %v5027_v61  ;;  %v5191_v1 = vsub.f32 %v5184_v48, %v5190_v63  ;;  %9021 = vmatpush3.msra.mxu1 %v4870_v62  ;;  %v8424_v48 = vld [vmem:[%s11580_s21] ss:$0 sm:$0xff]  ;;  %v5564_v61 = vld [vmem:[#allocation18] sm:$0xff]  ;;  %v5576_v62 = vld [vmem:[%s11581_s23 + $0x38] sm:$0xff] }
0x2030   : > { %9030 = vmatprep.subr.mxu1 %v10174_v0  ;;  %v5575_v63 = vld [vmem:[%s11581_s23 + $0x30] sm:$0xff] }
0x2031   : > { %v5192_v2 = vmul.f32 1.442695, %v5191_v1  ;;  %v5574_v1 = vld [vmem:[%s11581_s23 + $0x28] sm:$0xff] }
0x2032   : > { %v5355_v3 = vpop.xlane.xlu0 %5354 }
0x2033   : > { %9574 = vpow2.f32 %v5192_v2  ;;  %v5356_v4 = vsub.f32 %v5349_v51, %v5355_v3  ;;  %v5573_v2 = vld [vmem:[%s11581_s23 + $0x20] sm:$0xff]  ;;  %v5572_v3 = vld [vmem:[%s11581_s23 + $0x18] sm:$0xff] }
0x2035   : > { %v5357_v6 = vmul.f32 1.442695, %v5356_v4 }
0x2037   : > { %9576 = vpow2.f32 %v5357_v6 }
0x203c   : > { %v9573_v7 = vpop.eup %9572 }
0x203d   : > { %v5029_v8 = vsel %vm1564_vm2, %v9573_v7, 0.0 }
0x203e   : > { %5030 = vadd.xlane.f32.xlu0 %v5029_v8 }
0x2040   : > { %v9575_v9 = vpop.eup %9574 }
0x2041   : > { %v5194_v10 = vsel %vm1564_vm2, %v9575_v9, 0.0 }
0x2042   : > { %5195 = vadd.xlane.f32.xlu1 %v5194_v10 }
0x2044   : > { %v9577_v11 = vpop.eup %9576 }
0x2045   : > { %v5359_v12 = vsel %vm1564_vm2, %v9577_v11, 0.0 }
0x2046   : > { %5360 = vadd.xlane.f32.xlu0 %v5359_v12 }
0x2053   : > { %5199 = vrot.lane.b32.xlu1 %v11051_v31, %s11572_s6 }
0x2057   : > { %5364 = vrot.lane.b32.xlu1 %v11051_v31, %s11574_s7 }
0x205c   : > { %5034 = vrot.lane.b32.xlu0 %v11051_v31, %s11570_s4 }
0x205f   : > { %v4866_v13 = vpop.xlane.xlu1 %4865 }
0x2060   : > { %9578 = vrcp.f32 %v4866_v13 }
0x206d   : > { %v9579_v14 = vpop.eup %9578 }
0x206e   : > { %v4868_v15 = vmul.f32 %v9579_v14, %v9571_v57  ;;  %v5571_v14 = vld [vmem:[%s11581_s23 + $0x10] sm:$0xff] }
0x2070   : > { %9023 = vmatmul.mubr.msk.f32.vlgmr.msra.gmra.mxu1 %vm1564_vm2, %v4868_v15  ;;  %v5570_v15 = vld [vmem:[%s11581_s23 + $0x8] sm:$0xff] }
0x2071   : > { %9032 = vmatprep.mubr.msk.f32.mxu1 %vm10175_vm0, %v10174_v0 }
0x20c7   : > { %v5031_v16 = vpop.xlane.xlu0 %5030 }
0x20c8   : > { %9580 = vrcp.f32 %v5031_v16  ;;  %v5569_v16 = vld [vmem:[%s11581_s23] sm:$0xff] }
0x20cb   : > { %v5196_v17 = vpop.xlane.xlu1 %5195 }
0x20cc   : > { %9582 = vrcp.f32 %v5196_v17  ;;  %v8428_v17 = vld [vmem:[%s11583_s25] ss:$0 sm:$0xff] }
0x20cf   : > { %v5361_v19 = vpop.xlane.xlu0 %5360  ;;  %v5200_v22 = vpop.permute.xlu1 %5199 }
0x20d0   : > { %9584 = vrcp.f32 %v5361_v19 }
0x20d3   : > { %v5035_v20 = vpop.permute.xlu0 %5034  ;;  %v5365_v26 = vpop.permute.xlu1 %5364 }
0x20d4   : > { %9031 = vmatpush3.msra.mxu1 %v5035_v20 }
0x20d5   : > { %v9581_v21 = vpop.eup %9580  ;;  %9040 = vmatprep.subr.mxu1 %v10174_v0 }
0x20d6   : > { %v5033_v23 = vmul.f32 %v9581_v21, %v9573_v7 }
0x20d8   : > { %9033 = vmatmul.mubr.msk.f32.vlgmr.msra.gmra.mxu1 %vm1564_vm2, %v5033_v23  ;;  %v8430_v23 = vld [vmem:[%s11584_s27] ss:$0 sm:$0xff] }
0x20d9   : > { %v9583_v24 = vpop.eup %9582  ;;  %9041 = vmatpush3.msra.mxu1 %v5200_v22  ;;  %9042 = vmatprep.mubr.msk.f32.mxu1 %vm10175_vm0, %v10174_v0 }
0x20da   : > { %9050 = vmatprep.subr.mxu1 %v10174_v0  ;;  %v5198_v25 = vmul.f32 %v9583_v24, %v9575_v9  ;;  %v8426_v9 = vld [vmem:[#allocation16] ss:$0 sm:$0xff] }
0x20dc   : > { %9043 = vmatmul.mubr.msk.f32.vlgmr.msra.gmra.mxu1 %vm1564_vm2, %v5198_v25 }
0x20dd   : > { %v9585_v27 = vpop.eup %9584  ;;  %9051 = vmatpush3.msra.mxu1 %v5365_v26  ;;  %9052 = vmatprep.mubr.msk.f32.mxu1 %vm10175_vm0, %v10174_v0 }
0x20de   : > { %v5363_v29 = vmul.f32 %v9585_v27, %v9577_v11  ;;  %9066 = vmatprep.subr.mxu1 %v10174_v0  ;;  %v8427_v11 = vld [vmem:[%s11582_s24] ss:$0 sm:$0xff] }
0x20e0   : > { %9053 = vmatmul.mubr.msk.f32.vlgmr.msra.gmra.mxu1 %vm1564_vm2, %v5363_v29 }
0x20e1   : > { %9074 = vmatprep.mubr.msk.f32.mxu1 %vm10175_vm0, %v10174_v0  ;;  %9067 = vmatpush3.msra.mxu1 %v5567_v59 }
0x20e2   : > { %9068 = vmatprep.subr.mxu1 %v10174_v0 }
0x20e3   : > { %9069 = vmatpush3.msra.mxu1 %v5566_v60 }
0x20e4   : > { %9070 = vmatprep.subr.mxu1 %v10174_v0 }
0x2130   : > { %v4941_v30 = vpop.f32.mrf.mxu1 }
0x2132   : > { %v9024_v31 = vpop.f32.mrf.mxu1 }
0x2198   : > { %v5106_v36 = vpop.f32.mrf.mxu1 }
0x2199   : > { %5441 = vrot.lane.b32.xlu0 %v5106_v36, %s11563_s26  ;;  %v8436_v36 = vld [vmem:[%s11566_s0 + $0x30] sm:$0xff] }
0x219a   : > { %v9034_v37 = vpop.f32.mrf.mxu1 }
0x219b   : > { %v8435_v37 = vld [vmem:[%s11566_s0 + $0x28] sm:$0xff] }
0x219c   : > { %v5271_v38 = vpop.f32.mrf.mxu1 }
0x219d   : > { %5445 = vrot.lane.b32.xlu1 %v5271_v38, %s11564_s16  ;;  %v8434_v38 = vld [vmem:[%s11566_s0 + $0x20] sm:$0xff] }
0x219e   : > { %v9044_v39 = vpop.f32.mrf.mxu1 }
0x21a0   : > { %v5436_v40 = vpop.f32.mrf.mxu1 }
0x21a1   : > { %5449 = vrot.lane.b32.xlu0 %v5436_v40, %s11565_s15 }
0x21a2   : > { %v9054_v41 = vpop.f32.mrf.mxu1 }
0x220b   : > { %v5442_v42 = vpop.permute.xlu0 %5441 }
0x220c   : > { %v5452_v44 = vsel %vm1564_vm2, %v4941_v30, %v5442_v42 }
0x220f   : > { %v5446_v43 = vpop.permute.xlu1 %5445 }
0x2210   : > { %v5453_v18 = vsel %vm2234_vm3, %v5452_v44, %v5446_v43  ;;  %v8432_v43 = vld [vmem:[#allocation19] ss:$0 sm:$0xff] }
0x2213   : > { %v5450_v46 = vpop.permute.xlu0 %5449 }
0x2214   : > { %v5454_v47 = vsel %vm2236_vm4, %v5453_v18, %v5450_v46  ;;  %v8433_v18 = vld [vmem:[#allocation21] ss:$0 sm:$0xff] }
0x2215   : > { %9064 = vmatmul.mubr.msk.f32.vlgmr.msra.gmra.mxu0 %vm1487_vm1, %v5454_v47 }
0x2216   : > { %9093 = vmatprep.mubr.msk.f32.mxu0 %vm10175_vm0, %v10174_v0  ;;  %9078 = vmatpush3.msra.mxu0 %v5576_v62 }
0x2217   : > { %9079 = vmatprep.subr.mxu0 %v10174_v0 }
0x2218   : > { %9080 = vmatpush3.msra.mxu0 %v5575_v63 }
0x2219   : > { %9081 = vmatprep.subr.mxu0 %v10174_v0 }
0x221a   : > { %9082 = vmatpush3.msra.mxu0 %v5574_v1 }
0x221b   : > { %9083 = vmatprep.subr.mxu0 %v10174_v0 }
0x221c   : > { %9084 = vmatpush3.msra.mxu0 %v5573_v2 }
0x221d   : > { %9085 = vmatprep.subr.mxu0 %v10174_v0 }
0x221e   : > { %9086 = vmatpush3.msra.mxu0 %v5572_v3 }
0x221f   : > { %9087 = vmatprep.subr.mxu0 %v10174_v0 }
0x2220   : > { %9088 = vmatpush3.msra.mxu0 %v5571_v14 }
0x2221   : > { %9089 = vmatprep.subr.mxu0 %v10174_v0 }
0x2222   : > { %9090 = vmatpush3.msra.mxu0 %v5570_v15 }
0x2223   : > { %9091 = vmatprep.subr.mxu0 %v10174_v0 }
0x2224   : > { %9092 = vmatpush3.msra.mxu0 %v5569_v16 }
0x2225   : > { %9117 = vmatprep.subr.mxu0 %v10174_v0 }
0x22d5   : > { %v5530_v49 = vpop.f32.mrf.mxu0 }
0x22d6   : > { %v5531_v50 = vadd.f32 %v8424_v48, %v5530_v49  ;;  %v8442_v48 = vld [vmem:[#allocation10 + $0x1] ss:$0 sm:$0xff] }
0x22d7   : > { %v9065_v51 = vpop.f32.mrf.mxu0 }
0x22d8   : > { %v5534_v52 = vadd.f32 %v5531_v50, %v11045_v28  ;;  %v5565_v28 = vld [vmem:[#allocation18 + $0x8] sm:$0xff] }
0x22d9   : > { %9071 = vmatpush3.msra.mxu1 %v5565_v28 }
0x22da   : > { %v5537_v53 = vsel %vm1487_vm1, %v5534_v52, 0.0  ;;  %9072 = vmatprep.subr.mxu1 %v10174_v0 }
0x22db   : > { %5538 = vadd.xlane.f32.xlu1 %v5537_v53  ;;  %9073 = vmatpush3.msra.mxu1 %v5564_v61 }
0x22dc   : > { %9096 = vmatprep.subr.mxu1 %v10174_v0 }
0x2364   : > { %v5539_v54 = vpop.xlane.xlu1 %5538 }
0x2365   : > { %v5540_v55 = vmul.f32 0.03125, %v5539_v54 }
0x2367   : > { %v5541_v56 = vsub.f32 %v5534_v52, %v5540_v55 }
0x2369   : > { %v5542_v57 = vmul.f32 %v5541_v56, %v5541_v56 }
0x236b   : > { %v5543_v58 = vsel %vm1487_vm1, %v5542_v57, 0.0 }
0x236c   : > { %5544 = vadd.xlane.f32.xlu0 %v5543_v58 }
0x23f5   : > { %v5545_v4 = vpop.xlane.xlu0 %5544 }
0x23f6   : > { %v5546_v6 = vmul.f32 0.03125, %v5545_v4 }
0x23f8   : > { %v5547_v7 = vadd.f32 1e-05, %v5546_v6 }
0x23fa   : > { %9586 = vrsqrt.f32 %v5547_v7 }
0x2407   : > { %v9587_v8 = vpop.eup %9586 }
0x2408   : > { %v5549_v10 = vmul.f32 %v9587_v8, %v5541_v56 }
0x240a   : > { %v5556_v12 = vmul.f32 %v8426_v9, %v5549_v10 }
0x240c   : > { %v5563_v13 = vadd.f32 %v8427_v11, %v5556_v12 }
0x240e   : > { %9075 = vmatmul.mubr.msk.f32.vlgmr.msra.gmra.mxu1 %vm1487_vm1, %v5563_v13 }
0x240f   : > { %9104 = vmatprep.mubr.msk.f32.mxu1 %vm10175_vm0, %v10174_v0  ;;  %9097 = vmatpush3.msra.mxu1 %v8437_v34 }
0x2410   : > { %9098 = vmatprep.subr.mxu1 %v10174_v0 }
0x2411   : > { %9099 = vmatpush3.msra.mxu1 %v8436_v36 }
0x2412   : > { %9100 = vmatprep.subr.mxu1 %v10174_v0 }
0x2413   : > { %9101 = vmatpush3.msra.mxu1 %v8435_v37 }
0x2414   : > { %9102 = vmatprep.subr.mxu1 %v10174_v0 }
0x2415   : > { %9103 = vmatpush3.msra.mxu1 %v8434_v38 }
0x2416   : > { %9107 = vmatprep.subr.mxu1 %v10174_v0 }
0x24ce   : > { %v5653_v19 = vpop.f32.mrf.mxu1 }
0x24cf   : > { %v5654_v20 = vadd.f32 %v8428_v17, %v5653_v19 }
0x24d0   : > { %v9076_v21 = vpop.f32.mrf.mxu1 }
0x24d1   : > { %v5657_v22 = vmax.f32 %v5654_v20, 0.0 }
0x24d3   : > { %9094 = vmatmul.mubr.msk.f32.vlgmr.msra.gmra.mxu0 %vm2448_vm5, %v5657_v22 }
0x24d4   : > { %9119 = vmatprep.mubr.msk.f32.mxu0 %vm10175_vm0, %v10174_v0 }
0x2593   : > { %v5733_v24 = vpop.f32.mrf.mxu0 }
0x2594   : > { %v5734_v25 = vadd.f32 %v8430_v23, %v5733_v24 }
0x2595   : > { %v9095_v26 = vpop.f32.mrf.mxu0 }
0x2596   : > { %v5737_v27 = vadd.f32 %v5734_v25, %v5563_v13 }
0x2598   : > { %v5740_v29 = vsel %vm1487_vm1, %v5737_v27, 0.0 }
0x2599   : > { %5741 = vadd.xlane.f32.xlu0 %v5740_v29 }
0x2622   : > { %v5742_v30 = vpop.xlane.xlu0 %5741 }
0x2623   : > { %v5743_v31 = vmul.f32 0.03125, %v5742_v30 }
0x2625   : > { %v5744_v32 = vsub.f32 %v5737_v27, %v5743_v31 }
0x2627   : > { %v5745_v33 = vmul.f32 %v5744_v32, %v5744_v32 }
0x2629   : > { %v5746_v5 = vsel %vm1487_vm1, %v5745_v33, 0.0 }
0x262a   : > { %5747 = vadd.xlane.f32.xlu1 %v5746_v5 }
0x26b3   : > { %v5748_v39 = vpop.xlane.xlu1 %5747 }
0x26b4   : > { %v5749_v40 = vmul.f32 0.03125, %v5748_v39 }
0x26b6   : > { %v5750_v41 = vadd.f32 1e-05, %v5749_v40 }
0x26b8   : > { %9588 = vrsqrt.f32 %v5750_v41 }
0x26c5   : > { %v9589_v42 = vpop.eup %9588 }
0x26c6   : > { %v5752_v44 = vmul.f32 %v9589_v42, %v5744_v32 }
0x26c8   : > { %v5759_v46 = vmul.f32 %v8432_v43, %v5752_v44 }
0x26ca   : > { %v11171_v47 = vadd.f32 %v8433_v18, %v5759_v46  ;;  %v8441_v46 = vld [vmem:[%s11576_s9 + $0x38] sm:$0xff] }
0x26cc   : > { %9105 = vmatmul.mubr.msk.f32.vlgmr.msra.gmra.mxu1 %vm1487_vm1, %v11171_v47 }
0x26cd   : > { %9109 = vmatprep.mubr.msk.f32.mxu1 %vm10175_vm0, %v10174_v0 }
0x278c   : > { %v5856_v49 = vpop.f32.mrf.mxu1 }
0x278d   : > { %v11177_v50 = vadd.f32 %v8442_v48, %v5856_v49  ;;  %v8440_v48 = vld [vmem:[%s11576_s9 + $0x30] sm:$0xff]  ;;  %v8439_v49 = vld [vmem:[%s11576_s9 + $0x28] sm:$0xff] }
0x278e   : > { %v9106_v51 = vpop.f32.mrf.mxu1 }
0x278f   : > { %6026 = vrot.lane.b32.xlu1 %v11177_v50, %s11570_s4  ;;  %5861 = vrot.lane.b32.xlu0 %v11177_v50, %s11569_s3  ;;  %v8438_v51 = vld [vmem:[%s11576_s9 + $0x20] sm:$0xff] }
0x2793   : > { %6024 = vrot.lane.b32.xlu1 %v11177_v50, %s11571_s2  ;;  %6191 = vrot.lane.b32.xlu0 %v11177_v50, %s11572_s6 }
0x2797   : > { %6189 = vrot.lane.b32.xlu1 %v11177_v50, %s11573_s1  ;;  %6356 = vrot.lane.b32.xlu0 %v11177_v50, %s11574_s7 }
0x279b   : > { %6354 = vrot.lane.b32.xlu1 %v11177_v50, %s11575_s8 }
0x2801   : > { %v6027_v52 = vpop.permute.xlu1 %6026  ;;  %v5862_v53 = vpop.permute.xlu0 %5861 }
0x2802   : > { %9108 = vmatpush3.xpose.msk.msra.mxu1 %vm1564_vm2, %v5862_v53  ;;  %9118 = vmatpush3.xpose.msk.msra.mxu0 %vm1564_vm2, %v6027_v52 }
0x2803   : > { %9127 = vmatprep.subr.mxu0 %v10174_v0  ;;  %9112 = vmatprep.subr.mxu1 %v10174_v0 }
0x2805   : > { %v6025_v54 = vpop.permute.xlu1 %6024  ;;  %9110 = vmatmul.mubr.msk.f32.vlgmr.msra.gmra.mxu1 %vm1564_vm2, %v11177_v50  ;;  %v6192_v55 = vpop.permute.xlu0 %6191 }
0x2806   : > { %9120 = vmatmul.mubr.msk.f32.vlgmr.msra.gmra.mxu0 %vm1564_vm2, %v6025_v54  ;;  %9114 = vmatprep.mubr.msk.f32.mxu1 %vm10175_vm0, %v10174_v0 }
0x2807   : > { %9128 = vmatpush3.xpose.msk.msra.mxu0 %vm1564_vm2, %v6192_v55  ;;  %9129 = vmatprep.mubr.msk.f32.mxu0 %vm10175_vm0, %v10174_v0 }
0x2808   : > { %9137 = vmatprep.subr.mxu0 %v10174_v0 }
0x2809   : > { %v6190_v56 = vpop.permute.xlu1 %6189  ;;  %v6357_v57 = vpop.permute.xlu0 %6356 }
0x280a   : > { %9130 = vmatmul.mubr.msk.f32.vlgmr.msra.gmra.mxu0 %vm1564_vm2, %v6190_v56 }
0x280b   : > { %9138 = vmatpush3.xpose.msk.msra.mxu0 %vm1564_vm2, %v6357_v57  ;;  %9139 = vmatprep.mubr.msk.f32.mxu0 %vm10175_vm0, %v10174_v0 }
0x280c   : > { %9147 = vmatprep.subr.mxu0 %v10174_v0 }
0x280d   : > { %v6355_v58 = vpop.permute.xlu1 %6354 }
0x280e   : > { %9140 = vmatmul.mubr.msk.f32.vlgmr.msra.gmra.mxu0 %vm1564_vm2, %v6355_v58 }
0x280f   : > { %9155 = vmatprep.mubr.msk.f32.mxu0 %vm10175_vm0, %v10174_v0  ;;  %9148 = vmatpush3.msra.mxu0 %v8441_v46 }
0x2810   : > { %9149 = vmatprep.subr.mxu0 %v10174_v0 }
0x2811   : > { %9150 = vmatpush3.msra.mxu0 %v8440_v48 }
0x2812   : > { %9151 = vmatprep.subr.mxu0 %v10174_v0 }
0x2813   : > { %9152 = vmatpush3.msra.mxu0 %v8439_v49 }
0x2814   : > { %9153 = vmatprep.subr.mxu0 %v10174_v0 }
0x2815   : > { %9154 = vmatpush3.msra.mxu0 %v8438_v51 }
0x2816   : > { %9169 = vmatprep.subr.mxu0 %v10174_v0 }
0x28c5   : > { %v5933_v59 = vpop.f32.mrf.mxu1 }
0x28c6   : > { %v6098_v60 = vpop.f32.mrf.mxu0  ;;  %v5937_v28 = vsel %vm1564_vm2, %v5933_v59, -inf }
0x28c7   : > { %5938 = vmax.xlane.f32.xlu0 %v5937_v28  ;;  %v9111_v61 = vpop.f32.mrf.mxu1  ;;  %v6102_v62 = vsel %vm1564_vm2, %v6098_v60, -inf }
0x28c8   : > { %6103 = vmax.xlane.f32.xlu1 %v6102_v62  ;;  %v9121_v63 = vpop.f32.mrf.mxu0 }
0x28ca   : > { %v6263_v1 = vpop.f32.mrf.mxu0 }
0x28cb   : > { %v6267_v2 = vsel %vm1564_vm2, %v6263_v1, -inf }
0x28cc   : > { %6268 = vmax.xlane.f32.xlu0 %v6267_v2  ;;  %v9131_v3 = vpop.f32.mrf.mxu0 }
0x28ce   : > { %v6428_v4 = vpop.f32.mrf.mxu0 }
0x28cf   : > { %v6432_v6 = vsel %vm1564_vm2, %v6428_v4, -inf }
0x28d0   : > { %6433 = vmax.xlane.f32.xlu0 %v6432_v6  ;;  %v9141_v7 = vpop.f32.mrf.mxu0 }
0x28d9   : > { %5948 = vrot.lane.b32.xlu1 %v11177_v50, %s11560_s11 }
0x2950   : > { %v5939_v8 = vpop.xlane.xlu0 %5938 }
0x2951   : > { %v5940_v9 = vsub.f32 %v5933_v59, %v5939_v8  ;;  %v6104_v10 = vpop.xlane.xlu1 %6103  ;;  %v6648_v8 = vld [vmem:[#allocation13 + $0x30] sm:$0xff] }
0x2952   : > { %v6105_v11 = vsub.f32 %v6098_v60, %v6104_v10  ;;  %v6647_v10 = vld [vmem:[#allocation13 + $0x28] sm:$0xff] }
0x2953   : > { %v5941_v12 = vmul.f32 1.442695, %v5940_v9  ;;  %v6649_v9 = vld [vmem:[#allocation13 + $0x38] sm:$0xff] }
0x2954   : > { %v6106_v13 = vmul.f32 1.442695, %v6105_v11  ;;  %v6646_v11 = vld [vmem:[#allocation13 + $0x20] sm:$0xff] }
0x2955   : > { %9590 = vpow2.f32 %v5941_v12  ;;  %v5949_v14 = vpop.permute.xlu1 %5948  ;;  %v6269_v15 = vpop.xlane.xlu0 %6268 }
0x2956   : > { %9592 = vpow2.f32 %v6106_v13  ;;  %v6270_v16 = vsub.f32 %v6263_v1, %v6269_v15  ;;  %9113 = vmatpush3.msra.mxu1 %v5949_v14  ;;  %v8456_v1 = vld [vmem:[#allocation12 + $0x1] ss:$0 sm:$0xff] }
0x2957   : > { %9122 = vmatprep.subr.mxu1 %v10174_v0 }
0x2958   : > { %v6271_v17 = vmul.f32 1.442695, %v6270_v16  ;;  %v8464_v16 = vld [vmem:[%s11577_s10 + $0x1] ss:$0 sm:$0xff] }
0x2959   : > { %v6434_v19 = vpop.xlane.xlu0 %6433 }
0x295a   : > { %9594 = vpow2.f32 %v6271_v17  ;;  %v6435_v20 = vsub.f32 %v6428_v4, %v6434_v19 }
0x295c   : > { %v6436_v21 = vmul.f32 1.442695, %v6435_v20 }
0x295e   : > { %9596 = vpow2.f32 %v6436_v21 }
0x2962   : > { %v9591_v22 = vpop.eup %9590 }
0x2963   : > { %v9593_v23 = vpop.eup %9592  ;;  %v5943_v24 = vsel %vm1564_vm2, %v9591_v22, 0.0 }
0x2964   : > { %5944 = vadd.xlane.f32.xlu1 %v5943_v24  ;;  %v6108_v25 = vsel %vm1564_vm2, %v9593_v23, 0.0 }
0x2965   : > { %6109 = vadd.xlane.f32.xlu0 %v6108_v25 }
0x2967   : > { %v9595_v26 = vpop.eup %9594 }
0x2968   : > { %v6273_v27 = vsel %vm1564_vm2, %v9595_v26, 0.0 }
0x2969   : > { %6274 = vadd.xlane.f32.xlu1 %v6273_v27 }
0x296b   : > { %v9597_v29 = vpop.eup %9596 }
0x296c   : > { %v6438_v30 = vsel %vm1564_vm2, %v9597_v29, 0.0 }
0x296d   : > { %6439 = vadd.xlane.f32.xlu0 %v6438_v30 }
0x297a   : > { %6278 = vrot.lane.b32.xlu1 %v11177_v50, %s11561_s19 }
0x297e   : > { %6443 = vrot.lane.b32.xlu1 %v11177_v50, %s11562_s14 }
0x2983   : > { %6113 = vrot.lane.b32.xlu0 %v11177_v50, %s11559_s20 }
0x29ed   : > { %v5945_v31 = vpop.xlane.xlu1 %5944 }
0x29ee   : > { %9598 = vrcp.f32 %v5945_v31  ;;  %v6110_v32 = vpop.xlane.xlu0 %6109 }
0x29ef   : > { %9600 = vrcp.f32 %v6110_v32 }
0x29f2   : > { %v6275_v33 = vpop.xlane.xlu1 %6274 }
0x29f3   : > { %9602 = vrcp.f32 %v6275_v33 }
0x29f6   : > { %v6440_v5 = vpop.xlane.xlu0 %6439  ;;  %v6279_v39 = vpop.permute.xlu1 %6278 }
0x29f7   : > { %9604 = vrcp.f32 %v6440_v5 }
0x29fa   : > { %v6114_v38 = vpop.permute.xlu0 %6113  ;;  %v6444_v44 = vpop.permute.xlu1 %6443 }
0x29fb   : > { %v9599_v34 = vpop.eup %9598 }
0x29fc   : > { %v5947_v36 = vmul.f32 %v9599_v34, %v9591_v22  ;;  %v9601_v37 = vpop.eup %9600 }
0x29fd   : > { %v6112_v40 = vmul.f32 %v9601_v37, %v9593_v23 }
0x29fe   : > { %9115 = vmatmul.mubr.msk.f32.vlgmr.msra.gmra.mxu1 %vm1564_vm2, %v5947_v36 }
0x29ff   : > { %9123 = vmatpush3.msra.mxu1 %v6114_v38  ;;  %9124 = vmatprep.mubr.msk.f32.mxu1 %vm10175_vm0, %v10174_v0 }
0x2a00   : > { %9132 = vmatprep.subr.mxu1 %v10174_v0  ;;  %v9603_v41 = vpop.eup %9602 }
0x2a01   : > { %v6277_v42 = vmul.f32 %v9603_v41, %v9595_v26  ;;  %v8460_v26 = vld [vmem:[%s11578_s12 + $0x1] ss:$0 sm:$0xff] }
0x2a02   : > { %9125 = vmatmul.mubr.msk.f32.vlgmr.msra.gmra.mxu1 %vm1564_vm2, %v6112_v40 }
0x2a03   : > { %9133 = vmatpush3.msra.mxu1 %v6279_v39  ;;  %9134 = vmatprep.mubr.msk.f32.mxu1 %vm10175_vm0, %v10174_v0 }
0x2a04   : > { %9142 = vmatprep.subr.mxu1 %v10174_v0  ;;  %v9605_v43 = vpop.eup %9604 }
0x2a05   : > { %v6442_v18 = vmul.f32 %v9605_v43, %v9597_v29  ;;  %v8461_v29 = vld [vmem:[%s11579_s17 + $0x1] ss:$0 sm:$0xff] }
0x2a06   : > { %9135 = vmatmul.mubr.msk.f32.vlgmr.msra.gmra.mxu1 %vm1564_vm2, %v6277_v42 }
0x2a07   : > { %9143 = vmatpush3.msra.mxu1 %v6444_v44  ;;  %9144 = vmatprep.mubr.msk.f32.mxu1 %vm10175_vm0, %v10174_v0 }
0x2a08   : > { %9158 = vmatprep.subr.mxu1 %v10174_v0 }
0x2a0a   : > { %9145 = vmatmul.mubr.msk.f32.vlgmr.msra.gmra.mxu1 %vm1564_vm2, %v6442_v18 }
0x2a0b   : > { %9166 = vmatprep.mubr.msk.f32.mxu1 %vm10175_vm0, %v10174_v0  ;;  %9159 = vmatpush3.msra.mxu1 %v6649_v9 }
0x2a0c   : > { %9160 = vmatprep.subr.mxu1 %v10174_v0 }
0x2a0d   : > { %9161 = vmatpush3.msra.mxu1 %v6648_v8 }
0x2a0e   : > { %9162 = vmatprep.subr.mxu1 %v10174_v0 }
0x2a0f   : > { %9163 = vmatpush3.msra.mxu1 %v6647_v10 }
0x2a10   : > { %9164 = vmatprep.subr.mxu1 %v10174_v0 }
0x2a11   : > { %9165 = vmatpush3.msra.mxu1 %v6646_v11 }
0x2a12   : > { %9180 = vmatprep.subr.mxu1 %v10174_v0 }
0x2abe   : > { %v6020_v50 = vpop.f32.mrf.mxu1 }
0x2ac0   : > { %v9116_v52 = vpop.f32.mrf.mxu1 }
0x2ac2   : > { %v6185_v53 = vpop.f32.mrf.mxu1 }
0x2ac3   : > { %6520 = vrot.lane.b32.xlu0 %v6185_v53, %s11563_s26 }
0x2ac4   : > { %v9126_v54 = vpop.f32.mrf.mxu1 }
0x2ac6   : > { %v6350_v55 = vpop.f32.mrf.mxu1 }
0x2ac7   : > { %6524 = vrot.lane.b32.xlu1 %v6350_v55, %s11564_s16 }
0x2ac8   : > { %v9136_v56 = vpop.f32.mrf.mxu1 }
0x2aca   : > { %v6515_v57 = vpop.f32.mrf.mxu1 }
0x2acb   : > { %6528 = vrot.lane.b32.xlu0 %v6515_v57, %s11565_s15 }
0x2acc   : > { %v9146_v58 = vpop.f32.mrf.mxu1 }
0x2b35   : > { %v6521_v59 = vpop.permute.xlu0 %6520 }
0x2b36   : > { %v6531_v28 = vsel %vm1564_vm2, %v6020_v50, %v6521_v59 }
0x2b39   : > { %v6525_v60 = vpop.permute.xlu1 %6524 }
0x2b3a   : > { %v6532_v61 = vsel %vm2234_vm3, %v6531_v28, %v6525_v60 }
0x2b3d   : > { %v6529_v62 = vpop.permute.xlu0 %6528 }
0x2b3e   : > { %v6533_v63 = vsel %vm2236_vm4, %v6532_v61, %v6529_v62 }
0x2b3f   : > { %9156 = vmatmul.mubr.msk.f32.vlgmr.msra.gmra.mxu0 %vm1487_vm1, %v6533_v63 }
0x2b40   : > { %9177 = vmatprep.mubr.msk.f32.mxu0 %vm10175_vm0, %v10174_v0 }
0x2bff   : > { %v6609_v2 = vpop.f32.mrf.mxu0 }
0x2c00   : > { %v6610_v3 = vadd.f32 %v8456_v1, %v6609_v2 }
0x2c01   : > { %v9157_v4 = vpop.f32.mrf.mxu0 }
0x2c02   : > { %v6613_v6 = vadd.f32 %v6610_v3, %v11171_v47 }
0x2c04   : > { %v6618_v7 = vsel %vm1487_vm1, %v6613_v6, 0.0 }
0x2c05   : > { %6619 = vadd.xlane.f32.xlu1 %v6618_v7 }
0x2c16   : > { %6746 = vrot.lane.b32.xlu1 %v6648_v8, %s11569_s3 }
0x2c1a   : > { %6744 = vrot.lane.b32.xlu1 %v6647_v10, %s11569_s3 }
0x2c1e   : > { %6754 = vrot.lane.b32.xlu1 %v8464_v16, %s11569_s3 }
0x2c8e   : > { %v6620_v47 = vpop.xlane.xlu1 %6619 }
0x2c8f   : > { %v6621_v12 = vmul.f32 0.03125, %v6620_v47 }
0x2c91   : > { %v6622_v13 = vsub.f32 %v6613_v6, %v6621_v12 }
0x2c92   : > { %v6747_v19 = vpop.permute.xlu1 %6746 }
0x2c93   : > { %v6623_v14 = vmul.f32 %v6622_v13, %v6622_v13 }
0x2c95   : > { %v6624_v15 = vsel %vm1487_vm1, %v6623_v14, 0.0 }
0x2c96   : > { %6625 = vadd.xlane.f32.xlu0 %v6624_v15  ;;  %v6745_v23 = vpop.permute.xlu1 %6744 }
0x2c9a   : > { %v6755_v32 = vpop.permute.xlu1 %6754 }
0x2cac   : > { %6748 = vrot.lane.b32.xlu0 %v6649_v9, %s11569_s3 }
0x2cb0   : > { %6742 = vrot.lane.b32.xlu0 %v6646_v11, %s11569_s3 }
0x2d1f   : > { %v6626_v17 = vpop.xlane.xlu0 %6625 }
0x2d20   : > { %v6627_v20 = vmul.f32 0.03125, %v6626_v17 }
0x2d22   : > { %v6628_v21 = vadd.f32 1e-05, %v6627_v20 }
0x2d23   : > { %v6749_v22 = vpop.permute.xlu0 %6748 }
0x2d24   : > { %9606 = vrsqrt.f32 %v6628_v21  ;;  %9170 = vmatpush3.msra.mxu0 %v6749_v22 }
0x2d25   : > { %9171 = vmatprep.subr.mxu0 %v10174_v0 }
0x2d26   : > { %9172 = vmatpush3.msra.mxu0 %v6747_v19 }
0x2d27   : > { %9173 = vmatprep.subr.mxu0 %v10174_v0  ;;  %v6743_v24 = vpop.permute.xlu0 %6742 }
0x2d28   : > { %9174 = vmatpush3.msra.mxu0 %v6745_v23 }
0x2d29   : > { %9175 = vmatprep.subr.mxu0 %v10174_v0 }
0x2d2a   : > { %9176 = vmatpush3.msra.mxu0 %v6743_v24 }
0x2d2b   : > { %9178 = vmatmul.mubr.msk.f32.vlgmr.msra.gmra.mxu0 %vm1487_vm1, %v10928_v45  ;;  %9190 = vmatprep.subr.mxu0 %v10174_v0 }
0x2d2c   : > { %9192 = vmatprep.mubr.msk.f32.mxu0 %vm10175_vm0, %v10174_v0 }
0x2d31   : > { %v9607_v25 = vpop.eup %9606 }
0x2d32   : > { %v6630_v27 = vmul.f32 %v9607_v25, %v6622_v13 }
0x2d34   : > { %v6637_v30 = vmul.f32 %v8460_v26, %v6630_v27 }
0x2d36   : > { %v11286_v31 = vadd.f32 %v8461_v29, %v6637_v30 }
0x2d38   : > { %9167 = vmatmul.mubr.msk.f32.vlgmr.msra.gmra.mxu1 %vm1487_vm1, %v11286_v31 }
0x2d39   : > { %9182 = vmatprep.mubr.msk.f32.mxu1 %vm10175_vm0, %v10174_v0 }
0x2deb   : > { %v6823_v45 = vpop.f32.mrf.mxu0 }
0x2dec   : > { %v11292_v33 = vadd.f32 %v6823_v45, %v6755_v32 }
0x2ded   : > { %v9179_v5 = vpop.f32.mrf.mxu0 }
0x2dee   : > { %6992 = vrot.lane.b32.xlu0 %v11292_v33, %s11571_s2  ;;  %9181 = vmatpush3.xpose.msk.msra.mxu1 %vm1564_vm2, %v11292_v33  ;;  %v6655_v5 = vld [vmem:[#allocation15 + $0x30] sm:$0xff] }
0x2def   : > { %9185 = vmatprep.subr.mxu1 %v10174_v0 }
0x2df2   : > { %7157 = vrot.lane.b32.xlu0 %v11292_v33, %s11573_s1 }
0x2df6   : > { %7322 = vrot.lane.b32.xlu0 %v11292_v33, %s11575_s8 }
0x2df8   : > { %v6734_v34 = vpop.f32.mrf.mxu1 }
0x2df9   : > { %v6735_v36 = vadd.f32 %v8464_v16, %v6734_v34  ;;  %v6654_v34 = vld [vmem:[#allocation15 + $0x28] sm:$0xff] }
0x2dfa   : > { %v9168_v37 = vpop.f32.mrf.mxu1 }
0x2dfb   : > { %6990 = vrot.lane.b32.xlu1 %v6735_v36, %s11571_s2  ;;  %9183 = vmatmul.mubr.msk.f32.vlgmr.msra.gmra.mxu1 %vm1564_vm2, %v6735_v36 }
0x2dfc   : > { %9187 = vmatprep.mubr.msk.f32.mxu1 %vm10175_vm0, %v10174_v0 }
0x2dff   : > { %7155 = vrot.lane.b32.xlu1 %v6735_v36, %s11573_s1 }
0x2e03   : > { %7320 = vrot.lane.b32.xlu1 %v6735_v36, %s11575_s8  ;;  %v6653_v36 = vld [vmem:[#allocation15 + $0x20] sm:$0xff]  ;;  %s1468_s8 = scalar_lea.vmem %s10393_s5, %s10617_s18 }
0x2e60   : > { %v6993_v38 = vpop.permute.xlu0 %6992 }
0x2e61   : > { %9191 = vmatpush3.xpose.msk.msra.mxu0 %vm1564_vm2, %v6993_v38 }
0x2e62   : > { %9200 = vmatprep.subr.mxu0 %v10174_v0 }
0x2e64   : > { %v7158_v39 = vpop.permute.xlu0 %7157 }
0x2e68   : > { %v7323_v42 = vpop.permute.xlu0 %7322 }
0x2e6d   : > { %v6991_v40 = vpop.permute.xlu1 %6990 }
0x2e6e   : > { %9193 = vmatmul.mubr.msk.f32.vlgmr.msra.gmra.mxu0 %vm1564_vm2, %v6991_v40 }
0x2e6f   : > { %9201 = vmatpush3.xpose.msk.msra.mxu0 %vm1564_vm2, %v7158_v39  ;;  %9202 = vmatprep.mubr.msk.f32.mxu0 %vm10175_vm0, %v10174_v0 }
0x2e70   : > { %9210 = vmatprep.subr.mxu0 %v10174_v0 }
0x2e71   : > { %v7156_v41 = vpop.permute.xlu1 %7155 }
0x2e72   : > { %9203 = vmatmul.mubr.msk.f32.vlgmr.msra.gmra.mxu0 %vm1564_vm2, %v7156_v41 }
0x2e73   : > { %9211 = vmatpush3.xpose.msk.msra.mxu0 %vm1564_vm2, %v7323_v42  ;;  %9212 = vmatprep.mubr.msk.f32.mxu0 %vm10175_vm0, %v10174_v0 }
0x2e74   : > { %9220 = vmatprep.subr.mxu0 %v10174_v0 }
0x2e75   : > { %v7321_v43 = vpop.permute.xlu1 %7320 }
0x2e76   : > { %9213 = vmatmul.mubr.msk.f32.vlgmr.msra.gmra.mxu0 %vm1564_vm2, %v7321_v43 }
0x2e77   : > { %9228 = vmatprep.mubr.msk.f32.mxu0 %vm10175_vm0, %v10174_v0 }
0x2ebb   : > { %v6899_v44 = vpop.f32.mrf.mxu1 }
0x2ebc   : > { %v6903_v18 = vsel %vm1564_vm2, %v6899_v44, -inf }
0x2ebd   : > { %6904 = vmax.xlane.f32.xlu0 %v6903_v18  ;;  %v9184_v46 = vpop.f32.mrf.mxu1 }
0x2f2e   : > { %v7064_v48 = vpop.f32.mrf.mxu0 }
0x2f2f   : > { %v7068_v49 = vsel %vm1564_vm2, %v7064_v48, -inf }
0x2f30   : > { %7069 = vmax.xlane.f32.xlu1 %v7068_v49  ;;  %v9194_v50 = vpop.f32.mrf.mxu0 }
0x2f31   : > { %v8479_v50 = vld [vmem:[%s11580_s21 + $0x1] ss:$0 sm:$0xff] }
0x2f32   : > { %v7229_v51 = vpop.f32.mrf.mxu0 }
0x2f33   : > { %v7233_v52 = vsel %vm1564_vm2, %v7229_v51, -inf }
0x2f34   : > { %7234 = vmax.xlane.f32.xlu0 %v7233_v52  ;;  %v9204_v53 = vpop.f32.mrf.mxu0 }
0x2f36   : > { %v7394_v54 = vpop.f32.mrf.mxu0 }
0x2f37   : > { %v7398_v55 = vsel %vm1564_vm2, %v7394_v54, -inf }
0x2f38   : > { %7399 = vmax.xlane.f32.xlu0 %v7398_v55  ;;  %v9214_v56 = vpop.f32.mrf.mxu0 }
0x2f41   : > { %6914 = vrot.lane.b32.xlu1 %v11292_v33, %s11569_s3 }
0x2f46   : > { %v6905_v57 = vpop.xlane.xlu0 %6904 }
0x2f47   : > { %v6906_v58 = vsub.f32 %v6899_v44, %v6905_v57 }
0x2f49   : > { %v6907_v59 = vmul.f32 1.442695, %v6906_v58 }
0x2f4b   : > { %9608 = vpow2.f32 %v6907_v59 }
0x2f58   : > { %v9609_v60 = vpop.eup %9608 }
0x2f59   : > { %v6909_v28 = vsel %vm1564_vm2, %v9609_v60, 0.0 }
0x2f65   : > { %6910 = vadd.xlane.f32.xlu1 %v6909_v28  ;;  %v7615_v28 = vld [vmem:[#allocation18 + $0x38] sm:$0xff] }
0x2fb9   : > { %v7070_v61 = vpop.xlane.xlu1 %7069 }
0x2fba   : > { %v7071_v62 = vsub.f32 %v7064_v48, %v7070_v61  ;;  %v7614_v61 = vld [vmem:[#allocation18 + $0x30] sm:$0xff] }
0x2fbc   : > { %v7072_v63 = vmul.f32 1.442695, %v7071_v62  ;;  %v7612_v62 = vld [vmem:[#allocation18 + $0x20] sm:$0xff] }
0x2fbd   : > { %v6915_v1 = vpop.permute.xlu1 %6914  ;;  %v7235_v2 = vpop.xlane.xlu0 %7234 }
0x2fbe   : > { %9610 = vpow2.f32 %v7072_v63  ;;  %v7236_v3 = vsub.f32 %v7229_v51, %v7235_v2  ;;  %9186 = vmatpush3.msra.mxu1 %v6915_v1  ;;  %v8492_v63 = vld [vmem:[%s11581_s23 + $0x78] sm:$0xff]  ;;  %v8491_v1 = vld [vmem:[%s11581_s23 + $0x70] sm:$0xff]  ;;  %v8490_v2 = vld [vmem:[%s11581_s23 + $0x68] sm:$0xff] }
0x2fbf   : > { %9195 = vmatprep.subr.mxu1 %v10174_v0 }
0x2fc0   : > { %v7237_v4 = vmul.f32 1.442695, %v7236_v3  ;;  %v8489_v3 = vld [vmem:[%s11581_s23 + $0x60] sm:$0xff] }
0x2fc1   : > { %v7400_v6 = vpop.xlane.xlu0 %7399 }
0x2fc2   : > { %9612 = vpow2.f32 %v7237_v4  ;;  %v7401_v7 = vsub.f32 %v7394_v54, %v7400_v6  ;;  %v8488_v4 = vld [vmem:[%s11581_s23 + $0x58] sm:$0xff] }
0x2fc4   : > { %v7402_v8 = vmul.f32 1.442695, %v7401_v7 }
0x2fc6   : > { %9614 = vpow2.f32 %v7402_v8 }
0x2fcb   : > { %v9611_v9 = vpop.eup %9610 }
0x2fcc   : > { %v7074_v10 = vsel %vm1564_vm2, %v9611_v9, 0.0 }
0x2fcd   : > { %7075 = vadd.xlane.f32.xlu0 %v7074_v10  ;;  %v8482_v10 = vld [vmem:[#allocation16 + $0x1] ss:$0 sm:$0xff] }
0x2fcf   : > { %v9613_v11 = vpop.eup %9612 }
0x2fd0   : > { %v7239_v47 = vsel %vm1564_vm2, %v9613_v11, 0.0 }
0x2fd1   : > { %7240 = vadd.xlane.f32.xlu1 %v7239_v47  ;;  %v8483_v47 = vld [vmem:[%s11582_s24 + $0x1] ss:$0 sm:$0xff] }
0x2fd3   : > { %v9615_v12 = vpop.eup %9614 }
0x2fd4   : > { %v7404_v13 = vsel %vm1564_vm2, %v9615_v12, 0.0 }
0x2fd5   : > { %7405 = vadd.xlane.f32.xlu0 %v7404_v13 }
0x2fe2   : > { %7244 = vrot.lane.b32.xlu1 %v11292_v33, %s11572_s6 }
0x2fe6   : > { %7409 = vrot.lane.b32.xlu1 %v11292_v33, %s11574_s7 }
0x2feb   : > { %7079 = vrot.lane.b32.xlu0 %v11292_v33, %s11570_s4  ;;  %v6656_v33 = vld [vmem:[#allocation15 + $0x38] sm:$0xff] }
0x2fec   : > { %9221 = vmatpush3.msra.mxu0 %v6656_v33 }
0x2fed   : > { %9222 = vmatprep.subr.mxu0 %v10174_v0 }
0x2fee   : > { %v6911_v14 = vpop.xlane.xlu1 %6910  ;;  %9223 = vmatpush3.msra.mxu0 %v6655_v5 }
0x2fef   : > { %9616 = vrcp.f32 %v6911_v14  ;;  %9224 = vmatprep.subr.mxu0 %v10174_v0  ;;  %v8487_v14 = vld [vmem:[%s11581_s23 + $0x50] sm:$0xff] }
0x2ff0   : > { %9225 = vmatpush3.msra.mxu0 %v6654_v34 }
0x2ff1   : > { %9226 = vmatprep.subr.mxu0 %v10174_v0 }
0x2ff2   : > { %9227 = vmatpush3.msra.mxu0 %v6653_v36  ;;  %v7823_v36 = vld [vmem:[#allocation25 + $0x18] sm:$0xff] }
0x2ff3   : > { %9242 = vmatprep.subr.mxu0 %v10174_v0 }
0x2ffc   : > { %v9617_v15 = vpop.eup %9616 }
0x2ffd   : > { %v6913_v16 = vmul.f32 %v9617_v15, %v9609_v60  ;;  %v8486_v15 = vld [vmem:[%s11581_s23 + $0x48] sm:$0xff] }
0x2fff   : > { %9188 = vmatmul.mubr.msk.f32.vlgmr.msra.gmra.mxu1 %vm1564_vm2, %v6913_v16  ;;  %v8485_v16 = vld [vmem:[%s11581_s23 + $0x40] sm:$0xff] }
0x3000   : > { %9197 = vmatprep.mubr.msk.f32.mxu1 %vm10175_vm0, %v10174_v0 }
0x3056   : > { %v7076_v17 = vpop.xlane.xlu0 %7075 }
0x3057   : > { %9618 = vrcp.f32 %v7076_v17  ;;  %v8494_v17 = vld [vmem:[%s11583_s25 + $0x1] ss:$0 sm:$0xff] }
0x305a   : > { %v7241_v19 = vpop.xlane.xlu1 %7240 }
0x305b   : > { %9620 = vrcp.f32 %v7241_v19 }
0x305e   : > { %v7406_v20 = vpop.xlane.xlu0 %7405  ;;  %v7245_v23 = vpop.permute.xlu1 %7244 }
0x305f   : > { %9622 = vrcp.f32 %v7406_v20 }
0x3062   : > { %v7080_v21 = vpop.permute.xlu0 %7079  ;;  %v7410_v27 = vpop.permute.xlu1 %7409 }
0x3063   : > { %9196 = vmatpush3.msra.mxu1 %v7080_v21 }
0x3064   : > { %v9619_v22 = vpop.eup %9618  ;;  %9205 = vmatprep.subr.mxu1 %v10174_v0 }
0x3065   : > { %v7078_v24 = vmul.f32 %v9619_v22, %v9611_v9 }
0x3067   : > { %9198 = vmatmul.mubr.msk.f32.vlgmr.msra.gmra.mxu1 %vm1564_vm2, %v7078_v24 }
0x3068   : > { %v9621_v25 = vpop.eup %9620  ;;  %9206 = vmatpush3.msra.mxu1 %v7245_v23  ;;  %9207 = vmatprep.mubr.msk.f32.mxu1 %vm10175_vm0, %v10174_v0  ;;  %v8496_v23 = vld [vmem:[%s11584_s27 + $0x1] ss:$0 sm:$0xff] }
0x3069   : > { %9215 = vmatprep.subr.mxu1 %v10174_v0  ;;  %v7243_v26 = vmul.f32 %v9621_v25, %v9613_v11 }
0x306b   : > { %9208 = vmatmul.mubr.msk.f32.vlgmr.msra.gmra.mxu1 %vm1564_vm2, %v7243_v26 }
0x306c   : > { %v9623_v29 = vpop.eup %9622  ;;  %9216 = vmatpush3.msra.mxu1 %v7410_v27  ;;  %9217 = vmatprep.mubr.msk.f32.mxu1 %vm10175_vm0, %v10174_v0 }
0x306d   : > { %v7408_v30 = vmul.f32 %v9623_v29, %v9615_v12  ;;  %9231 = vmatprep.subr.mxu1 %v10174_v0 }
0x306f   : > { %9218 = vmatmul.mubr.msk.f32.vlgmr.msra.gmra.mxu1 %vm1564_vm2, %v7408_v30 }
0x3070   : > { %9239 = vmatprep.mubr.msk.f32.mxu1 %vm10175_vm0, %v10174_v0  ;;  %9232 = vmatpush3.msra.mxu1 %v7615_v28 }
0x3071   : > { %9233 = vmatprep.subr.mxu1 %v10174_v0 }
0x3072   : > { %9234 = vmatpush3.msra.mxu1 %v7614_v61 }
0x3073   : > { %9235 = vmatprep.subr.mxu1 %v10174_v0 }
0x30bf   : > { %v6986_v32 = vpop.f32.mrf.mxu1 }
0x30c1   : > { %v9189_v45 = vpop.f32.mrf.mxu1 }
0x3127   : > { %v7151_v37 = vpop.f32.mrf.mxu1 }
0x3128   : > { %7486 = vrot.lane.b32.xlu0 %v7151_v37, %s11563_s26  ;;  %v7822_v37 = vld [vmem:[#allocation25 + $0x10] sm:$0xff] }
0x3129   : > { %v9199_v38 = vpop.f32.mrf.mxu1 }
0x312a   : > { %v7821_v38 = vld [vmem:[#allocation25 + $0x8] sm:$0xff] }
0x312b   : > { %v7316_v39 = vpop.f32.mrf.mxu1 }
0x312c   : > { %7490 = vrot.lane.b32.xlu1 %v7316_v39, %s11564_s16 }
0x312d   : > { %v9209_v40 = vpop.f32.mrf.mxu1 }
0x312f   : > { %v7481_v41 = vpop.f32.mrf.mxu1 }
0x3130   : > { %7494 = vrot.lane.b32.xlu0 %v7481_v41, %s11565_s15 }
0x3131   : > { %v9219_v42 = vpop.f32.mrf.mxu1 }
0x319a   : > { %v7487_v43 = vpop.permute.xlu0 %7486 }
0x319b   : > { %v7497_v18 = vsel %vm1564_vm2, %v6986_v32, %v7487_v43  ;;  %v8498_v43 = vld [vmem:[#allocation19 + $0x1] ss:$0 sm:$0xff] }
0x319e   : > { %v7491_v44 = vpop.permute.xlu1 %7490 }
0x319f   : > { %v7498_v46 = vsel %vm2234_vm3, %v7497_v18, %v7491_v44  ;;  %v8499_v18 = vld [vmem:[#allocation21 + $0x1] ss:$0 sm:$0xff] }
0x31a2   : > { %v7495_v48 = vpop.permute.xlu0 %7494 }
0x31a3   : > { %v7499_v49 = vsel %vm2236_vm4, %v7498_v46, %v7495_v48 }
0x31a4   : > { %9229 = vmatmul.mubr.msk.f32.vlgmr.msra.gmra.mxu0 %vm1487_vm1, %v7499_v49  ;;  %v8500_v49 = vld [vmem:[#allocation27] ss:$0 sm:$0xff] }
0x31a5   : > { %9258 = vmatprep.mubr.msk.f32.mxu0 %vm10175_vm0, %v10174_v0  ;;  %9243 = vmatpush3.msra.mxu0 %v8492_v63 }
0x31a6   : > { %9244 = vmatprep.subr.mxu0 %v10174_v0 }
0x31a7   : > { %9245 = vmatpush3.msra.mxu0 %v8491_v1 }
0x31a8   : > { %9246 = vmatprep.subr.mxu0 %v10174_v0 }
0x31a9   : > { %9247 = vmatpush3.msra.mxu0 %v8490_v2 }
0x31aa   : > { %9248 = vmatprep.subr.mxu0 %v10174_v0 }
0x31ab   : > { %9249 = vmatpush3.msra.mxu0 %v8489_v3 }
0x31ac   : > { %9250 = vmatprep.subr.mxu0 %v10174_v0 }
0x31ad   : > { %9251 = vmatpush3.msra.mxu0 %v8488_v4 }
0x31ae   : > { %9252 = vmatprep.subr.mxu0 %v10174_v0 }
0x31af   : > { %9253 = vmatpush3.msra.mxu0 %v8487_v14 }
0x31b0   : > { %9254 = vmatprep.subr.mxu0 %v10174_v0 }
0x31b1   : > { %9255 = vmatpush3.msra.mxu0 %v8486_v15 }
0x31b2   : > { %9256 = vmatprep.subr.mxu0 %v10174_v0 }
0x31b3   : > { %9257 = vmatpush3.msra.mxu0 %v8485_v16 }
0x3264   : > { %v7575_v51 = vpop.f32.mrf.mxu0 }
0x3265   : > { %v7576_v52 = vadd.f32 %v8479_v50, %v7575_v51 }
0x3266   : > { %v9230_v53 = vpop.f32.mrf.mxu0 }
0x3267   : > { %v7579_v54 = vadd.f32 %v7576_v52, %v11286_v31  ;;  %v7613_v31 = vld [vmem:[#allocation18 + $0x28] sm:$0xff] }
0x3268   : > { %9236 = vmatpush3.msra.mxu1 %v7613_v31 }
0x3269   : > { %v7584_v55 = vsel %vm1487_vm1, %v7579_v54, 0.0  ;;  %9237 = vmatprep.subr.mxu1 %v10174_v0 }
0x326a   : > { %7585 = vadd.xlane.f32.xlu1 %v7584_v55  ;;  %9238 = vmatpush3.msra.mxu1 %v7612_v62 }
0x326b   : > { %9261 = vmatprep.subr.mxu1 %v10174_v0 }
0x32f3   : > { %v7586_v56 = vpop.xlane.xlu1 %7585 }
0x32f4   : > { %v7587_v57 = vmul.f32 0.03125, %v7586_v56 }
0x32f6   : > { %v7588_v58 = vsub.f32 %v7579_v54, %v7587_v57 }
0x32f8   : > { %v7589_v59 = vmul.f32 %v7588_v58, %v7588_v58 }
0x32fa   : > { %v7590_v60 = vsel %vm1487_vm1, %v7589_v59, 0.0 }
0x32fb   : > { %7591 = vadd.xlane.f32.xlu0 %v7590_v60 }
0x3384   : > { %v7592_v6 = vpop.xlane.xlu0 %7591 }
0x3385   : > { %v7593_v7 = vmul.f32 0.03125, %v7592_v6 }
0x3387   : > { %v7594_v8 = vadd.f32 1e-05, %v7593_v7 }
0x3389   : > { %9624 = vrsqrt.f32 %v7594_v8 }
0x3396   : > { %v9625_v9 = vpop.eup %9624 }
0x3397   : > { %v7596_v11 = vmul.f32 %v9625_v9, %v7588_v58 }
0x3399   : > { %v7603_v12 = vmul.f32 %v8482_v10, %v7596_v11 }
0x339b   : > { %v7610_v13 = vadd.f32 %v8483_v47, %v7603_v12 }
0x339d   : > { %9240 = vmatmul.mubr.msk.f32.vlgmr.msra.gmra.mxu1 %vm1487_vm1, %v7610_v13 }
0x339e   : > { %9269 = vmatprep.mubr.msk.f32.mxu1 %vm10175_vm0, %v10174_v0  ;;  %9262 = vmatpush3.msra.mxu1 %v7823_v36 }
0x339f   : > { %9263 = vmatprep.subr.mxu1 %v10174_v0 }
0x33a0   : > { %9264 = vmatpush3.msra.mxu1 %v7822_v37 }
0x33a1   : > { %9265 = vmatprep.subr.mxu1 %v10174_v0 }
0x33a2   : > { %9266 = vmatpush3.msra.mxu1 %v7821_v38 }
0x33a3   : > { %9267 = vmatprep.subr.mxu1 %v10174_v0 }
0x345d   : > { %v7704_v19 = vpop.f32.mrf.mxu1 }
0x345e   : > { %v7705_v20 = vadd.f32 %v8494_v17, %v7704_v19 }
0x345f   : > { %v9241_v21 = vpop.f32.mrf.mxu1 }
0x3460   : > { %v7708_v22 = vmax.f32 %v7705_v20, 0.0 }
0x3462   : > { %9259 = vmatmul.mubr.msk.f32.vlgmr.msra.gmra.mxu0 %vm2448_vm5, %v7708_v22 }
0x3522   : > { %v7784_v24 = vpop.f32.mrf.mxu0 }
0x3523   : > { %v7785_v25 = vadd.f32 %v8496_v23, %v7784_v24 }
0x3524   : > { %v9260_v26 = vpop.f32.mrf.mxu0 }
0x3525   : > { %v7788_v27 = vadd.f32 %v7785_v25, %v7610_v13 }
0x3527   : > { %v7793_v29 = vsel %vm1487_vm1, %v7788_v27, 0.0 }
0x3528   : > { %7794 = vadd.xlane.f32.xlu0 %v7793_v29 }
0x353e   : > { %7908 = vrot.lane.b32.xlu0 %v10913_v35, %s11569_s3  ;;  %v7820_v35 = vld [vmem:[#allocation25] sm:$0xff]  ;;  %s1456_s3 = scalar_lea.vmem %s10378_s13, %s10617_s18 }
0x353f   : > { %9268 = vmatpush3.msra.mxu1 %v7820_v35 }
0x35b1   : > { %v7795_v30 = vpop.xlane.xlu0 %7794 }
0x35b2   : > { %v7796_v32 = vmul.f32 0.03125, %v7795_v30 }
0x35b4   : > { %v7797_v45 = vsub.f32 %v7788_v27, %v7796_v32 }
0x35b5   : > { %v7909_v33 = vpop.permute.xlu0 %7908 }
0x35b6   : > { %7911 = vst.msk [vmem:[%s1468_s8] sm:$0xff] %vm1487_vm1, %v7909_v33  ;;  %v7798_v5 = vmul.f32 %v7797_v45, %v7797_v45 }
0x35b8   : > { %v7799_v34 = vsel %vm1487_vm1, %v7798_v5, 0.0 }
0x35b9   : > { %7800 = vadd.xlane.f32.xlu1 %v7799_v34 }
0x3642   : > { %v7801_v39 = vpop.xlane.xlu1 %7800 }
0x3643   : > { %v7802_v40 = vmul.f32 0.03125, %v7801_v39 }
0x3645   : > { %v7803_v41 = vadd.f32 1e-05, %v7802_v40 }
0x3647   : > { %9626 = vrsqrt.f32 %v7803_v41 }
0x3654   : > { %v9627_v42 = vpop.eup %9626 }
0x3655   : > { %v7805_v44 = vmul.f32 %v9627_v42, %v7797_v45 }
0x3657   : > { %v7812_v46 = vmul.f32 %v8498_v43, %v7805_v44 }
0x3659   : > { %v7819_v48 = vadd.f32 %v8499_v18, %v7812_v46 }
0x365b   : > { %9270 = vmatmul.mubr.msk.f32.vlgmr.msra.gmra.mxu1 %vm1487_vm1, %v7819_v48 }
0x371b   : > { %v7900_v50 = vpop.f32.mrf.mxu1 }
0x371c   : > { %v7901_v51 = vadd.f32 %v8500_v49, %v7900_v50 }
0x371d   : > { %v9271_v52 = vpop.f32.mrf.mxu1 }
0x371e   : > { %7904 = vst.msk [vmem:[%s1456_s3] sm:$0xff] %vm1487_vm1, %v7901_v51 }
0x371f PF: > { %s99_s22 = sadd.s32 1, %s10112_s22  }
0x3720   : > { %p96_p5 = scmp.ge.s32.totalorder %s99_s22, 4  }
0x3722   :  { %98 = sbr.rel (!%p96_p5) target bundleno = 90 (0x5a), region = 371 }
0x3727   :  { %7973 = vsyncpa [#allocation3], 1 }
0x3728   :  { %7975 = vsyncpa [#allocation3 + $0x1], 1 }
0x3729   :  { %7976 = vsyncpa [#allocation5], 1 }
0x372a   :  { %7977 = vsyncpa [#allocation8], 1 }
0x372b   :  { %7978 = vsyncpa [#allocation11], 1 }
0x372c   :  { %7979 = vsyncpa [#allocation14], 1 }
0x372d   :  { %7980 = vsyncpa [#allocation17], 1 }
0x372e   :  { %7981 = vsyncpa [#allocation20], 1 }
0x372f   :  { %7982 = vsyncpa [#allocation23], 1 }
0x3730   :  { %7983 = vsyncpa [#allocation26], 1 }

</bundles_post_ra>
